<compile_context>
chip_gen: v7x
topology: tpu7x:2x2x1
jax: 0.10.0
libtpu: 0.0.40
codegen_flags: <defaults>
</compile_context>

<pallas_src>
import jax
import jax.numpy as jnp
from jax.experimental import pallas as pl
from jax.experimental.pallas import tpu as pltpu

LANE = 128


def _mlp_kernel(z_ref,
                w1_ref, b1_ref,
                w2_ref, b2_ref,
                w3_ref, b3_ref,
                w4_ref, b4_ref,
                w5_ref, b5_ref,
                out_ref):
    """Fused 5-layer MLP: (Linear+ReLU) x4 -> Linear, all operands in VMEM.

    Weights arrive in bf16; each matmul accumulates in f32 on the MXU, and
    bias-add / ReLU are done in f32 on the VPU.
    """
    cdt = w1_ref.dtype  # MXU compute dtype (bf16)

    h = jnp.dot(z_ref[...].astype(cdt), w1_ref[...],
                preferred_element_type=jnp.float32) + b1_ref[...]
    h = jnp.maximum(h, 0.0)

    h = jnp.dot(h.astype(cdt), w2_ref[...],
                preferred_element_type=jnp.float32) + b2_ref[...]
    h = jnp.maximum(h, 0.0)

    h = jnp.dot(h.astype(cdt), w3_ref[...],
                preferred_element_type=jnp.float32) + b3_ref[...]
    h = jnp.maximum(h, 0.0)

    h = jnp.dot(h.astype(cdt), w4_ref[...],
                preferred_element_type=jnp.float32) + b4_ref[...]
    h = jnp.maximum(h, 0.0)

    h = jnp.dot(h.astype(cdt), w5_ref[...],
                preferred_element_type=jnp.float32) + b5_ref[...]

    out_ref[...] = h.astype(out_ref.dtype)


def _round_up(x, m):
    return ((x + m - 1) // m) * m


def bary_transform_forward(z, params, *, block_m=256,
                           weight_dtype=jnp.bfloat16):
    """Pallas forward pass of BaryTransformModel.

    z: (B, in_dim) float32
    params: dict with w1..w5 transposed to (in, out) and b1..b5 of shape (1, out),
            all float32 (cast to `weight_dtype` here for the MXU).

    block_m: 256 matches the v6e/v7x 256x256 MXU tile; use 128 on v5e.
    The batch is zero-padded to a multiple of block_m (tail handled by padding
    + final slice) and the narrow in/out feature dim is lane-padded to 128.
    """
    B, in_dim = z.shape
    hidden = params["w1"].shape[1]

    in_dim_p = _round_up(max(in_dim, LANE), LANE)
    B_p = _round_up(max(B, block_m), block_m)

    # ---- pad / cast operands (lane-dense in/out, bf16 weights) -------------
    z_p = jnp.pad(z, ((0, B_p - B), (0, in_dim_p - in_dim)))

    w1 = jnp.pad(params["w1"], ((0, in_dim_p - in_dim), (0, 0))).astype(weight_dtype)
    w2 = params["w2"].astype(weight_dtype)
    w3 = params["w3"].astype(weight_dtype)
    w4 = params["w4"].astype(weight_dtype)
    w5 = jnp.pad(params["w5"], ((0, 0), (0, in_dim_p - in_dim))).astype(weight_dtype)

    b1 = params["b1"].astype(jnp.float32)
    b2 = params["b2"].astype(jnp.float32)
    b3 = params["b3"].astype(jnp.float32)
    b4 = params["b4"].astype(jnp.float32)
    b5 = jnp.pad(params["b5"], ((0, 0), (0, in_dim_p - in_dim))).astype(jnp.float32)

    grid = (B_p // block_m,)

    def z_map(i):
        return (i, 0)

    def full_map(i):
        # Constant block index: weights/biases are fetched once and stay
        # resident in VMEM across the whole batch grid.
        return (0, 0)

    w_spec = lambda shp: pl.BlockSpec(shp, full_map)

    in_specs = [
        pl.BlockSpec((block_m, in_dim_p), z_map),
        w_spec((in_dim_p, hidden)), w_spec((1, hidden)),
        w_spec((hidden, hidden)), w_spec((1, hidden)),
        w_spec((hidden, hidden)), w_spec((1, hidden)),
        w_spec((hidden, hidden)), w_spec((1, hidden)),
        w_spec((hidden, in_dim_p)), w_spec((1, in_dim_p)),
    ]
    out_spec = pl.BlockSpec((block_m, in_dim_p), z_map)

    out_p = pl.pallas_call(
        _mlp_kernel,
        out_shape=jax.ShapeDtypeStruct((B_p, in_dim_p), z.dtype),
        grid_spec=pltpu.PrefetchScalarGridSpec(
            num_scalar_prefetch=0,
            grid=grid,
            in_specs=in_specs,
            out_specs=out_spec,
        ),
        compiler_params=pltpu.CompilerParams(
            dimension_semantics=("parallel",),      # batch axis -> megacore on v7x
            vmem_limit_bytes=32 * 1024 * 1024,      # comfortable on v5e/v6e/v7x
        ),
    )(z_p,
      w1, b1, w2, b2, w3, b3, w4, b4, w5, b5)

    return out_p[:B, :in_dim]


def init_params(key, in_dim):
    """Deterministic init matching _init_weights: W ~ N(0, 0.02), b = 0.

    Weights are stored already transposed to (in_features, out_features)."""
    hidden = max(512, 2 * in_dim)
    dims = [(in_dim, hidden), (hidden, hidden), (hidden, hidden),
            (hidden, hidden), (hidden, in_dim)]
    params = {}
    keys = jax.random.split(key, len(dims))
    for idx, ((d_in, d_out), k) in enumerate(zip(dims, keys), start=1):
        params[f"w{idx}"] = 0.02 * jax.random.normal(k, (d_in, d_out), jnp.float32)
        params[f"b{idx}"] = jnp.zeros((1, d_out), jnp.float32)
    return params


def reference_forward(z, params):
    """Original-module (f32) semantics for validation."""
    h = z
    for i in range(1, 5):
        h = jnp.maximum(h @ params[f"w{i}"] + params[f"b{i}"], 0.0)
    return h @ params["w5"] + params["b5"]


def _check(out, ref, tag):
    assert out.shape == ref.shape, (tag, out.shape, ref.shape)
    err = float(jnp.max(jnp.abs(out - ref)))
    scale = float(jnp.max(jnp.abs(ref)))
    # bf16 weights/activations with f32 accumulation: a few % relative error
    # at most; gross kernel bugs would blow far past this.
    assert err <= 5e-2 * scale + 1e-5, (tag, err, scale)


if __name__ == "__main__":
    key = jax.random.PRNGKey(0)
    k_param, k_z1, k_z2 = jax.random.split(key, 3)

    in_dim = 32          # model input dim -> hidden = max(512, 64) = 512
    params = init_params(k_param, in_dim)

    # Case 1: tiny batch (internally padded up to one 256-row block).
    z1 = jax.random.normal(k_z1, (8, in_dim), jnp.float32)
    out1 = jax.block_until_ready(bary_transform_forward(z1, params))
    _check(out1, reference_forward(z1, params), "small-batch")

    # Case 2: batch not a multiple of block_m, multi-step grid (v5e-style tile).
    z2 = jax.random.normal(k_z2, (300, in_dim), jnp.float32)
    out2 = jax.block_until_ready(bary_transform_forward(z2, params, block_m=128))
    _check(out2, reference_forward(z2, params), "tail-batch")

    print("KERNEL_OK")
</pallas_src>

<mosaic_0001>
module attributes {stable_mosaic.version = 11 : i64} {
  func.func @_mlp_kernel(%arg0: i32, %arg1: memref<256x128xf32, #tpu.memory_space<vmem>>, %arg2: memref<128x512xbf16, #tpu.memory_space<vmem>>, %arg3: memref<1x512xf32, #tpu.memory_space<vmem>>, %arg4: memref<512x512xbf16, #tpu.memory_space<vmem>>, %arg5: memref<1x512xf32, #tpu.memory_space<vmem>>, %arg6: memref<512x512xbf16, #tpu.memory_space<vmem>>, %arg7: memref<1x512xf32, #tpu.memory_space<vmem>>, %arg8: memref<512x512xbf16, #tpu.memory_space<vmem>>, %arg9: memref<1x512xf32, #tpu.memory_space<vmem>>, %arg10: memref<512x128xbf16, #tpu.memory_space<vmem>>, %arg11: memref<1x128xf32, #tpu.memory_space<vmem>>, %arg12: memref<256x128xf32, #tpu.memory_space<vmem>>) attributes {dimension_semantics = [#tpu.dimension_semantics<parallel>], iteration_bounds = array<i64: 1>, scalar_prefetch = 0 : i64, scratch_operands = 0 : i64, tpu.core_type = #tpu.core_type<tc>, window_params = [{transform_indices = @transform_0, window_bounds = array<i64: 256, 128>}, {pipeline_mode = #tpu.pipeline_mode<synchronous>, transform_indices = @transform_1, window_bounds = array<i64: 128, 512>}, {pipeline_mode = #tpu.pipeline_mode<synchronous>, transform_indices = @transform_2, window_bounds = array<i64: 1, 512>}, {pipeline_mode = #tpu.pipeline_mode<synchronous>, transform_indices = @transform_3, window_bounds = array<i64: 512, 512>}, {pipeline_mode = #tpu.pipeline_mode<synchronous>, transform_indices = @transform_4, window_bounds = array<i64: 1, 512>}, {pipeline_mode = #tpu.pipeline_mode<synchronous>, transform_indices = @transform_5, window_bounds = array<i64: 512, 512>}, {pipeline_mode = #tpu.pipeline_mode<synchronous>, transform_indices = @transform_6, window_bounds = array<i64: 1, 512>}, {pipeline_mode = #tpu.pipeline_mode<synchronous>, transform_indices = @transform_7, window_bounds = array<i64: 512, 512>}, {pipeline_mode = #tpu.pipeline_mode<synchronous>, transform_indices = @transform_8, window_bounds = array<i64: 1, 512>}, {pipeline_mode = #tpu.pipeline_mode<synchronous>, transform_indices = @transform_9, window_bounds = array<i64: 512, 128>}, {pipeline_mode = #tpu.pipeline_mode<synchronous>, transform_indices = @transform_10, window_bounds = array<i64: 1, 128>}, {transform_indices = @transform_11, window_bounds = array<i64: 256, 128>}]} {
    %c0 = arith.constant 0 : index
    %c0_0 = arith.constant 0 : index
    %0 = vector.load %arg1[%c0, %c0_0] : memref<256x128xf32, #tpu.memory_space<vmem>>, vector<256x128xf32>
    %1 = arith.truncf %0 : vector<256x128xf32> to vector<256x128xbf16>
    %c0_1 = arith.constant 0 : index
    %c0_2 = arith.constant 0 : index
    %2 = vector.load %arg2[%c0_1, %c0_2] : memref<128x512xbf16, #tpu.memory_space<vmem>>, vector<128x512xbf16>
    %cst = arith.constant dense<0.000000e+00> : vector<256x512xf32>
    %3 = tpu.matmul %1, %2, %cst {dimension_numbers = #tpu.dot_dimension_numbers<[1], [0], [0], [1], [0, 0, 1, 1], [], []>} : vector<256x128xbf16>, vector<128x512xbf16>, vector<256x512xf32> -> vector<256x512xf32>
    %c0_3 = arith.constant 0 : index
    %c0_4 = arith.constant 0 : index
    %4 = vector.load %arg3[%c0_3, %c0_4] : memref<1x512xf32, #tpu.memory_space<vmem>>, vector<1x512xf32>
    %5 = vector.broadcast %4 : vector<1x512xf32> to vector<256x512xf32>
    %6 = arith.addf %3, %5 : vector<256x512xf32>
    %cst_5 = arith.constant 0.000000e+00 : f32
    %7 = vector.broadcast %cst_5 : f32 to vector<256x512xf32>
    %8 = arith.maximumf %6, %7 : vector<256x512xf32>
    %9 = arith.truncf %8 : vector<256x512xf32> to vector<256x512xbf16>
    %c0_6 = arith.constant 0 : index
    %c0_7 = arith.constant 0 : index
    %10 = vector.load %arg4[%c0_6, %c0_7] : memref<512x512xbf16, #tpu.memory_space<vmem>>, vector<512x512xbf16>
    %cst_8 = arith.constant dense<0.000000e+00> : vector<256x512xf32>
    %11 = tpu.matmul %9, %10, %cst_8 {dimension_numbers = #tpu.dot_dimension_numbers<[1], [0], [0], [1], [0, 0, 1, 1], [], []>} : vector<256x512xbf16>, vector<512x512xbf16>, vector<256x512xf32> -> vector<256x512xf32>
    %c0_9 = arith.constant 0 : index
    %c0_10 = arith.constant 0 : index
    %12 = vector.load %arg5[%c0_9, %c0_10] : memref<1x512xf32, #tpu.memory_space<vmem>>, vector<1x512xf32>
    %13 = vector.broadcast %12 : vector<1x512xf32> to vector<256x512xf32>
    %14 = arith.addf %11, %13 : vector<256x512xf32>
    %cst_11 = arith.constant 0.000000e+00 : f32
    %15 = vector.broadcast %cst_11 : f32 to vector<256x512xf32>
    %16 = arith.maximumf %14, %15 : vector<256x512xf32>
    %17 = arith.truncf %16 : vector<256x512xf32> to vector<256x512xbf16>
    %c0_12 = arith.constant 0 : index
    %c0_13 = arith.constant 0 : index
    %18 = vector.load %arg6[%c0_12, %c0_13] : memref<512x512xbf16, #tpu.memory_space<vmem>>, vector<512x512xbf16>
    %cst_14 = arith.constant dense<0.000000e+00> : vector<256x512xf32>
    %19 = tpu.matmul %17, %18, %cst_14 {dimension_numbers = #tpu.dot_dimension_numbers<[1], [0], [0], [1], [0, 0, 1, 1], [], []>} : vector<256x512xbf16>, vector<512x512xbf16>, vector<256x512xf32> -> vector<256x512xf32>
    %c0_15 = arith.constant 0 : index
    %c0_16 = arith.constant 0 : index
    %20 = vector.load %arg7[%c0_15, %c0_16] : memref<1x512xf32, #tpu.memory_space<vmem>>, vector<1x512xf32>
    %21 = vector.broadcast %20 : vector<1x512xf32> to vector<256x512xf32>
    %22 = arith.addf %19, %21 : vector<256x512xf32>
    %cst_17 = arith.constant 0.000000e+00 : f32
    %23 = vector.broadcast %cst_17 : f32 to vector<256x512xf32>
    %24 = arith.maximumf %22, %23 : vector<256x512xf32>
    %25 = arith.truncf %24 : vector<256x512xf32> to vector<256x512xbf16>
    %c0_18 = arith.constant 0 : index
    %c0_19 = arith.constant 0 : index
    %26 = vector.load %arg8[%c0_18, %c0_19] : memref<512x512xbf16, #tpu.memory_space<vmem>>, vector<512x512xbf16>
    %cst_20 = arith.constant dense<0.000000e+00> : vector<256x512xf32>
    %27 = tpu.matmul %25, %26, %cst_20 {dimension_numbers = #tpu.dot_dimension_numbers<[1], [0], [0], [1], [0, 0, 1, 1], [], []>} : vector<256x512xbf16>, vector<512x512xbf16>, vector<256x512xf32> -> vector<256x512xf32>
    %c0_21 = arith.constant 0 : index
    %c0_22 = arith.constant 0 : index
    %28 = vector.load %arg9[%c0_21, %c0_22] : memref<1x512xf32, #tpu.memory_space<vmem>>, vector<1x512xf32>
    %29 = vector.broadcast %28 : vector<1x512xf32> to vector<256x512xf32>
    %30 = arith.addf %27, %29 : vector<256x512xf32>
    %cst_23 = arith.constant 0.000000e+00 : f32
    %31 = vector.broadcast %cst_23 : f32 to vector<256x512xf32>
    %32 = arith.maximumf %30, %31 : vector<256x512xf32>
    %33 = arith.truncf %32 : vector<256x512xf32> to vector<256x512xbf16>
    %c0_24 = arith.constant 0 : index
    %c0_25 = arith.constant 0 : index
    %34 = vector.load %arg10[%c0_24, %c0_25] : memref<512x128xbf16, #tpu.memory_space<vmem>>, vector<512x128xbf16>
    %cst_26 = arith.constant dense<0.000000e+00> : vector<256x128xf32>
    %35 = tpu.matmul %33, %34, %cst_26 {dimension_numbers = #tpu.dot_dimension_numbers<[1], [0], [0], [1], [0, 0, 1, 1], [], []>} : vector<256x512xbf16>, vector<512x128xbf16>, vector<256x128xf32> -> vector<256x128xf32>
    %c0_27 = arith.constant 0 : index
    %c0_28 = arith.constant 0 : index
    %36 = vector.load %arg11[%c0_27, %c0_28] : memref<1x128xf32, #tpu.memory_space<vmem>>, vector<1x128xf32>
    %37 = vector.broadcast %36 : vector<1x128xf32> to vector<256x128xf32>
    %38 = arith.addf %35, %37 : vector<256x128xf32>
    %c0_29 = arith.constant 0 : index
    %c0_30 = arith.constant 0 : index
    %39 = vector.load %arg12[%c0_29, %c0_30] : memref<256x128xf32, #tpu.memory_space<vmem>>, vector<256x128xf32>
    tpu.vector_store %arg12[%c0_29, %c0_30], %38 {strides = array<i32>} : memref<256x128xf32, #tpu.memory_space<vmem>>, vector<256x128xf32>,
    return
  }
  func.func @transform_0(%arg0: i32) -> (i32, i32) {
    %c0_i32 = arith.constant 0 : i32
    %c0_i32_0 = arith.constant 0 : i32
    return %arg0, %c0_i32 : i32, i32
  }
  func.func @transform_1(%arg0: i32) -> (i32, i32) {
    %c0_i32 = arith.constant 0 : i32
    %c0_i32_0 = arith.constant 0 : i32
    %c0_i32_1 = arith.constant 0 : i32
    return %c0_i32, %c0_i32_0 : i32, i32
  }
  func.func @transform_2(%arg0: i32) -> (i32, i32) {
    %c0_i32 = arith.constant 0 : i32
    %c0_i32_0 = arith.constant 0 : i32
    %c0_i32_1 = arith.constant 0 : i32
    return %c0_i32, %c0_i32_0 : i32, i32
  }
  func.func @transform_3(%arg0: i32) -> (i32, i32) {
    %c0_i32 = arith.constant 0 : i32
    %c0_i32_0 = arith.constant 0 : i32
    %c0_i32_1 = arith.constant 0 : i32
    return %c0_i32, %c0_i32_0 : i32, i32
  }
  func.func @transform_4(%arg0: i32) -> (i32, i32) {
    %c0_i32 = arith.constant 0 : i32
    %c0_i32_0 = arith.constant 0 : i32
    %c0_i32_1 = arith.constant 0 : i32
    return %c0_i32, %c0_i32_0 : i32, i32
  }
  func.func @transform_5(%arg0: i32) -> (i32, i32) {
    %c0_i32 = arith.constant 0 : i32
    %c0_i32_0 = arith.constant 0 : i32
    %c0_i32_1 = arith.constant 0 : i32
    return %c0_i32, %c0_i32_0 : i32, i32
  }
  func.func @transform_6(%arg0: i32) -> (i32, i32) {
    %c0_i32 = arith.constant 0 : i32
    %c0_i32_0 = arith.constant 0 : i32
    %c0_i32_1 = arith.constant 0 : i32
    return %c0_i32, %c0_i32_0 : i32, i32
  }
  func.func @transform_7(%arg0: i32) -> (i32, i32) {
    %c0_i32 = arith.constant 0 : i32
    %c0_i32_0 = arith.constant 0 : i32
    %c0_i32_1 = arith.constant 0 : i32
    return %c0_i32, %c0_i32_0 : i32, i32
  }
  func.func @transform_8(%arg0: i32) -> (i32, i32) {
    %c0_i32 = arith.constant 0 : i32
    %c0_i32_0 = arith.constant 0 : i32
    %c0_i32_1 = arith.constant 0 : i32
    return %c0_i32, %c0_i32_0 : i32, i32
  }
  func.func @transform_9(%arg0: i32) -> (i32, i32) {
    %c0_i32 = arith.constant 0 : i32
    %c0_i32_0 = arith.constant 0 : i32
    %c0_i32_1 = arith.constant 0 : i32
    return %c0_i32, %c0_i32_0 : i32, i32
  }
  func.func @transform_10(%arg0: i32) -> (i32, i32) {
    %c0_i32 = arith.constant 0 : i32
    %c0_i32_0 = arith.constant 0 : i32
    %c0_i32_1 = arith.constant 0 : i32
    return %c0_i32, %c0_i32_0 : i32, i32
  }
  func.func @transform_11(%arg0: i32) -> (i32, i32) {
    %c0_i32 = arith.constant 0 : i32
    %c0_i32_0 = arith.constant 0 : i32
    return %arg0, %c0_i32 : i32, i32
  }
}

</mosaic_0001>

<bundles_post_ra>
// kernel: tpu_custom_call.1
= control target key start
LH: loop header
LB: loop body
LE: loop exit
PB: predicated region body
PF: predicated region fallthrough
CT: control target
= control target key end

     0   :  { %16 = vsyncpa [#allocation3], 0  ;;  %s10345_s0 = inlined_call_operand.hbm [shape: f32[256,128], index: 0, kind: input, shape index: {}]   ;;  %s10346_s1 = inlined_call_operand.hbm [shape: bf16[128,512], index: 1, kind: input, shape index: {}]   ;;  %s10347_s2 = inlined_call_operand.vmem [shape: f32[1,512], index: 2, kind: input, shape index: {}]   ;;  %s10348_s3 = inlined_call_operand.hbm [shape: bf16[512,512], index: 3, kind: input, shape index: {}]   ;;  %s10349_s4 = inlined_call_operand.vmem [shape: f32[1,512], index: 4, kind: input, shape index: {}]   ;;  %s10350_s5 = inlined_call_operand.hbm [shape: bf16[512,512], index: 5, kind: input, shape index: {}]   ;;  %s10351_s6 = inlined_call_operand.vmem [shape: f32[1,512], index: 6, kind: input, shape index: {}]   ;;  %s10352_s7 = inlined_call_operand.hbm [shape: bf16[512,512], index: 7, kind: input, shape index: {}]   ;;  %s10353_s8 = inlined_call_operand.vmem [shape: f32[1,512], index: 8, kind: input, shape index: {}]   ;;  %s10354_s9 = inlined_call_operand.hbm [shape: bf16[512,128], index: 9, kind: input, shape index: {}]   ;;  %s10355_s10 = inlined_call_operand.vmem [shape: f32[1,128], index: 10, kind: input, shape index: {}]   ;;  %s10356_s11 = inlined_call_operand.hbm [shape: f32[256,128], index: 11, kind: output, shape index: {}]  }
   0x1   :  { %17 = vsyncpa [#allocation6], 0 }
   0x2   :  { %18 = vsyncpa [#allocation9], 0 }
   0x3   :  { %19 = vsyncpa [#allocation12], 0 }
   0x4   :  { %20 = vsyncpa [#allocation4], 0  ;;  %s9136_s17 = smov [#allocation5]   ;;  %s8972_s21 = scalar_lea.hbm %s10346_s1, 4096 }
   0x5   :  { %s38_s18 = sshll.u32 %s9136_s17, 4  ;;  %p8973_p0 = scmp.ne.s32.totalorder %s10346_s1, %s8972_s21  ;;  %s39_s18 = int_to_ptr.vmem [resolvable:$true] %s38_s18 }
   0x6   :  { %p8976_p1 = scmp.lt.u32.totalorder %s8972_s21, %s10346_s1 }
   0x8   :  { %p8978_p2 = pnand %p8976_p1, %p8973_p0 }
   0xa   :  { %8981 = shalt.err (!%p8978_p2)
}
   0xb   :  { %s8982_s26 = scalar_lea.vmem %s39_s18, 4096  ;;  %p8987_p4 = scmp.lt.s32.totalorder %s39_s18, %s39_s18 }
   0xc   :  { %p8983_p3 = scmp.ne.s32.totalorder %s39_s18, %s8982_s26  ;;  %p8988_p5 = scmp.lt.s32.totalorder %s8982_s26, %s8982_s26 }
   0xe   :  { %p8989_p6 = por %p8988_p5, %p8987_p4 }
  0x10   :  { %p8990_p7 = pnand %p8989_p6, %p8983_p3 }
  0x12   :  { %8993 = shalt.err (!%p8990_p7)
}
  0x13   :  { %s9137_s27 = smov 256   ;;  %s9138_s28 = smov 16  }
  0x14   :  { %44 = dma.hbm_to_vmem [thread:$0]  %s10346_s1, 4096, %s39_s18, [#allocation6], %s9137_s27, %s9137_s27, %s9138_s28  }
  0x15   :  { %s9139_s12 = smov [#allocation8]   ;;  %s9140_s14 = smov [#allocation2]  }
  0x16   :  { %s66_s13 = sshll.u32 %s9139_s12, 4  ;;  %s26_s15 = sshll.u32 %s9140_s14, 4  ;;  %s67_s13 = int_to_ptr.vmem [resolvable:$true] %s66_s13  ;;  %s27_s15 = int_to_ptr.vmem [resolvable:$true] %s26_s15 }
  0x17   :  { %s8994_s19 = scalar_lea.hbm %s10350_s5, 16384 }
  0x18   :  { %p8995_p8 = scmp.ne.s32.totalorder %s10350_s5, %s8994_s19  ;;  %p8998_p9 = scmp.lt.u32.totalorder %s8994_s19, %s10350_s5 }
  0x1a   :  { %p9000_p10 = pnand %p8998_p9, %p8995_p8 }
  0x1c   :  { %9003 = shalt.err (!%p9000_p10)
}
  0x1d   :  { %s9004_s1 = scalar_lea.vmem %s67_s13, 16384  ;;  %p9009_p12 = scmp.lt.s32.totalorder %s67_s13, %s67_s13 }
  0x1e   :  { %p9005_p11 = scmp.ne.s32.totalorder %s67_s13, %s9004_s1  ;;  %p9010_p13 = scmp.lt.s32.totalorder %s9004_s1, %s9004_s1 }
  0x20   :  { %p9011_p0 = por %p9010_p13, %p9009_p12 }
  0x22   :  { %p9012_p1 = pnand %p9011_p0, %p9005_p11 }
  0x24   :  { %9015 = shalt.err (!%p9012_p1)
}
  0x25   :  { %72 = dma.hbm_to_vmem [thread:$0]  %s10350_s5, 16384, %s67_s13, [#allocation9], %s9137_s27, %s9137_s27, %s9138_s28  }
  0x26   :  { %s9016_s29 = scalar_lea.hbm %s10345_s0, 4096 }
  0x27   :  { %p9017_p2 = scmp.ne.s32.totalorder %s10345_s0, %s9016_s29  ;;  %p9020_p3 = scmp.lt.u32.totalorder %s9016_s29, %s10345_s0 }
  0x29   :  { %p9022_p4 = pnand %p9020_p3, %p9017_p2 }
  0x2b   :  { %9025 = shalt.err (!%p9022_p4)
}
  0x2c   :  { %s9026_s17 = scalar_lea.vmem %s27_s15, 4096  ;;  %p9031_p6 = scmp.lt.s32.totalorder %s27_s15, %s27_s15 }
  0x2d   :  { %p9027_p5 = scmp.ne.s32.totalorder %s27_s15, %s9026_s17  ;;  %p9032_p7 = scmp.lt.s32.totalorder %s9026_s17, %s9026_s17 }
  0x2f   :  { %p9033_p8 = por %p9032_p7, %p9031_p6 }
  0x31   :  { %p9034_p9 = pnand %p9033_p8, %p9027_p5 }
  0x33   :  { %9037 = shalt.err (!%p9034_p9)
}
  0x34   :  { %s9141_s5 = smov 128   ;;  %s9142_s13 = smov 8  }
  0x35   :  { %32 = dma.hbm_to_vmem [thread:$0]  %s10345_s0, 4096, %s27_s15, [#allocation3], %s9141_s5, %s9141_s5, %s9142_s13  }
  0x36   :  { %s9143_s21 = smov [#allocation7]   ;;  %s9144_s23 = smov [#allocation10]  }
  0x37   :  { %s52_s22 = sshll.u32 %s9143_s21, 4  ;;  %s80_s1 = sshll.u32 %s9144_s23, 4  ;;  %s53_s22 = int_to_ptr.vmem [resolvable:$true] %s52_s22  ;;  %s81_s1 = int_to_ptr.vmem [resolvable:$true] %s80_s1 }
  0x38   :  { %s9038_s25 = scalar_lea.hbm %s10348_s3, 16384 }
  0x39   :  { %p9039_p10 = scmp.ne.s32.totalorder %s10348_s3, %s9038_s25  ;;  %p9042_p11 = scmp.lt.u32.totalorder %s9038_s25, %s10348_s3 }
  0x3b   :  { %p9044_p12 = pnand %p9042_p11, %p9039_p10 }
  0x3d   :  { %9047 = shalt.err (!%p9044_p12)
}
  0x3e   :  { %s9048_s0 = scalar_lea.vmem %s53_s22, 16384  ;;  %p9053_p0 = scmp.lt.s32.totalorder %s53_s22, %s53_s22 }
  0x3f   :  { %p9049_p13 = scmp.ne.s32.totalorder %s53_s22, %s9048_s0  ;;  %p9054_p1 = scmp.lt.s32.totalorder %s9048_s0, %s9048_s0 }
  0x41   :  { %p9055_p2 = por %p9054_p1, %p9053_p0 }
  0x43   :  { %p9056_p3 = pnand %p9055_p2, %p9049_p13 }
  0x45   :  { %9059 = shalt.err (!%p9056_p3)
}
  0x46   :  { %58 = dma.hbm_to_vmem [thread:$0]  %s10348_s3, 16384, %s53_s22, [#allocation6], %s9137_s27, %s9137_s27, %s9138_s28  }
  0x47   :  { %s9060_s19 = scalar_lea.hbm %s10352_s7, 16384 }
  0x48   :  { %p9061_p4 = scmp.ne.s32.totalorder %s10352_s7, %s9060_s19  ;;  %p9064_p5 = scmp.lt.u32.totalorder %s9060_s19, %s10352_s7 }
  0x4a   :  { %p9066_p6 = pnand %p9064_p5, %p9061_p4 }
  0x4c   :  { %9069 = shalt.err (!%p9066_p6)
}
  0x4d   :  { %s9070_s24 = scalar_lea.vmem %s81_s1, 16384  ;;  %p9075_p8 = scmp.lt.s32.totalorder %s81_s1, %s81_s1 }
  0x4e   :  { %p9071_p7 = scmp.ne.s32.totalorder %s81_s1, %s9070_s24  ;;  %p9076_p9 = scmp.lt.s32.totalorder %s9070_s24, %s9070_s24 }
  0x50   :  { %p9077_p10 = por %p9076_p9, %p9075_p8 }
  0x52   :  { %p9078_p11 = pnand %p9077_p10, %p9071_p7 }
  0x54   :  { %9081 = shalt.err (!%p9078_p11)
}
  0x55   :  { %86 = dma.hbm_to_vmem [thread:$0]  %s10352_s7, 16384, %s81_s1, [#allocation9], %s9137_s27, %s9137_s27, %s9138_s28  }
  0x56   :  { %s9145_s25 = smov [#allocation11]   ;;  %s9082_s12 = scalar_lea.hbm %s10354_s9, 4096 }
  0x57   :  { %s94_s26 = sshll.u32 %s9145_s25, 4  ;;  %p9083_p12 = scmp.ne.s32.totalorder %s10354_s9, %s9082_s12  ;;  %s95_s26 = int_to_ptr.vmem [resolvable:$true] %s94_s26 }
  0x58   :  { %p9086_p13 = scmp.lt.u32.totalorder %s9082_s12, %s10354_s9 }
  0x5a   :  { %p9088_p0 = pnand %p9086_p13, %p9083_p12 }
  0x5c   :  { %9091 = shalt.err (!%p9088_p0)
}
  0x5d   :  { %s9092_s17 = scalar_lea.vmem %s95_s26, 4096  ;;  %p9097_p2 = scmp.lt.s32.totalorder %s95_s26, %s95_s26 }
  0x5e   :  { %p9093_p1 = scmp.ne.s32.totalorder %s95_s26, %s9092_s17  ;;  %p9098_p3 = scmp.lt.s32.totalorder %s9092_s17, %s9092_s17 }
  0x60   :  { %p9099_p4 = por %p9098_p3, %p9097_p2 }
  0x62   :  { %p9100_p5 = pnand %p9099_p4, %p9093_p1 }
  0x64   :  { %9103 = shalt.err (!%p9100_p5)
}
  0x65   :  { %s9146_s7 = smov 64   ;;  %s9147_s27 = smov 4  }
  0x66   :  { %100 = dma.hbm_to_vmem [thread:$0]  %s10354_s9, 4096, %s95_s26, [#allocation12], %s9146_s7, %s9146_s7, %s9147_s27  }
  0x67   :  { %9126 = dma.done.wait [#allocation3], 4096  }
  0x68   :  { %9127 = vsyncadd [#allocation3], 4294963200 }
  0x69   :  { %9128 = dma.done.wait [#allocation6], 20480  }
  0x6a   :  { %9129 = vsyncadd [#allocation6], 4294946816 }
  0x6b   :  { %9130 = dma.done.wait [#allocation9], 32768  }
  0x6c   :  { %9131 = vsyncadd [#allocation9], 4294934528 }
  0x6d   :  { %9132 = dma.done.wait [#allocation12], 4096  }
  0x6e   :  { %9133 = vsyncadd [#allocation12], 4294963200  ;;  %v9148_v0 = vmov 0   ;;  %v8316_v1 = vld [vmem:[#allocation5 + $0x4] ss:$16 sps:$4 sm:$0xff]   ;;  %v123_v25 = vld [vmem:[#allocation2 + $0x8] sm:$0xff] }
  0x6f   :  { %416 = vmatprep.mubr.bf16.mxu0 %v9148_v0  ;;  %609 = vmatprep.mubr.bf16.mxu1 %v9148_v0  ;;  %v8318_v2 = vld [vmem:[#allocation5] ss:$16 sps:$4 sm:$0xff]   ;;  %v8319_v3 = vld [vmem:[#allocation5 + $0x24] ss:$16 sps:$4 sm:$0xff]   ;;  %v8340_v12 = vld [vmem:[#allocation5 + $0xc] ss:$16 sps:$4 sm:$0xff]  }
  0x70   :  { %384 = vmatprep.subr.bf16.mxu0 %v8316_v1  ;;  %v8321_v4 = vld [vmem:[#allocation5 + $0x20] ss:$16 sps:$4 sm:$0xff]   ;;  %v8322_v5 = vld [vmem:[#allocation5 + $0x44] ss:$16 sps:$4 sm:$0xff]   ;;  %v8342_v14 = vld [vmem:[#allocation5 + $0x8] ss:$16 sps:$4 sm:$0xff]   ;;  %577 = vmatprep.subr.bf16.mxu1 %v8340_v12 }
  0x71   :  { %385 = vmatpush1.bf16.msra.mxu0 %v8318_v2  ;;  %v8324_v6 = vld [vmem:[#allocation5 + $0x40] ss:$16 sps:$4 sm:$0xff]   ;;  %v8325_v7 = vld [vmem:[#allocation5 + $0x64] ss:$16 sps:$4 sm:$0xff]   ;;  %v8343_v15 = vld [vmem:[#allocation5 + $0x2c] ss:$16 sps:$4 sm:$0xff]   ;;  %578 = vmatpush1.bf16.msra.mxu1 %v8342_v14 }
  0x72   :  { %386 = vmatprep.subr.bf16.mxu0 %v8319_v3  ;;  %v8327_v8 = vld [vmem:[#allocation5 + $0x60] ss:$16 sps:$4 sm:$0xff]   ;;  %v8328_v9 = vld [vmem:[#allocation5 + $0x84] ss:$16 sps:$4 sm:$0xff]   ;;  %v8345_v16 = vld [vmem:[#allocation5 + $0x28] ss:$16 sps:$4 sm:$0xff]   ;;  %579 = vmatprep.subr.bf16.mxu1 %v8343_v15 }
  0x73   :  { %v8330_v10 = vld [vmem:[#allocation5 + $0x80] ss:$16 sps:$4 sm:$0xff]   ;;  %v8331_v11 = vld [vmem:[#allocation5 + $0xa4] ss:$16 sps:$4 sm:$0xff]   ;;  %v8346_v18 = vld [vmem:[#allocation5 + $0x4c] ss:$16 sps:$4 sm:$0xff]  }
  0x74   :  { %v8333_v13 = vld [vmem:[#allocation5 + $0xa0] ss:$16 sps:$4 sm:$0xff]   ;;  %v8334_v17 = vld [vmem:[#allocation5 + $0xc4] ss:$16 sps:$4 sm:$0xff]   ;;  %v8348_v20 = vld [vmem:[#allocation5 + $0x48] ss:$16 sps:$4 sm:$0xff]  }
  0x75   :  { %387 = vmatpush1.bf16.msra.mxu0 %v8321_v4  ;;  %v8336_v19 = vld [vmem:[#allocation5 + $0xc0] ss:$16 sps:$4 sm:$0xff]   ;;  %580 = vmatpush1.bf16.msra.mxu1 %v8345_v16  ;;  %v8337_v21 = vld [vmem:[#allocation5 + $0xe4] ss:$16 sps:$4 sm:$0xff]   ;;  %v8349_v22 = vld [vmem:[#allocation5 + $0x6c] ss:$16 sps:$4 sm:$0xff]  }
  0x76   :  { %388 = vmatprep.subr.bf16.mxu0 %v8322_v5  ;;  %581 = vmatprep.subr.bf16.mxu1 %v8346_v18  ;;  %v8339_v23 = vld [vmem:[#allocation5 + $0xe0] ss:$16 sps:$4 sm:$0xff]   ;;  %v8351_v26 = vld [vmem:[#allocation5 + $0x68] ss:$16 sps:$4 sm:$0xff]   ;;  %v8352_v27 = vld [vmem:[#allocation5 + $0x8c] ss:$16 sps:$4 sm:$0xff]  }
  0x77   :  { %v122_v24 = vld [vmem:[#allocation2] sm:$0xff]  ;;  %v8354_v30 = vld [vmem:[#allocation5 + $0x88] ss:$16 sps:$4 sm:$0xff]   ;;  %v8355_v31 = vld [vmem:[#allocation5 + $0xac] ss:$16 sps:$4 sm:$0xff]  }
  0x78   :  { %v154_v28 = vpack.c.bf16 %v123_v25, %v122_v24  ;;  %v8366_v29 = vld [vmem:[#allocation7 + $0x4] ss:$16 sps:$4 sm:$0xff]   ;;  %v8364_v32 = vld [vmem:[#allocation7] ss:$16 sps:$4 sm:$0xff]   ;;  %v125_v35 = vld [vmem:[#allocation2 + $0x18] sm:$0xff] }
  0x79   :  { %389 = vmatpush1.bf16.msra.mxu0 %v8324_v6  ;;  %582 = vmatpush1.bf16.msra.mxu1 %v8348_v20  ;;  %v8369_v33 = vld [vmem:[#allocation7 + $0x24] ss:$16 sps:$4 sm:$0xff]   ;;  %v8357_v36 = vld [vmem:[#allocation5 + $0xa8] ss:$16 sps:$4 sm:$0xff]   ;;  %v8358_v37 = vld [vmem:[#allocation5 + $0xcc] ss:$16 sps:$4 sm:$0xff]  }
  0x7a   :  { %390 = vmatprep.subr.bf16.mxu0 %v8325_v7  ;;  %583 = vmatprep.subr.bf16.mxu1 %v8349_v22  ;;  %v124_v34 = vld [vmem:[#allocation2 + $0x10] sm:$0xff]  ;;  %v8360_v41 = vld [vmem:[#allocation5 + $0xc8] ss:$16 sps:$4 sm:$0xff]   ;;  %v8361_v42 = vld [vmem:[#allocation5 + $0xec] ss:$16 sps:$4 sm:$0xff]  }
  0x7b   :  { %v8367_v38 = vld [vmem:[#allocation7 + $0x20] ss:$16 sps:$4 sm:$0xff]   ;;  %v8372_v39 = vld [vmem:[#allocation7 + $0x44] ss:$16 sps:$4 sm:$0xff]   ;;  %v155_v40 = vpack.c.bf16 %v125_v35, %v124_v34  ;;  %v127_v46 = vld [vmem:[#allocation2 + $0x28] sm:$0xff] }
  0x7c   :  { %v8370_v43 = vld [vmem:[#allocation7 + $0x40] ss:$16 sps:$4 sm:$0xff]   ;;  %v8375_v44 = vld [vmem:[#allocation7 + $0x64] ss:$16 sps:$4 sm:$0xff]   ;;  %v8363_v47 = vld [vmem:[#allocation5 + $0xe8] ss:$16 sps:$4 sm:$0xff]  }
  0x7d   :  { %391 = vmatpush1.bf16.msra.mxu0 %v8327_v8  ;;  %584 = vmatpush1.bf16.msra.mxu1 %v8351_v26  ;;  %v126_v45 = vld [vmem:[#allocation2 + $0x20] sm:$0xff]  ;;  %v8393_v50 = vld [vmem:[#allocation7 + $0xc] ss:$16 sps:$4 sm:$0xff]   ;;  %v8391_v54 = vld [vmem:[#allocation7 + $0x8] ss:$16 sps:$4 sm:$0xff]  }
  0x7e   :  { %392 = vmatprep.subr.bf16.mxu0 %v8328_v9  ;;  %585 = vmatprep.subr.bf16.mxu1 %v8352_v27  ;;  %v8373_v48 = vld [vmem:[#allocation7 + $0x60] ss:$16 sps:$4 sm:$0xff]   ;;  %v8378_v49 = vld [vmem:[#allocation7 + $0x84] ss:$16 sps:$4 sm:$0xff]   ;;  %v156_v51 = vpack.c.bf16 %v127_v46, %v126_v45  ;;  %v8396_v55 = vld [vmem:[#allocation7 + $0x2c] ss:$16 sps:$4 sm:$0xff]  }
  0x7f   :  { %v8376_v52 = vld [vmem:[#allocation7 + $0x80] ss:$16 sps:$4 sm:$0xff]   ;;  %v8381_v53 = vld [vmem:[#allocation7 + $0xa4] ss:$16 sps:$4 sm:$0xff]   ;;  %v129_v57 = vld [vmem:[#allocation2 + $0x38] sm:$0xff] }
  0x80   :  { %v128_v56 = vld [vmem:[#allocation2 + $0x30] sm:$0xff]  ;;  %v8394_v60 = vld [vmem:[#allocation7 + $0x28] ss:$16 sps:$4 sm:$0xff]   ;;  %v8402_v61 = vld [vmem:[#allocation7 + $0x4c] ss:$16 sps:$4 sm:$0xff]  }
  0x81   :  { %393 = vmatpush1.bf16.msra.mxu0 %v8330_v10  ;;  %586 = vmatpush1.bf16.msra.mxu1 %v8354_v30  ;;  %v8379_v58 = vld [vmem:[#allocation7 + $0xa0] ss:$16 sps:$4 sm:$0xff]   ;;  %v8384_v59 = vld [vmem:[#allocation7 + $0xc4] ss:$16 sps:$4 sm:$0xff]   ;;  %v157_v62 = vpack.c.bf16 %v129_v57, %v128_v56  ;;  %v8400_v2 = vld [vmem:[#allocation7 + $0x48] ss:$16 sps:$4 sm:$0xff]  }
  0x82   :  { %394 = vmatprep.subr.bf16.mxu0 %v8331_v11  ;;  %587 = vmatprep.subr.bf16.mxu1 %v8355_v31  ;;  %v8382_v63 = vld [vmem:[#allocation7 + $0xc0] ss:$16 sps:$4 sm:$0xff]   ;;  %v8387_v1 = vld [vmem:[#allocation7 + $0xe4] ss:$16 sps:$4 sm:$0xff]   ;;  %v8405_v3 = vld [vmem:[#allocation7 + $0x6c] ss:$16 sps:$4 sm:$0xff]  }
  0x83   :  { %v130_v4 = vld [vmem:[#allocation2 + $0x40] sm:$0xff]  ;;  %v131_v5 = vld [vmem:[#allocation2 + $0x48] sm:$0xff]  ;;  %v132_v15 = vld [vmem:[#allocation2 + $0x50] sm:$0xff] }
  0x84   :  { %v8385_v6 = vld [vmem:[#allocation7 + $0xe0] ss:$16 sps:$4 sm:$0xff]   ;;  %v8390_v7 = vld [vmem:[#allocation7 + $0x104] ss:$16 sps:$4 sm:$0xff]   ;;  %v8403_v8 = vld [vmem:[#allocation7 + $0x68] ss:$16 sps:$4 sm:$0xff]   ;;  %v158_v10 = vpack.c.bf16 %v131_v5, %v130_v4 }
  0x85   :  { %395 = vmatpush1.bf16.msra.mxu0 %v8333_v13  ;;  %588 = vmatpush1.bf16.msra.mxu1 %v8357_v36  ;;  %v8411_v9 = vld [vmem:[#allocation7 + $0x8c] ss:$16 sps:$4 sm:$0xff]   ;;  %v8388_v11 = vld [vmem:[#allocation7 + $0x100] ss:$16 sps:$4 sm:$0xff]   ;;  %v8399_v12 = vld [vmem:[#allocation7 + $0x124] ss:$16 sps:$4 sm:$0xff]  }
  0x86   :  { %396 = vmatprep.subr.bf16.mxu0 %v8334_v17  ;;  %589 = vmatprep.subr.bf16.mxu1 %v8358_v37  ;;  %v8409_v13 = vld [vmem:[#allocation7 + $0x88] ss:$16 sps:$4 sm:$0xff]   ;;  %v8414_v14 = vld [vmem:[#allocation7 + $0xac] ss:$16 sps:$4 sm:$0xff]   ;;  %v8397_v17 = vld [vmem:[#allocation7 + $0x120] ss:$16 sps:$4 sm:$0xff]  }
  0x87   :  { %v133_v16 = vld [vmem:[#allocation2 + $0x58] sm:$0xff]  ;;  %v8408_v18 = vld [vmem:[#allocation7 + $0x144] ss:$16 sps:$4 sm:$0xff]   ;;  %v8406_v22 = vld [vmem:[#allocation7 + $0x140] ss:$16 sps:$4 sm:$0xff]  }
  0x88   :  { %v8420_v20 = vld [vmem:[#allocation7 + $0xcc] ss:$16 sps:$4 sm:$0xff]   ;;  %v8417_v24 = vld [vmem:[#allocation7 + $0x164] ss:$16 sps:$4 sm:$0xff]   ;;  %v8427_v34 = vld [vmem:[#allocation7 + $0x108] ss:$16 sps:$4 sm:$0xff]  }
  0x89   :  { %397 = vmatpush1.bf16.msra.mxu0 %v8336_v19  ;;  %590 = vmatpush1.bf16.msra.mxu1 %v8360_v41  ;;  %v8412_v19 = vld [vmem:[#allocation7 + $0xa8] ss:$16 sps:$4 sm:$0xff]   ;;  %v8423_v25 = vld [vmem:[#allocation7 + $0xec] ss:$16 sps:$4 sm:$0xff]   ;;  %v134_v26 = vld [vmem:[#allocation2 + $0x60] sm:$0xff] }
  0x8a   :  { %398 = vmatprep.subr.bf16.mxu0 %v8337_v21  ;;  %591 = vmatprep.subr.bf16.mxu1 %v8361_v42  ;;  %v159_v21 = vpack.c.bf16 %v133_v16, %v132_v15  ;;  %v135_v27 = vld [vmem:[#allocation2 + $0x68] sm:$0xff]  ;;  %v8426_v30 = vld [vmem:[#allocation7 + $0x184] ss:$16 sps:$4 sm:$0xff]   ;;  %v8442_v45 = vld [vmem:[#allocation7 + $0x1c0] ss:$16 sps:$4 sm:$0xff]  }
  0x8b   :  { %v8429_v31 = vld [vmem:[#allocation7 + $0x10c] ss:$16 sps:$4 sm:$0xff]   ;;  %v8435_v36 = vld [vmem:[#allocation7 + $0x1a4] ss:$16 sps:$4 sm:$0xff]   ;;  %v8448_v56 = vld [vmem:[#allocation7 + $0x1a8] ss:$16 sps:$4 sm:$0xff]  }
  0x8c   :  { %v8432_v35 = vld [vmem:[#allocation7 + $0x12c] ss:$16 sps:$4 sm:$0xff]   ;;  %v136_v37 = vld [vmem:[#allocation2 + $0x70] sm:$0xff] }
  0x8d   :  { %399 = vmatpush1.bf16.msra.mxu0 %v8339_v23  ;;  %592 = vmatpush1.bf16.msra.mxu1 %v8363_v47  ;;  %v8418_v23 = vld [vmem:[#allocation7 + $0xc8] ss:$16 sps:$4 sm:$0xff]   ;;  %v8438_v41 = vld [vmem:[#allocation7 + $0x14c] ss:$16 sps:$4 sm:$0xff]   ;;  %v8444_v42 = vld [vmem:[#allocation7 + $0x1c4] ss:$16 sps:$4 sm:$0xff]  }
  0x8e   :  { %1752 = vmatprep.subr.bf16.mxu0 %v8366_v29  ;;  %2138 = vmatprep.subr.bf16.mxu1 %v8393_v50  ;;  %v8421_v29 = vld [vmem:[#allocation7 + $0xe8] ss:$16 sps:$4 sm:$0xff]   ;;  %v8441_v46 = vld [vmem:[#allocation7 + $0x16c] ss:$16 sps:$4 sm:$0xff]   ;;  %v138_v47 = vld [vmem:[#allocation2 + $0x80] sm:$0xff] }
  0x8f   :  { %v8447_v50 = vld [vmem:[#allocation7 + $0x18c] ss:$16 sps:$4 sm:$0xff]   ;;  %v8453_v5 = vld [vmem:[#allocation7 + $0x1e4] ss:$16 sps:$4 sm:$0xff]  }
  0x90   :  { %417 = vmatmul.mubr.bf16.vlgmr.msra.gmra.mrb[0].mxu0 %v154_v28  ;;  %610 = vmatmul.mubr.bf16.vlgmr.msra.gmra.mrb[0].mxu1 %v154_v28  ;;  %v8415_v28 = vld [vmem:[#allocation7 + $0x160] ss:$16 sps:$4 sm:$0xff]   ;;  %v147_v4 = vld [vmem:[#allocation2 + $0xc8] sm:$0xff] }
  0x91   :  { %426 = vmatprep.mubr.bf16.mxu0 %v9148_v0  ;;  %1753 = vmatpush1.bf16.msra.mxu0 %v8364_v32  ;;  %v160_v32 = vpack.c.bf16 %v135_v27, %v134_v26  ;;  %v151_v15 = vld [vmem:[#allocation2 + $0xe8] sm:$0xff] }
  0x92   :  { %1754 = vmatprep.subr.bf16.mxu0 %v8369_v33  ;;  %619 = vmatprep.mubr.bf16.mxu1 %v9148_v0  ;;  %v8424_v33 = vld [vmem:[#allocation7 + $0x180] ss:$16 sps:$4 sm:$0xff]  }
  0x93   :  { %2139 = vmatpush1.bf16.msra.mxu1 %v8391_v54  ;;  %v140_v54 = vld [vmem:[#allocation2 + $0x90] sm:$0xff] }
  0x94   :  { %2140 = vmatprep.subr.bf16.mxu1 %v8396_v55  ;;  %v141_v55 = vld [vmem:[#allocation2 + $0x98] sm:$0xff] }
  0x95   :  { %1755 = vmatpush1.bf16.msra.mxu0 %v8367_v38  ;;  %v137_v38 = vld [vmem:[#allocation2 + $0x78] sm:$0xff]  ;;  %v163_v57 = vpack.c.bf16 %v141_v55, %v140_v54  ;;  %v8463_v55 = vld [vmem:[#allocation7 + $0x220] ss:$16 sps:$4 sm:$0xff]  }
  0x96   :  { %1756 = vmatprep.subr.bf16.mxu0 %v8372_v39  ;;  %v8430_v39 = vld [vmem:[#allocation7 + $0x128] ss:$16 sps:$4 sm:$0xff]  }
  0x97   :  { %2141 = vmatpush1.bf16.msra.mxu1 %v8394_v60 }
  0x98   :  { %427 = vmatmul.mubr.bf16.gmra.mrb[4].mxu0 %v155_v40  ;;  %2142 = vmatprep.subr.bf16.mxu1 %v8402_v61  ;;  %v144_v61 = vld [vmem:[#allocation2 + $0xb0] sm:$0xff] }
  0x99   :  { %436 = vmatprep.mubr.bf16.mxu0 %v9148_v0  ;;  %1757 = vmatpush1.bf16.msra.mxu0 %v8370_v43  ;;  %v161_v43 = vpack.c.bf16 %v137_v38, %v136_v37 }
  0x9a   :  { %1758 = vmatprep.subr.bf16.mxu0 %v8375_v44  ;;  %620 = vmatmul.mubr.bf16.gmra.mrb[4].mxu1 %v155_v40  ;;  %v8433_v40 = vld [vmem:[#allocation7 + $0x1a0] ss:$16 sps:$4 sm:$0xff]   ;;  %v8436_v44 = vld [vmem:[#allocation7 + $0x148] ss:$16 sps:$4 sm:$0xff]  }
  0x9b   :  { %629 = vmatprep.mubr.bf16.mxu1 %v9148_v0  ;;  %2143 = vmatpush1.bf16.msra.mxu1 %v8400_v2  ;;  %v8454_v2 = vld [vmem:[#allocation7 + $0x1c8] ss:$16 sps:$4 sm:$0xff]  }
  0x9c   :  { %2144 = vmatprep.subr.bf16.mxu1 %v8405_v3  ;;  %v146_v3 = vld [vmem:[#allocation2 + $0xc0] sm:$0xff] }
  0x9d   :  { %1759 = vmatpush1.bf16.msra.mxu0 %v8373_v48  ;;  %v139_v48 = vld [vmem:[#allocation2 + $0x88] sm:$0xff] }
  0x9e   :  { %1760 = vmatprep.subr.bf16.mxu0 %v8378_v49  ;;  %v8439_v49 = vld [vmem:[#allocation7 + $0x168] ss:$16 sps:$4 sm:$0xff]  }
  0x9f   :  { %2145 = vmatpush1.bf16.msra.mxu1 %v8403_v8  ;;  %v8457_v8 = vld [vmem:[#allocation7 + $0x1e8] ss:$16 sps:$4 sm:$0xff]  }
  0xa0   :  { %437 = vmatmul.mubr.bf16.gmra.mrb[8].mxu0 %v156_v51  ;;  %2146 = vmatprep.subr.bf16.mxu1 %v8411_v9  ;;  %v166_v9 = vpack.c.bf16 %v147_v4, %v146_v3 }
  0xa1   :  { %446 = vmatprep.mubr.bf16.mxu0 %v9148_v0  ;;  %1761 = vmatpush1.bf16.msra.mxu0 %v8376_v52  ;;  %v8445_v52 = vld [vmem:[#allocation7 + $0x188] ss:$16 sps:$4 sm:$0xff]  }
  0xa2   :  { %1762 = vmatprep.subr.bf16.mxu0 %v8381_v53  ;;  %630 = vmatmul.mubr.bf16.gmra.mrb[8].mxu1 %v156_v51  ;;  %v162_v51 = vpack.c.bf16 %v139_v48, %v138_v47  ;;  %v8450_v53 = vld [vmem:[#allocation7 + $0x1ac] ss:$16 sps:$4 sm:$0xff]  }
  0xa3   :  { %639 = vmatprep.mubr.bf16.mxu1 %v9148_v0  ;;  %2147 = vmatpush1.bf16.msra.mxu1 %v8409_v13  ;;  %v8492_v47 = vld [vmem:[#allocation7 + $0x22c] ss:$16 sps:$4 sm:$0xff]  }
  0xa4   :  { %2148 = vmatprep.subr.bf16.mxu1 %v8414_v14  ;;  %v150_v14 = vld [vmem:[#allocation2 + $0xe0] sm:$0xff] }
  0xa5   :  { %1763 = vmatpush1.bf16.msra.mxu0 %v8379_v58  ;;  %v142_v58 = vld [vmem:[#allocation2 + $0xa0] sm:$0xff]  ;;  %v168_v16 = vpack.c.bf16 %v151_v15, %v150_v14 }
  0xa6   :  { %1764 = vmatprep.subr.bf16.mxu0 %v8384_v59  ;;  %v143_v59 = vld [vmem:[#allocation2 + $0xa8] sm:$0xff] }
  0xa7   :  { %2149 = vmatpush1.bf16.msra.mxu1 %v8412_v19  ;;  %v164_v60 = vpack.c.bf16 %v143_v59, %v142_v58  ;;  %v8468_v59 = vld [vmem:[#allocation7 + $0x244] ss:$16 sps:$4 sm:$0xff]  }
  0xa8   :  { %447 = vmatmul.mubr.bf16.gmra.mrb[12].mxu0 %v157_v62  ;;  %2150 = vmatprep.subr.bf16.mxu1 %v8420_v20  ;;  %v8489_v20 = vld [vmem:[#allocation7 + $0x20c] ss:$16 sps:$4 sm:$0xff]  }
  0xa9   :  { %456 = vmatprep.mubr.bf16.mxu0 %v9148_v0  ;;  %1765 = vmatpush1.bf16.msra.mxu0 %v8382_v63 }
  0xaa   :  { %1766 = vmatprep.subr.bf16.mxu0 %v8387_v1  ;;  %640 = vmatmul.mubr.bf16.gmra.mrb[12].mxu1 %v157_v62  ;;  %v145_v62 = vld [vmem:[#allocation2 + $0xb8] sm:$0xff] }
  0xab   :  { %649 = vmatprep.mubr.bf16.mxu1 %v9148_v0  ;;  %2151 = vmatpush1.bf16.msra.mxu1 %v8418_v23  ;;  %v165_v63 = vpack.c.bf16 %v145_v62, %v144_v61  ;;  %v8456_v1 = vld [vmem:[#allocation7 + $0x1cc] ss:$16 sps:$4 sm:$0xff]  }
  0xac   :  { %2152 = vmatprep.subr.bf16.mxu1 %v8423_v25 }
  0xad   :  { %1767 = vmatpush1.bf16.msra.mxu0 %v8385_v6  ;;  %v8459_v6 = vld [vmem:[#allocation7 + $0x1ec] ss:$16 sps:$4 sm:$0xff]  }
  0xae   :  { %1768 = vmatprep.subr.bf16.mxu0 %v8390_v7  ;;  %v8451_v7 = vld [vmem:[#allocation7 + $0x1e0] ss:$16 sps:$4 sm:$0xff]  }
  0xaf   :  { %2153 = vmatpush1.bf16.msra.mxu1 %v8421_v29 }
  0xb0   :  { %457 = vmatmul.mubr.bf16.gmra.mrb[16].mxu0 %v158_v10  ;;  %2154 = vmatprep.subr.bf16.mxu1 %v8429_v31 }
  0xb1   :  { %466 = vmatprep.mubr.bf16.mxu0 %v9148_v0  ;;  %1769 = vmatpush1.bf16.msra.mxu0 %v8388_v11  ;;  %v149_v11 = vld [vmem:[#allocation2 + $0xd8] sm:$0xff] }
  0xb2   :  { %1770 = vmatprep.subr.bf16.mxu0 %v8399_v12  ;;  %650 = vmatmul.mubr.bf16.gmra.mrb[16].mxu1 %v158_v10  ;;  %v148_v10 = vld [vmem:[#allocation2 + $0xd0] sm:$0xff] }
  0xb3   :  { %659 = vmatprep.mubr.bf16.mxu1 %v9148_v0  ;;  %2155 = vmatpush1.bf16.msra.mxu1 %v8427_v34  ;;  %v8462_v12 = vld [vmem:[#allocation7 + $0x204] ss:$16 sps:$4 sm:$0xff]   ;;  %v167_v13 = vpack.c.bf16 %v149_v11, %v148_v10  ;;  %v8501_v11 = vld [vmem:[#allocation7 + $0x26c] ss:$16 sps:$4 sm:$0xff]  }
  0xb4   :  { %2156 = vmatprep.subr.bf16.mxu1 %v8432_v35  ;;  %v8471_v10 = vld [vmem:[#allocation7 + $0x264] ss:$16 sps:$4 sm:$0xff]  }
  0xb5   :  { %1771 = vmatpush1.bf16.msra.mxu0 %v8397_v17  ;;  %v152_v17 = vld [vmem:[#allocation2 + $0xf0] sm:$0xff] }
  0xb6   :  { %1772 = vmatprep.subr.bf16.mxu0 %v8408_v18  ;;  %v153_v18 = vld [vmem:[#allocation2 + $0xf8] sm:$0xff] }
  0xb7   :  { %2157 = vmatpush1.bf16.msra.mxu1 %v8430_v39  ;;  %v169_v19 = vpack.c.bf16 %v153_v18, %v152_v17 }
  0xb8   :  { %467 = vmatmul.mubr.bf16.gmra.mrb[20].mxu0 %v159_v21  ;;  %2158 = vmatprep.subr.bf16.mxu1 %v8438_v41 }
  0xb9   :  { %476 = vmatprep.mubr.bf16.mxu0 %v9148_v0  ;;  %1773 = vmatpush1.bf16.msra.mxu0 %v8406_v22 }
  0xba   :  { %1774 = vmatprep.subr.bf16.mxu0 %v8417_v24  ;;  %660 = vmatmul.mubr.bf16.gmra.mrb[20].mxu1 %v159_v21  ;;  %v204_v21 = vlaneseq  ;;  %v202_v24 = vld [vmem:[%s10347_s2] sm:$0xf] }
  0xbb   :  { %669 = vmatprep.mubr.bf16.mxu1 %v9148_v0  ;;  %2159 = vmatpush1.bf16.msra.mxu1 %v8436_v44 }
  0xbc   :  { %2160 = vmatprep.subr.bf16.mxu1 %v8441_v46  ;;  %v205_v22 = vshrl.u32 %v204_v21, 7  ;;  %v8465_v46 = vld [vmem:[#allocation7 + $0x224] ss:$16 sps:$4 sm:$0xff]  }
  0xbd   :  { %1775 = vmatpush1.bf16.msra.mxu0 %v8415_v28 }
  0xbe   :  { %1776 = vmatprep.subr.bf16.mxu0 %v8426_v30  ;;  %v9329_v23 = vsub.s32 0, %v205_v22  ;;  %v9334_v25 = vsub.s32 1, %v205_v22  ;;  %v9347_v48 = vsub.s32 2, %v205_v22 }
  0xbf   :  { %2161 = vmatpush1.bf16.msra.mxu1 %v8439_v49 }
  0xc0   :  { %477 = vmatmul.mubr.bf16.gmra.mrb[24].mxu0 %v160_v32  ;;  %2162 = vmatprep.subr.bf16.mxu1 %v8447_v50  ;;  %v9337_v26 = vrot.slane %v202_v24, %v9329_v23  ;;  %v9340_v27 = vrot.slane %v202_v24, %v9334_v25  ;;  %v9355_v61 = vrot.slane %v202_v24, %v9347_v48 }
  0xc1   :  { %486 = vmatprep.mubr.bf16.mxu0 %v9148_v0  ;;  %1777 = vmatpush1.bf16.msra.mxu0 %v8424_v33 }
  0xc2   :  { %1778 = vmatprep.subr.bf16.mxu0 %v8435_v36  ;;  %670 = vmatmul.mubr.bf16.gmra.mrb[24].mxu1 %v160_v32 }
  0xc3   :  { %679 = vmatprep.mubr.bf16.mxu1 %v9148_v0  ;;  %2163 = vmatpush1.bf16.msra.mxu1 %v8445_v52 }
  0xc4   :  { %2164 = vmatprep.subr.bf16.mxu1 %v8450_v53 }
  0xc5   :  { %1779 = vmatpush1.bf16.msra.mxu0 %v8433_v40 }
  0xc6   :  { %1780 = vmatprep.subr.bf16.mxu0 %v8444_v42  ;;  %v8460_v42 = vld [vmem:[#allocation7 + $0x200] ss:$16 sps:$4 sm:$0xff]  }
  0xc7   :  { %2165 = vmatpush1.bf16.msra.mxu1 %v8448_v56  ;;  %v8490_v56 = vld [vmem:[#allocation7 + $0x228] ss:$16 sps:$4 sm:$0xff]  }
  0xc8   :  { %487 = vmatmul.mubr.bf16.gmra.mrb[28].mxu0 %v161_v43  ;;  %2166 = vmatprep.subr.bf16.mxu1 %v8456_v1 }
  0xc9   :  { %496 = vmatprep.mubr.bf16.mxu0 %v9148_v0  ;;  %1781 = vmatpush1.bf16.msra.mxu0 %v8442_v45 }
  0xca   :  { %680 = vmatmul.mubr.bf16.gmra.mrb[28].mxu1 %v161_v43  ;;  %1782 = vmatprep.subr.bf16.mxu0 %v8453_v5  ;;  %v8487_v43 = vld [vmem:[#allocation7 + $0x208] ss:$16 sps:$4 sm:$0xff]   ;;  %v8466_v5 = vld [vmem:[#allocation7 + $0x240] ss:$16 sps:$4 sm:$0xff]  }
  0xcb   :  { %689 = vmatprep.mubr.bf16.mxu1 %v9148_v0  ;;  %2167 = vmatpush1.bf16.msra.mxu1 %v8454_v2 }
  0xcc   :  { %2168 = vmatprep.subr.bf16.mxu1 %v8459_v6  ;;  %v8496_v6 = vld [vmem:[#allocation7 + $0x248] ss:$16 sps:$4 sm:$0xff]  }
  0xcd   :  { %1783 = vmatpush1.bf16.msra.mxu0 %v8451_v7 }
  0xce   :  { %1945 = vmatprep.subr.bf16.mxu0 %v8462_v12 }
  0xcf   :  { %2169 = vmatpush1.bf16.msra.mxu1 %v8457_v8 }
  0xd0   :  { %497 = vmatmul.mubr.bf16.gmra.mrb[32].mxu0 %v162_v51  ;;  %2331 = vmatprep.subr.bf16.mxu1 %v8489_v20  ;;  %v8469_v20 = vld [vmem:[#allocation7 + $0x260] ss:$16 sps:$4 sm:$0xff]  }
  0xd1   :  { %506 = vmatprep.mubr.bf16.mxu0 %v9148_v0 }
  0xd2   :  { %690 = vmatmul.mubr.bf16.gmra.mrb[32].mxu1 %v162_v51  ;;  %v9350_v51 = vsub.s32 3, %v205_v22 }
  0xd3   :  { %699 = vmatprep.mubr.bf16.mxu1 %v9148_v0 }
  0xd4   :  { %v9358_v1 = vrot.slane %v202_v24, %v9350_v51 }
  0xd8   :  { %507 = vmatmul.mubr.bf16.gmra.mrb[36].mxu0 %v163_v57 }
  0xd9   :  { %516 = vmatprep.mubr.bf16.mxu0 %v9148_v0 }
  0xda   :  { %700 = vmatmul.mubr.bf16.gmra.mrb[36].mxu1 %v163_v57 }
  0xdb   :  { %709 = vmatprep.mubr.bf16.mxu1 %v9148_v0 }
  0xe0   :  { %517 = vmatmul.mubr.bf16.gmra.mrb[40].mxu0 %v164_v60 }
  0xe1   :  { %526 = vmatprep.mubr.bf16.mxu0 %v9148_v0 }
  0xe2   :  { %710 = vmatmul.mubr.bf16.gmra.mrb[40].mxu1 %v164_v60  ;;  %v8498_v60 = vld [vmem:[#allocation7 + $0x24c] ss:$16 sps:$4 sm:$0xff]  }
  0xe3   :  { %719 = vmatprep.mubr.bf16.mxu1 %v9148_v0 }
  0xe8   :  { %527 = vmatmul.mubr.bf16.gmra.mrb[44].mxu0 %v165_v63 }
  0xe9   :  { %536 = vmatprep.mubr.bf16.mxu0 %v9148_v0 }
  0xea   :  { %720 = vmatmul.mubr.bf16.gmra.mrb[44].mxu1 %v165_v63 }
  0xeb   :  { %729 = vmatprep.mubr.bf16.mxu1 %v9148_v0 }
  0xf0   :  { %537 = vmatmul.mubr.bf16.gmra.mrb[48].mxu0 %v166_v9 }
  0xf1   :  { %546 = vmatprep.mubr.bf16.mxu0 %v9148_v0 }
  0xf2   :  { %730 = vmatmul.mubr.bf16.gmra.mrb[48].mxu1 %v166_v9 }
  0xf3   :  { %739 = vmatprep.mubr.bf16.mxu1 %v9148_v0 }
  0xf8   :  { %547 = vmatmul.mubr.bf16.gmra.mrb[52].mxu0 %v167_v13 }
  0xf9   :  { %556 = vmatprep.mubr.bf16.mxu0 %v9148_v0 }
  0xfa   :  { %740 = vmatmul.mubr.bf16.gmra.mrb[52].mxu1 %v167_v13 }
  0xfb   :  { %749 = vmatprep.mubr.bf16.mxu1 %v9148_v0 }
 0x100   :  { %557 = vmatmul.mubr.bf16.gmra.mrb[56].mxu0 %v168_v16 }
 0x101   :  { %566 = vmatprep.mubr.bf16.mxu0 %v9148_v0 }
 0x102   :  { %750 = vmatmul.mubr.bf16.gmra.mrb[56].mxu1 %v168_v16 }
 0x103   :  { %759 = vmatprep.mubr.bf16.mxu1 %v9148_v0 }
 0x108   :  { %567 = vmatmul.mubr.bf16.gmra.mrb[60].mxu0 %v169_v19 }
 0x10a   :  { %760 = vmatmul.mubr.bf16.gmra.mrb[60].mxu1 %v169_v19 }
 0x163   :  { %v418_v0 = vpop.f32.mrb[0].mxu0  ;;  %v611_v7 = vpop.f32.mrb[0].mxu1 }
 0x164   :  { %v419_v28 = vadd.f32 %v418_v0, %v9337_v26  ;;  %v420_v29 = vpop.f32.mrb[1].mxu0  ;;  %v612_v12 = vadd.f32 %v611_v7, %v9355_v61  ;;  %v613_v13 = vpop.f32.mrb[1].mxu1 }
 0x165   :  { %v421_v30 = vadd.f32 %v420_v29, %v9340_v27  ;;  %v422_v31 = vpop.f32.mrb[2].mxu0  ;;  %v614_v16 = vadd.f32 %v613_v13, %v9358_v1  ;;  %v615_v17 = vpop.f32.mrb[2].mxu1  ;;  %v8499_v29 = vld [vmem:[#allocation7 + $0x268] ss:$16 sps:$4 sm:$0xff]  }
 0x166   :  { %v423_v32 = vadd.f32 %v422_v31, %v9337_v26  ;;  %v424_v33 = vpop.f32.mrb[3].mxu0  ;;  %v770_v35 = vmax.f32 %v419_v28, 0.0  ;;  %v772_v21 = vmax.f32 %v612_v12, 0.0  ;;  %v616_v22 = vadd.f32 %v615_v17, %v9355_v61  ;;  %v617_v24 = vpop.f32.mrb[3].mxu1  ;;  %v8474_v28 = vld [vmem:[#allocation7 + $0x284] ss:$16 sps:$4 sm:$0xff]  }
 0x167   :  { %v425_v34 = vadd.f32 %v424_v33, %v9340_v27  ;;  %v771_v37 = vmax.f32 %v421_v30, 0.0  ;;  %v773_v30 = vmax.f32 %v614_v16, 0.0  ;;  %v618_v31 = vadd.f32 %v617_v24, %v9358_v1 }
 0x168   :  { %v774_v36 = vmax.f32 %v423_v32, 0.0 }
 0x169   :  { %v775_v38 = vmax.f32 %v425_v34, 0.0  ;;  %v8507_v34 = vld [vmem:[#allocation7 + $0x28c] ss:$16 sps:$4 sm:$0xff]  }
 0x16a   :  { %v898_v39 = vpack.c.bf16 %v774_v36, %v770_v35  ;;  %v776_v35 = vmax.f32 %v616_v22, 0.0 }
 0x16b   :  { %v428_v40 = vpop.f32.mrb[4].mxu0  ;;  %v899_v41 = vpack.c.bf16 %v775_v38, %v771_v37  ;;  %v777_v38 = vmax.f32 %v618_v31, 0.0 }
 0x16c   :  { %v429_v44 = vadd.f32 %v428_v40, %v9337_v26  ;;  %v430_v45 = vpop.f32.mrb[5].mxu0  ;;  %v9368_v40 = vpack.c.bf16 %v776_v35, %v772_v21  ;;  %v8514_v21 = vld [vmem:[#allocation7 + $0x2c8] ss:$16 sps:$4 sm:$0xff]  }
 0x16d   :  { %v431_v49 = vadd.f32 %v430_v45, %v9340_v27  ;;  %v432_v50 = vpop.f32.mrb[6].mxu0  ;;  %1784 = vmatprep.mubr.bf16.mxu0 %v899_v41  ;;  %2170 = vmatprep.mubr.bf16.mxu1 %v899_v41  ;;  %v621_v45 = vpop.f32.mrb[4].mxu1 }
 0x16e   :  { %v433_v52 = vadd.f32 %v432_v50, %v9337_v26  ;;  %v434_v53 = vpop.f32.mrb[7].mxu0  ;;  %1785 = vmatmul.mubr.bf16.vlgmr.msra.gmra.mrb[64].mxu0 %v898_v39  ;;  %2171 = vmatmul.mubr.bf16.vlgmr.msra.gmra.mrb[64].mxu1 %v898_v39  ;;  %v778_v57 = vmax.f32 %v429_v44, 0.0  ;;  %v8505_v44 = vld [vmem:[#allocation7 + $0x288] ss:$16 sps:$4 sm:$0xff]   ;;  %v8477_v50 = vld [vmem:[#allocation7 + $0x2a4] ss:$16 sps:$4 sm:$0xff]  }
 0x16f   :  { %v435_v54 = vadd.f32 %v434_v53, %v9340_v27  ;;  %1946 = vmatpush1.bf16.msra.mxu0 %v8460_v42  ;;  %2332 = vmatpush1.bf16.msra.mxu1 %v8487_v43  ;;  %v779_v62 = vmax.f32 %v431_v49, 0.0  ;;  %v8472_v43 = vld [vmem:[#allocation7 + $0x280] ss:$16 sps:$4 sm:$0xff]   ;;  %v622_v53 = vadd.f32 %v621_v45, %v9355_v61  ;;  %v8486_v45 = vld [vmem:[#allocation7 + $0x304] ss:$16 sps:$4 sm:$0xff]  }
 0x170   :  { %v782_v58 = vmax.f32 %v433_v52, 0.0  ;;  %1947 = vmatprep.subr.bf16.mxu0 %v8465_v46  ;;  %2333 = vmatprep.subr.bf16.mxu1 %v8492_v47  ;;  %v9370_v46 = vpack.c.bf16 %v777_v38, %v773_v30  ;;  %v8510_v52 = vld [vmem:[#allocation7 + $0x2ac] ss:$16 sps:$4 sm:$0xff]  }
 0x171   :  { %v783_v63 = vmax.f32 %v435_v54, 0.0  ;;  %v623_v54 = vpop.f32.mrb[5].mxu1  ;;  %v8519_v30 = vld [vmem:[#allocation7 + $0x2ec] ss:$16 sps:$4 sm:$0xff]  }
 0x172   :  { %v902_v2 = vpack.c.bf16 %v782_v58, %v778_v57  ;;  %v624_v57 = vadd.f32 %v623_v54, %v9358_v1  ;;  %v625_v58 = vpop.f32.mrb[6].mxu1  ;;  %v8525_v54 = vld [vmem:[#allocation7 + $0x30c] ss:$16 sps:$4 sm:$0xff]  }
 0x173   :  { %v438_v3 = vpop.f32.mrb[8].mxu0  ;;  %v903_v4 = vpack.c.bf16 %v783_v63, %v779_v62  ;;  %1948 = vmatpush1.bf16.msra.mxu0 %v8463_v55  ;;  %2334 = vmatpush1.bf16.msra.mxu1 %v8490_v56  ;;  %v8475_v62 = vld [vmem:[#allocation7 + $0x2a0] ss:$16 sps:$4 sm:$0xff]   ;;  %v780_v63 = vmax.f32 %v622_v53, 0.0 }
 0x174   :  { %v439_v8 = vadd.f32 %v438_v3, %v9337_v26  ;;  %v440_v9 = vpop.f32.mrb[9].mxu0  ;;  %1949 = vmatprep.subr.bf16.mxu0 %v8468_v59  ;;  %2335 = vmatprep.subr.bf16.mxu1 %v8498_v60  ;;  %v627_v3 = vpop.f32.mrb[7].mxu1  ;;  %v781_v7 = vmax.f32 %v624_v57, 0.0 }
 0x175   :  { %v441_v14 = vadd.f32 %v440_v9, %v9340_v27  ;;  %v442_v15 = vpop.f32.mrb[10].mxu0  ;;  %1794 = vmatprep.mubr.bf16.mxu0 %v903_v4  ;;  %2180 = vmatprep.mubr.bf16.mxu1 %v903_v4  ;;  %v631_v22 = vpop.f32.mrb[8].mxu1 }
 0x176   :  { %v443_v18 = vadd.f32 %v442_v15, %v9337_v26  ;;  %v444_v19 = vpop.f32.mrb[11].mxu0  ;;  %1795 = vmatmul.mubr.bf16.gmra.mrb[68].mxu0 %v902_v2  ;;  %2181 = vmatmul.mubr.bf16.gmra.mrb[68].mxu1 %v902_v2  ;;  %v786_v32 = vmax.f32 %v439_v8, 0.0  ;;  %v626_v2 = vadd.f32 %v625_v58, %v9355_v61  ;;  %v628_v8 = vadd.f32 %v627_v3, %v9358_v1  ;;  %v8523_v3 = vld [vmem:[#allocation7 + $0x308] ss:$16 sps:$4 sm:$0xff]  }
 0x177   :  { %v445_v0 = vadd.f32 %v444_v19, %v9340_v27  ;;  %1950 = vmatpush1.bf16.msra.mxu0 %v8466_v5  ;;  %2336 = vmatpush1.bf16.msra.mxu1 %v8496_v6  ;;  %v787_v36 = vmax.f32 %v441_v14, 0.0  ;;  %v8480_v5 = vld [vmem:[#allocation7 + $0x2c4] ss:$16 sps:$4 sm:$0xff]   ;;  %v8508_v6 = vld [vmem:[#allocation7 + $0x2a8] ss:$16 sps:$4 sm:$0xff]   ;;  %v632_v31 = vadd.f32 %v631_v22, %v9355_v61 }
 0x178   :  { %v790_v33 = vmax.f32 %v443_v18, 0.0  ;;  %1951 = vmatprep.subr.bf16.mxu0 %v8471_v10  ;;  %2337 = vmatprep.subr.bf16.mxu1 %v8501_v11  ;;  %v8516_v11 = vld [vmem:[#allocation7 + $0x2cc] ss:$16 sps:$4 sm:$0xff]   ;;  %v784_v12 = vmax.f32 %v626_v2, 0.0  ;;  %v785_v15 = vmax.f32 %v628_v8, 0.0 }
 0x179   :  { %v791_v37 = vmax.f32 %v445_v0, 0.0  ;;  %v8484_v2 = vld [vmem:[#allocation7 + $0x300] ss:$16 sps:$4 sm:$0xff]   ;;  %v8495_v8 = vld [vmem:[#allocation7 + $0x324] ss:$16 sps:$4 sm:$0xff]  }
 0x17a   :  { %v906_v39 = vpack.c.bf16 %v790_v33, %v786_v32  ;;  %v9380_v17 = vpack.c.bf16 %v784_v12, %v780_v63  ;;  %v9382_v24 = vpack.c.bf16 %v785_v15, %v781_v7  ;;  %v633_v32 = vpop.f32.mrb[9].mxu1 }
 0x17b   :  { %v448_v41 = vpop.f32.mrb[12].mxu0  ;;  %v907_v42 = vpack.c.bf16 %v791_v37, %v787_v36  ;;  %1952 = vmatpush1.bf16.msra.mxu0 %v8469_v20  ;;  %2338 = vmatpush1.bf16.msra.mxu1 %v8499_v29  ;;  %v8478_v20 = vld [vmem:[#allocation7 + $0x2c0] ss:$16 sps:$4 sm:$0xff]   ;;  %v8483_v29 = vld [vmem:[#allocation7 + $0x2e4] ss:$16 sps:$4 sm:$0xff]   ;;  %v634_v35 = vadd.f32 %v633_v32, %v9358_v1  ;;  %v635_v36 = vpop.f32.mrb[10].mxu1 }
 0x17c   :  { %v449_v47 = vadd.f32 %v448_v41, %v9337_v26  ;;  %v450_v49 = vpop.f32.mrb[13].mxu0  ;;  %1953 = vmatprep.subr.bf16.mxu0 %v8474_v28  ;;  %2339 = vmatprep.subr.bf16.mxu1 %v8507_v34  ;;  %v788_v41 = vmax.f32 %v632_v31, 0.0 }
 0x17d   :  { %v451_v55 = vadd.f32 %v450_v49, %v9340_v27  ;;  %v452_v56 = vpop.f32.mrb[14].mxu0  ;;  %1804 = vmatprep.mubr.bf16.mxu0 %v907_v42  ;;  %2190 = vmatprep.mubr.bf16.mxu1 %v907_v42  ;;  %v636_v42 = vadd.f32 %v635_v36, %v9355_v61  ;;  %v789_v49 = vmax.f32 %v634_v35, 0.0 }
 0x17e   :  { %v453_v59 = vadd.f32 %v452_v56, %v9337_v26  ;;  %v454_v60 = vpop.f32.mrb[15].mxu0  ;;  %1805 = vmatmul.mubr.bf16.gmra.mrb[72].mxu0 %v906_v39  ;;  %2191 = vmatmul.mubr.bf16.gmra.mrb[72].mxu1 %v906_v39  ;;  %v794_v9 = vmax.f32 %v449_v47, 0.0  ;;  %v8481_v39 = vld [vmem:[#allocation7 + $0x2e0] ss:$16 sps:$4 sm:$0xff]   ;;  %v8517_v47 = vld [vmem:[#allocation7 + $0x2e8] ss:$16 sps:$4 sm:$0xff]  }
 0x17f   :  { %v455_v4 = vadd.f32 %v454_v60, %v9340_v27  ;;  %1954 = vmatpush1.bf16.msra.mxu0 %v8472_v43  ;;  %2340 = vmatpush1.bf16.msra.mxu1 %v8505_v44  ;;  %v795_v13 = vmax.f32 %v451_v55, 0.0  ;;  %v637_v43 = vpop.f32.mrb[11].mxu1  ;;  %v792_v55 = vmax.f32 %v636_v42, 0.0 }
 0x180   :  { %v798_v10 = vmax.f32 %v453_v59, 0.0  ;;  %1955 = vmatprep.subr.bf16.mxu0 %v8477_v50  ;;  %2341 = vmatprep.subr.bf16.mxu1 %v8510_v52  ;;  %v638_v50 = vadd.f32 %v637_v43, %v9358_v1 }
 0x181   :  { %v799_v14 = vmax.f32 %v455_v4, 0.0  ;;  %v9392_v60 = vpack.c.bf16 %v792_v55, %v788_v41  ;;  %v641_v4 = vpop.f32.mrb[12].mxu1 }
 0x182   :  { %v910_v16 = vpack.c.bf16 %v798_v10, %v794_v9  ;;  %v793_v58 = vmax.f32 %v638_v50, 0.0  ;;  %v8528_v9 = vld [vmem:[#allocation7 + $0x32c] ss:$16 sps:$4 sm:$0xff]   ;;  %v642_v10 = vadd.f32 %v641_v4, %v9355_v61 }
 0x183   :  { %v458_v18 = vpop.f32.mrb[16].mxu0  ;;  %v911_v19 = vpack.c.bf16 %v799_v14, %v795_v13  ;;  %1956 = vmatpush1.bf16.msra.mxu0 %v8475_v62  ;;  %2342 = vmatpush1.bf16.msra.mxu1 %v8508_v6 }
 0x184   :  { %v459_v0 = vadd.f32 %v458_v18, %v9337_v26  ;;  %v460_v28 = vpop.f32.mrb[17].mxu0  ;;  %1957 = vmatprep.subr.bf16.mxu0 %v8480_v5  ;;  %2343 = vmatprep.subr.bf16.mxu1 %v8516_v11  ;;  %v9394_v5 = vpack.c.bf16 %v793_v58, %v789_v49  ;;  %v643_v11 = vpop.f32.mrb[13].mxu1 }
 0x185   :  { %v461_v33 = vadd.f32 %v460_v28, %v9340_v27  ;;  %v462_v34 = vpop.f32.mrb[18].mxu0  ;;  %1814 = vmatprep.mubr.bf16.mxu0 %v911_v19  ;;  %2200 = vmatprep.mubr.bf16.mxu1 %v911_v19  ;;  %v644_v14 = vadd.f32 %v643_v11, %v9358_v1  ;;  %v645_v15 = vpop.f32.mrb[14].mxu1  ;;  %v8493_v19 = vld [vmem:[#allocation7 + $0x320] ss:$16 sps:$4 sm:$0xff]   ;;  %v8504_v28 = vld [vmem:[#allocation7 + $0x344] ss:$16 sps:$4 sm:$0xff]  }
 0x186   :  { %v463_v37 = vadd.f32 %v462_v34, %v9337_v26  ;;  %v464_v38 = vpop.f32.mrb[19].mxu0  ;;  %1815 = vmatmul.mubr.bf16.gmra.mrb[76].mxu0 %v910_v16  ;;  %2201 = vmatmul.mubr.bf16.gmra.mrb[76].mxu1 %v910_v16  ;;  %v802_v52 = vmax.f32 %v459_v0, 0.0  ;;  %v647_v22 = vpop.f32.mrb[15].mxu1  ;;  %v8534_v34 = vld [vmem:[#allocation7 + $0x34c] ss:$16 sps:$4 sm:$0xff]  }
 0x187   :  { %v465_v44 = vadd.f32 %v464_v38, %v9340_v27  ;;  %1958 = vmatpush1.bf16.msra.mxu0 %v8478_v20  ;;  %2344 = vmatpush1.bf16.msra.mxu1 %v8514_v21  ;;  %v803_v56 = vmax.f32 %v461_v33, 0.0  ;;  %v796_v20 = vmax.f32 %v642_v10, 0.0  ;;  %v646_v21 = vadd.f32 %v645_v15, %v9355_v61  ;;  %v8535_v10 = vld [vmem:[#allocation7 + $0x368] ss:$16 sps:$4 sm:$0xff]   ;;  %v8543_v15 = vld [vmem:[#allocation7 + $0x38c] ss:$16 sps:$4 sm:$0xff]  }
 0x188   :  { %v806_v53 = vmax.f32 %v463_v37, 0.0  ;;  %1959 = vmatprep.subr.bf16.mxu0 %v8483_v29  ;;  %2345 = vmatprep.subr.bf16.mxu1 %v8519_v30  ;;  %v8526_v29 = vld [vmem:[#allocation7 + $0x328] ss:$16 sps:$4 sm:$0xff]   ;;  %v797_v30 = vmax.f32 %v644_v14, 0.0  ;;  %v648_v31 = vadd.f32 %v647_v22, %v9358_v1 }
 0x189   :  { %v807_v57 = vmax.f32 %v465_v44, 0.0  ;;  %v800_v35 = vmax.f32 %v646_v21, 0.0  ;;  %v8502_v44 = vld [vmem:[#allocation7 + $0x340] ss:$16 sps:$4 sm:$0xff]  }
 0x18a   :  { %v914_v59 = vpack.c.bf16 %v806_v53, %v802_v52  ;;  %v801_v38 = vmax.f32 %v648_v31, 0.0  ;;  %v8513_v53 = vld [vmem:[#allocation7 + $0x364] ss:$16 sps:$4 sm:$0xff]  }
 0x18b   :  { %v468_v62 = vpop.f32.mrb[20].mxu0  ;;  %v915_v63 = vpack.c.bf16 %v807_v57, %v803_v56  ;;  %1960 = vmatpush1.bf16.msra.mxu0 %v8481_v39  ;;  %2346 = vmatpush1.bf16.msra.mxu1 %v8517_v47  ;;  %v9404_v41 = vpack.c.bf16 %v800_v35, %v796_v20  ;;  %v651_v47 = vpop.f32.mrb[16].mxu1  ;;  %v8531_v35 = vld [vmem:[#allocation7 + $0x3a4] ss:$16 sps:$4 sm:$0xff]  }
 0x18c   :  { %v469_v6 = vadd.f32 %v468_v62, %v9337_v26  ;;  %v470_v7 = vpop.f32.mrb[21].mxu0  ;;  %1961 = vmatprep.subr.bf16.mxu0 %v8486_v45  ;;  %2347 = vmatprep.subr.bf16.mxu1 %v8525_v54  ;;  %v8532_v45 = vld [vmem:[#allocation7 + $0x348] ss:$16 sps:$4 sm:$0xff]   ;;  %v9406_v49 = vpack.c.bf16 %v801_v38, %v797_v30  ;;  %v8537_v54 = vld [vmem:[#allocation7 + $0x36c] ss:$16 sps:$4 sm:$0xff]   ;;  %v652_v55 = vadd.f32 %v651_v47, %v9355_v61  ;;  %v653_v56 = vpop.f32.mrb[17].mxu1 }
 0x18d   :  { %v471_v12 = vadd.f32 %v470_v7, %v9340_v27  ;;  %v472_v13 = vpop.f32.mrb[22].mxu0  ;;  %1824 = vmatprep.mubr.bf16.mxu0 %v915_v63  ;;  %2210 = vmatprep.mubr.bf16.mxu1 %v915_v63  ;;  %v655_v62 = vpop.f32.mrb[18].mxu1  ;;  %v8541_v30 = vld [vmem:[#allocation7 + $0x388] ss:$16 sps:$4 sm:$0xff]  }
 0x18e   :  { %v473_v16 = vadd.f32 %v472_v13, %v9337_v26  ;;  %v474_v18 = vpop.f32.mrb[23].mxu0  ;;  %1825 = vmatmul.mubr.bf16.gmra.mrb[80].mxu0 %v914_v59  ;;  %2211 = vmatmul.mubr.bf16.gmra.mrb[80].mxu1 %v914_v59  ;;  %v810_v32 = vmax.f32 %v469_v6, 0.0  ;;  %v654_v59 = vadd.f32 %v653_v56, %v9358_v1  ;;  %v804_v4 = vmax.f32 %v652_v55, 0.0  ;;  %v657_v7 = vpop.f32.mrb[19].mxu1  ;;  %v8540_v56 = vld [vmem:[#allocation7 + $0x3c4] ss:$16 sps:$4 sm:$0xff]  }
 0x18f   :  { %v475_v0 = vadd.f32 %v474_v18, %v9340_v27  ;;  %1962 = vmatpush1.bf16.msra.mxu0 %v8484_v2  ;;  %2348 = vmatpush1.bf16.msra.mxu1 %v8523_v3  ;;  %v811_v36 = vmax.f32 %v471_v12, 0.0  ;;  %v8511_v3 = vld [vmem:[#allocation7 + $0x360] ss:$16 sps:$4 sm:$0xff]   ;;  %v656_v6 = vadd.f32 %v655_v62, %v9355_v61  ;;  %v658_v12 = vadd.f32 %v657_v7, %v9358_v1  ;;  %v661_v31 = vpop.f32.mrb[20].mxu1 }
 0x190   :  { %v814_v33 = vmax.f32 %v473_v16, 0.0  ;;  %1963 = vmatprep.subr.bf16.mxu0 %v8495_v8  ;;  %2349 = vmatprep.subr.bf16.mxu1 %v8528_v9  ;;  %v8522_v9 = vld [vmem:[#allocation7 + $0x384] ss:$16 sps:$4 sm:$0xff]   ;;  %v805_v11 = vmax.f32 %v654_v59, 0.0  ;;  %v663_v38 = vpop.f32.mrb[21].mxu1 }
 0x191   :  { %v815_v37 = vmax.f32 %v475_v0, 0.0  ;;  %v808_v16 = vmax.f32 %v656_v6, 0.0  ;;  %v809_v20 = vmax.f32 %v658_v12, 0.0  ;;  %v8538_v12 = vld [vmem:[#allocation7 + $0x3c0] ss:$16 sps:$4 sm:$0xff]  }
 0x192   :  { %v918_v39 = vpack.c.bf16 %v814_v33, %v810_v32 }
 0x193   :  { %v478_v42 = vpop.f32.mrb[24].mxu0  ;;  %v919_v43 = vpack.c.bf16 %v815_v37, %v811_v36  ;;  %1964 = vmatpush1.bf16.msra.mxu0 %v8493_v19  ;;  %2350 = vmatpush1.bf16.msra.mxu1 %v8526_v29  ;;  %v9416_v22 = vpack.c.bf16 %v808_v16, %v804_v4  ;;  %v8520_v29 = vld [vmem:[#allocation7 + $0x380] ss:$16 sps:$4 sm:$0xff]   ;;  %v9418_v32 = vpack.c.bf16 %v809_v20, %v805_v11  ;;  %v8546_v36 = vld [vmem:[#allocation7 + $0x3ac] ss:$16 sps:$4 sm:$0xff]  }
 0x194   :  { %v479_v50 = vadd.f32 %v478_v42, %v9337_v26  ;;  %v480_v52 = vpop.f32.mrb[25].mxu0  ;;  %1965 = vmatprep.subr.bf16.mxu0 %v8504_v28  ;;  %2351 = vmatprep.subr.bf16.mxu1 %v8534_v34  ;;  %v662_v37 = vadd.f32 %v661_v31, %v9355_v61  ;;  %v8555_v20 = vld [vmem:[#allocation7 + $0x3ec] ss:$16 sps:$4 sm:$0xff]  }
 0x195   :  { %v481_v57 = vadd.f32 %v480_v52, %v9340_v27  ;;  %v482_v58 = vpop.f32.mrb[26].mxu0  ;;  %1834 = vmatprep.mubr.bf16.mxu0 %v919_v43  ;;  %2220 = vmatprep.mubr.bf16.mxu1 %v919_v43  ;;  %v664_v43 = vadd.f32 %v663_v38, %v9358_v1 }
 0x196   :  { %v483_v63 = vadd.f32 %v482_v58, %v9337_v26  ;;  %v484_v2 = vpop.f32.mrb[27].mxu0  ;;  %1835 = vmatmul.mubr.bf16.gmra.mrb[84].mxu0 %v918_v39  ;;  %2221 = vmatmul.mubr.bf16.gmra.mrb[84].mxu1 %v918_v39  ;;  %v818_v13 = vmax.f32 %v479_v50, 0.0  ;;  %v8529_v50 = vld [vmem:[#allocation7 + $0x3a0] ss:$16 sps:$4 sm:$0xff]   ;;  %v812_v52 = vmax.f32 %v662_v37, 0.0 }
 0x197   :  { %v485_v8 = vadd.f32 %v484_v2, %v9340_v27  ;;  %1966 = vmatpush1.bf16.msra.mxu0 %v8502_v44  ;;  %2352 = vmatpush1.bf16.msra.mxu1 %v8532_v45  ;;  %v819_v18 = vmax.f32 %v481_v57, 0.0  ;;  %v665_v44 = vpop.f32.mrb[22].mxu1  ;;  %v8544_v57 = vld [vmem:[#allocation7 + $0x3a8] ss:$16 sps:$4 sm:$0xff]   ;;  %v813_v58 = vmax.f32 %v664_v43, 0.0 }
 0x198   :  { %v822_v14 = vmax.f32 %v483_v63, 0.0  ;;  %1967 = vmatprep.subr.bf16.mxu0 %v8513_v53  ;;  %2353 = vmatprep.subr.bf16.mxu1 %v8537_v54  ;;  %v666_v53 = vadd.f32 %v665_v44, %v9355_v61  ;;  %v667_v54 = vpop.f32.mrb[23].mxu1  ;;  %v8552_v2 = vld [vmem:[#allocation7 + $0x3cc] ss:$16 sps:$4 sm:$0xff]  }
 0x199   :  { %v823_v19 = vmax.f32 %v485_v8, 0.0  ;;  %v668_v59 = vadd.f32 %v667_v54, %v9358_v1 }
 0x19a   :  { %v922_v21 = vpack.c.bf16 %v822_v14, %v818_v13  ;;  %v8550_v13 = vld [vmem:[#allocation7 + $0x3c8] ss:$16 sps:$4 sm:$0xff]   ;;  %v671_v14 = vpop.f32.mrb[24].mxu1 }
 0x19b   :  { %v488_v0 = vpop.f32.mrb[28].mxu0  ;;  %v923_v28 = vpack.c.bf16 %v823_v19, %v819_v18  ;;  %1968 = vmatpush1.bf16.msra.mxu0 %v8511_v3  ;;  %2354 = vmatpush1.bf16.msra.mxu1 %v8535_v10  ;;  %v816_v3 = vmax.f32 %v666_v53, 0.0  ;;  %v817_v7 = vmax.f32 %v668_v59, 0.0  ;;  %v8549_v19 = vld [vmem:[#allocation7 + $0x3e4] ss:$16 sps:$4 sm:$0xff]  }
 0x19c   :  { %v489_v33 = vadd.f32 %v488_v0, %v9337_v26  ;;  %v490_v34 = vpop.f32.mrb[29].mxu0  ;;  %1969 = vmatprep.subr.bf16.mxu0 %v8522_v9  ;;  %2355 = vmatprep.subr.bf16.mxu1 %v8543_v15  ;;  %v673_v0 = vpop.f32.mrb[25].mxu1 }
 0x19d   :  { %v491_v39 = vadd.f32 %v490_v34, %v9340_v27  ;;  %v492_v42 = vpop.f32.mrb[30].mxu0  ;;  %1844 = vmatprep.mubr.bf16.mxu0 %v923_v28  ;;  %2230 = vmatprep.mubr.bf16.mxu1 %v923_v28  ;;  %v9428_v9 = vpack.c.bf16 %v816_v3, %v812_v52  ;;  %v9430_v15 = vpack.c.bf16 %v817_v7, %v813_v58  ;;  %v675_v31 = vpop.f32.mrb[26].mxu1 }
 0x19e   :  { %v493_v45 = vadd.f32 %v492_v42, %v9337_v26  ;;  %v494_v47 = vpop.f32.mrb[31].mxu0  ;;  %1845 = vmatmul.mubr.bf16.gmra.mrb[88].mxu0 %v922_v21  ;;  %2231 = vmatmul.mubr.bf16.gmra.mrb[88].mxu1 %v922_v21  ;;  %v826_v62 = vmax.f32 %v489_v33, 0.0  ;;  %v672_v21 = vadd.f32 %v671_v14, %v9355_v61  ;;  %v677_v37 = vpop.f32.mrb[27].mxu1  ;;  %v8553_v42 = vld [vmem:[#allocation7 + $0x3e8] ss:$16 sps:$4 sm:$0xff]  }
 0x19f   :  { %v495_v55 = vadd.f32 %v494_v47, %v9340_v27  ;;  %1970 = vmatpush1.bf16.msra.mxu0 %v8520_v29  ;;  %2356 = vmatpush1.bf16.msra.mxu1 %v8541_v30  ;;  %v827_v4 = vmax.f32 %v491_v39, 0.0  ;;  %v674_v30 = vadd.f32 %v673_v0, %v9358_v1  ;;  %v8547_v39 = vld [vmem:[#allocation7 + $0x3e0] ss:$16 sps:$4 sm:$0xff]   ;;  %v678_v44 = vadd.f32 %v677_v37, %v9358_v1  ;;  %v681_v59 = vpop.f32.mrb[28].mxu1 }
 0x1a0   :  { %v830_v63 = vmax.f32 %v493_v45, 0.0  ;;  %1971 = vmatprep.subr.bf16.mxu0 %v8531_v35  ;;  %2357 = vmatprep.subr.bf16.mxu1 %v8546_v36  ;;  %v820_v35 = vmax.f32 %v672_v21, 0.0  ;;  %v676_v36 = vadd.f32 %v675_v31, %v9355_v61  ;;  %v682_v3 = vadd.f32 %v681_v59, %v9355_v61 }
 0x1a1   :  { %v831_v6 = vmax.f32 %v495_v55, 0.0  ;;  %v821_v43 = vmax.f32 %v674_v30, 0.0  ;;  %v825_v54 = vmax.f32 %v678_v44, 0.0 }
 0x1a2   :  { %v926_v8 = vpack.c.bf16 %v830_v63, %v826_v62 }
 0x1a3   :  { %v498_v10 = vpop.f32.mrb[32].mxu0  ;;  %v927_v11 = vpack.c.bf16 %v831_v6, %v827_v4  ;;  %1972 = vmatpush1.bf16.msra.mxu0 %v8529_v50  ;;  %2358 = vmatpush1.bf16.msra.mxu1 %v8544_v57  ;;  %v824_v50 = vmax.f32 %v676_v36, 0.0  ;;  %v9442_v62 = vpack.c.bf16 %v825_v54, %v821_v43  ;;  %v683_v4 = vpop.f32.mrb[29].mxu1 }
 0x1a4   :  { %v499_v16 = vadd.f32 %v498_v10, %v9337_v26  ;;  %v500_v18 = vpop.f32.mrb[33].mxu0  ;;  %1973 = vmatprep.subr.bf16.mxu0 %v8540_v56  ;;  %2359 = vmatprep.subr.bf16.mxu1 %v8552_v2  ;;  %v685_v10 = vpop.f32.mrb[30].mxu1 }
 0x1a5   :  { %v501_v28 = vadd.f32 %v500_v18, %v9340_v27  ;;  %v502_v29 = vpop.f32.mrb[34].mxu0  ;;  %1854 = vmatprep.mubr.bf16.mxu0 %v927_v11  ;;  %2240 = vmatprep.mubr.bf16.mxu1 %v927_v11  ;;  %v9440_v56 = vpack.c.bf16 %v824_v50, %v820_v35  ;;  %v686_v14 = vadd.f32 %v685_v10, %v9355_v61 }
 0x1a6   :  { %v503_v33 = vadd.f32 %v502_v29, %v9337_v26  ;;  %v504_v34 = vpop.f32.mrb[35].mxu0  ;;  %1855 = vmatmul.mubr.bf16.gmra.mrb[92].mxu0 %v926_v8  ;;  %2241 = vmatmul.mubr.bf16.gmra.mrb[92].mxu1 %v926_v8  ;;  %v834_v45 = vmax.f32 %v499_v16, 0.0  ;;  %v684_v8 = vadd.f32 %v683_v4, %v9358_v1  ;;  %v687_v16 = vpop.f32.mrb[31].mxu1 }
 0x1a7   :  { %v505_v38 = vadd.f32 %v504_v34, %v9340_v27  ;;  %1974 = vmatpush1.bf16.msra.mxu0 %v8538_v12  ;;  %2360 = vmatpush1.bf16.msra.mxu1 %v8550_v13  ;;  %v835_v52 = vmax.f32 %v501_v28, 0.0  ;;  %v828_v13 = vmax.f32 %v682_v3, 0.0  ;;  %v832_v28 = vmax.f32 %v686_v14, 0.0  ;;  %v691_v37 = vpop.f32.mrb[32].mxu1 }
 0x1a8   :  { %v838_v47 = vmax.f32 %v503_v33, 0.0  ;;  %1975 = vmatprep.subr.bf16.mxu0 %v8549_v19  ;;  %2361 = vmatprep.subr.bf16.mxu1 %v8555_v20  ;;  %v829_v19 = vmax.f32 %v684_v8, 0.0  ;;  %v688_v20 = vadd.f32 %v687_v16, %v9358_v1  ;;  %v692_v43 = vadd.f32 %v691_v37, %v9355_v61  ;;  %v693_v44 = vpop.f32.mrb[33].mxu1 }
 0x1a9   :  { %v839_v53 = vmax.f32 %v505_v38, 0.0  ;;  %v9452_v34 = vpack.c.bf16 %v832_v28, %v828_v13  ;;  %v694_v50 = vadd.f32 %v693_v44, %v9358_v1 }
 0x1aa   :  { %v930_v55 = vpack.c.bf16 %v838_v47, %v834_v45  ;;  %v833_v31 = vmax.f32 %v688_v20, 0.0 }
 0x1ab   :  { %v508_v57 = vpop.f32.mrb[36].mxu0  ;;  %v931_v58 = vpack.c.bf16 %v839_v53, %v835_v52  ;;  %1976 = vmatpush1.bf16.msra.mxu0 %v8547_v39  ;;  %2362 = vmatpush1.bf16.msra.mxu1 %v8553_v42  ;;  %v695_v52 = vpop.f32.mrb[34].mxu1 }
 0x1ac   :  { %v509_v63 = vadd.f32 %v508_v57, %v9337_v26  ;;  %v510_v2 = vpop.f32.mrb[37].mxu0  ;;  %v9454_v38 = vpack.c.bf16 %v833_v31, %v829_v19  ;;  %v696_v57 = vadd.f32 %v695_v52, %v9355_v61 }
 0x1ad   :  { %v511_v6 = vadd.f32 %v510_v2, %v9340_v27  ;;  %v512_v7 = vpop.f32.mrb[38].mxu0  ;;  %1864 = vmatprep.mubr.bf16.mxu0 %v931_v58  ;;  %2250 = vmatprep.mubr.bf16.mxu1 %v931_v58  ;;  %v697_v58 = vpop.f32.mrb[35].mxu1 }
 0x1ae   :  { %v513_v11 = vadd.f32 %v512_v7, %v9337_v26  ;;  %v514_v12 = vpop.f32.mrb[39].mxu0  ;;  %1865 = vmatmul.mubr.bf16.gmra.mrb[96].mxu0 %v930_v55  ;;  %2251 = vmatmul.mubr.bf16.gmra.mrb[96].mxu1 %v930_v55  ;;  %v842_v21 = vmax.f32 %v509_v63, 0.0  ;;  %v836_v55 = vmax.f32 %v692_v43, 0.0  ;;  %v837_v63 = vmax.f32 %v694_v50, 0.0  ;;  %v701_v16 = vpop.f32.mrb[36].mxu1 }
 0x1af   :  { %v515_v18 = vadd.f32 %v514_v12, %v9340_v27  ;;  %v843_v29 = vmax.f32 %v511_v6, 0.0  ;;  %v698_v2 = vadd.f32 %v697_v58, %v9358_v1  ;;  %v840_v6 = vmax.f32 %v696_v57, 0.0 }
 0x1b0   :  { %v846_v0 = vmax.f32 %v513_v11, 0.0 }
 0x1b1   :  { %v847_v30 = vmax.f32 %v515_v18, 0.0  ;;  %v841_v10 = vmax.f32 %v698_v2, 0.0  ;;  %v9464_v12 = vpack.c.bf16 %v840_v6, %v836_v55 }
 0x1b2   :  { %v934_v33 = vpack.c.bf16 %v846_v0, %v842_v21  ;;  %v702_v21 = vadd.f32 %v701_v16, %v9355_v61  ;;  %v703_v0 = vpop.f32.mrb[37].mxu1 }
 0x1b3   :  { %v518_v35 = vpop.f32.mrb[40].mxu0  ;;  %v935_v36 = vpack.c.bf16 %v847_v30, %v843_v29  ;;  %v9466_v18 = vpack.c.bf16 %v841_v10, %v837_v63  ;;  %v704_v30 = vadd.f32 %v703_v0, %v9358_v1  ;;  %v705_v31 = vpop.f32.mrb[38].mxu1 }
 0x1b4   :  { %v519_v39 = vadd.f32 %v518_v35, %v9337_v26  ;;  %v520_v42 = vpop.f32.mrb[41].mxu0  ;;  %v706_v37 = vadd.f32 %v705_v31, %v9355_v61 }
 0x1b5   :  { %v521_v45 = vadd.f32 %v520_v42, %v9340_v27  ;;  %v522_v47 = vpop.f32.mrb[42].mxu0  ;;  %1874 = vmatprep.mubr.bf16.mxu0 %v935_v36  ;;  %2260 = vmatprep.mubr.bf16.mxu1 %v935_v36  ;;  %v844_v36 = vmax.f32 %v702_v21, 0.0  ;;  %v845_v43 = vmax.f32 %v704_v30, 0.0  ;;  %v8558_v30 = vld [vmem:[#allocation8 + $0x4] ss:$16 sps:$4 sm:$0xff]  }
 0x1b6   :  { %v523_v53 = vadd.f32 %v522_v47, %v9337_v26  ;;  %v524_v54 = vpop.f32.mrb[43].mxu0  ;;  %1875 = vmatmul.mubr.bf16.gmra.mrb[100].mxu0 %v934_v33  ;;  %2261 = vmatmul.mubr.bf16.gmra.mrb[100].mxu1 %v934_v33  ;;  %v850_v3 = vmax.f32 %v519_v39, 0.0  ;;  %v707_v39 = vpop.f32.mrb[39].mxu1  ;;  %v848_v50 = vmax.f32 %v706_v37, 0.0 }
 0x1b7   :  { %v525_v59 = vadd.f32 %v524_v54, %v9340_v27  ;;  %v851_v7 = vmax.f32 %v521_v45, 0.0  ;;  %v708_v44 = vadd.f32 %v707_v39, %v9358_v1  ;;  %v711_v63 = vpop.f32.mrb[40].mxu1  ;;  %3506 = vmatprep.subr.bf16.mxu0 %v8558_v30 }
 0x1b8   :  { %v854_v4 = vmax.f32 %v523_v53, 0.0  ;;  %v9476_v57 = vpack.c.bf16 %v848_v50, %v844_v36  ;;  %v712_v6 = vadd.f32 %v711_v63, %v9355_v61 }
 0x1b9   :  { %v855_v8 = vmax.f32 %v525_v59, 0.0  ;;  %v849_v54 = vmax.f32 %v708_v44, 0.0 }
 0x1ba   :  { %v938_v11 = vpack.c.bf16 %v854_v4, %v850_v3 }
 0x1bb   :  { %v528_v13 = vpop.f32.mrb[44].mxu0  ;;  %v939_v14 = vpack.c.bf16 %v855_v8, %v851_v7  ;;  %v9478_v2 = vpack.c.bf16 %v849_v54, %v845_v43  ;;  %v713_v7 = vpop.f32.mrb[41].mxu1 }
 0x1bc   :  { %v529_v19 = vadd.f32 %v528_v13, %v9337_v26  ;;  %v530_v20 = vpop.f32.mrb[45].mxu0  ;;  %v715_v13 = vpop.f32.mrb[42].mxu1 }
 0x1bd   :  { %v531_v28 = vadd.f32 %v530_v20, %v9340_v27  ;;  %v532_v29 = vpop.f32.mrb[46].mxu0  ;;  %1884 = vmatprep.mubr.bf16.mxu0 %v939_v14  ;;  %2270 = vmatprep.mubr.bf16.mxu1 %v939_v14  ;;  %v716_v20 = vadd.f32 %v715_v13, %v9355_v61  ;;  %v717_v21 = vpop.f32.mrb[43].mxu1 }
 0x1be   :  { %v533_v33 = vadd.f32 %v532_v29, %v9337_v26  ;;  %v534_v35 = vpop.f32.mrb[47].mxu0  ;;  %1885 = vmatmul.mubr.bf16.gmra.mrb[104].mxu0 %v938_v11  ;;  %2271 = vmatmul.mubr.bf16.gmra.mrb[104].mxu1 %v938_v11  ;;  %v858_v45 = vmax.f32 %v529_v19, 0.0  ;;  %v714_v11 = vadd.f32 %v713_v7, %v9358_v1  ;;  %v852_v19 = vmax.f32 %v712_v6, 0.0 }
 0x1bf   :  { %v535_v42 = vadd.f32 %v534_v35, %v9340_v27  ;;  %v859_v52 = vmax.f32 %v531_v28, 0.0  ;;  %v718_v29 = vadd.f32 %v717_v21, %v9358_v1  ;;  %v856_v35 = vmax.f32 %v716_v20, 0.0 }
 0x1c0   :  { %v862_v47 = vmax.f32 %v533_v33, 0.0  ;;  %v853_v28 = vmax.f32 %v714_v11, 0.0 }
 0x1c1   :  { %v863_v53 = vmax.f32 %v535_v42, 0.0  ;;  %v857_v39 = vmax.f32 %v718_v29, 0.0  ;;  %v9488_v43 = vpack.c.bf16 %v856_v35, %v852_v19 }
 0x1c2   :  { %v942_v55 = vpack.c.bf16 %v862_v47, %v858_v45  ;;  %v721_v47 = vpop.f32.mrb[44].mxu1 }
 0x1c3   :  { %v538_v58 = vpop.f32.mrb[48].mxu0  ;;  %v943_v59 = vpack.c.bf16 %v863_v53, %v859_v52  ;;  %v9490_v50 = vpack.c.bf16 %v857_v39, %v853_v28  ;;  %v722_v54 = vadd.f32 %v721_v47, %v9355_v61 }
 0x1c4   :  { %v539_v3 = vadd.f32 %v538_v58, %v9337_v26  ;;  %v540_v4 = vpop.f32.mrb[49].mxu0 }
 0x1c5   :  { %v541_v8 = vadd.f32 %v540_v4, %v9340_v27  ;;  %v542_v10 = vpop.f32.mrb[50].mxu0  ;;  %1894 = vmatprep.mubr.bf16.mxu0 %v943_v59  ;;  %2280 = vmatprep.mubr.bf16.mxu1 %v943_v59  ;;  %v860_v7 = vmax.f32 %v722_v54, 0.0 }
 0x1c6   :  { %v543_v14 = vadd.f32 %v542_v10, %v9337_v26  ;;  %v544_v16 = vpop.f32.mrb[51].mxu0  ;;  %1895 = vmatmul.mubr.bf16.gmra.mrb[108].mxu0 %v942_v55  ;;  %2281 = vmatmul.mubr.bf16.gmra.mrb[108].mxu1 %v942_v55  ;;  %v866_v31 = vmax.f32 %v539_v3, 0.0  ;;  %v723_v55 = vpop.f32.mrb[45].mxu1 }
 0x1c7   :  { %v545_v0 = vadd.f32 %v544_v16, %v9340_v27  ;;  %v867_v36 = vmax.f32 %v541_v8, 0.0  ;;  %v724_v63 = vadd.f32 %v723_v55, %v9358_v1  ;;  %v725_v3 = vpop.f32.mrb[46].mxu1 }
 0x1c8   :  { %v870_v33 = vmax.f32 %v543_v14, 0.0  ;;  %v726_v8 = vadd.f32 %v725_v3, %v9355_v61  ;;  %v727_v10 = vpop.f32.mrb[47].mxu1 }
 0x1c9   :  { %v871_v37 = vmax.f32 %v545_v0, 0.0  ;;  %v861_v13 = vmax.f32 %v724_v63, 0.0  ;;  %v728_v14 = vadd.f32 %v727_v10, %v9358_v1  ;;  %v731_v35 = vpop.f32.mrb[48].mxu1 }
 0x1ca   :  { %v946_v42 = vpack.c.bf16 %v870_v33, %v866_v31  ;;  %v864_v20 = vmax.f32 %v726_v8, 0.0 }
 0x1cb   :  { %v548_v44 = vpop.f32.mrb[52].mxu0  ;;  %v947_v45 = vpack.c.bf16 %v871_v37, %v867_v36  ;;  %v865_v28 = vmax.f32 %v728_v14, 0.0 }
 0x1cc   :  { %v549_v52 = vadd.f32 %v548_v44, %v9337_v26  ;;  %v550_v53 = vpop.f32.mrb[53].mxu0  ;;  %v9500_v30 = vpack.c.bf16 %v864_v20, %v860_v7  ;;  %v733_v44 = vpop.f32.mrb[49].mxu1 }
 0x1cd   :  { %v551_v58 = vadd.f32 %v550_v53, %v9340_v27  ;;  %v552_v59 = vpop.f32.mrb[54].mxu0  ;;  %1904 = vmatprep.mubr.bf16.mxu0 %v947_v45  ;;  %2290 = vmatprep.mubr.bf16.mxu1 %v947_v45  ;;  %v9502_v36 = vpack.c.bf16 %v865_v28, %v861_v13  ;;  %v735_v53 = vpop.f32.mrb[50].mxu1 }
 0x1ce   :  { %v553_v4 = vadd.f32 %v552_v59, %v9337_v26  ;;  %v554_v6 = vpop.f32.mrb[55].mxu0  ;;  %1905 = vmatmul.mubr.bf16.gmra.mrb[112].mxu0 %v946_v42  ;;  %2291 = vmatmul.mubr.bf16.gmra.mrb[112].mxu1 %v946_v42  ;;  %v874_v16 = vmax.f32 %v549_v52, 0.0  ;;  %v732_v42 = vadd.f32 %v731_v35, %v9355_v61  ;;  %v734_v52 = vadd.f32 %v733_v44, %v9358_v1  ;;  %v737_v63 = vpop.f32.mrb[51].mxu1 }
 0x1cf   :  { %v555_v11 = vadd.f32 %v554_v6, %v9340_v27  ;;  %v875_v21 = vmax.f32 %v551_v58, 0.0  ;;  %v736_v59 = vadd.f32 %v735_v53, %v9355_v61  ;;  %v738_v6 = vadd.f32 %v737_v63, %v9358_v1 }
 0x1d0   :  { %v878_v19 = vmax.f32 %v553_v4, 0.0  ;;  %v868_v58 = vmax.f32 %v732_v42, 0.0  ;;  %v869_v4 = vmax.f32 %v734_v52, 0.0 }
 0x1d1   :  { %v879_v0 = vmax.f32 %v555_v11, 0.0  ;;  %v872_v10 = vmax.f32 %v736_v59, 0.0  ;;  %v873_v14 = vmax.f32 %v738_v6, 0.0 }
 0x1d2   :  { %v950_v29 = vpack.c.bf16 %v878_v19, %v874_v16 }
 0x1d3   :  { %v558_v31 = vpop.f32.mrb[56].mxu0  ;;  %v951_v33 = vpack.c.bf16 %v879_v0, %v875_v21  ;;  %v9512_v19 = vpack.c.bf16 %v872_v10, %v868_v58  ;;  %v741_v0 = vpop.f32.mrb[52].mxu1  ;;  %v9514_v28 = vpack.c.bf16 %v873_v14, %v869_v4 }
 0x1d4   :  { %v559_v37 = vadd.f32 %v558_v31, %v9337_v26  ;;  %v560_v39 = vpop.f32.mrb[57].mxu0  ;;  %v743_v35 = vpop.f32.mrb[53].mxu1 }
 0x1d5   :  { %v561_v45 = vadd.f32 %v560_v39, %v9340_v27  ;;  %v562_v47 = vpop.f32.mrb[58].mxu0  ;;  %1914 = vmatprep.mubr.bf16.mxu0 %v951_v33  ;;  %2300 = vmatprep.mubr.bf16.mxu1 %v951_v33  ;;  %v742_v33 = vadd.f32 %v741_v0, %v9355_v61  ;;  %v744_v42 = vadd.f32 %v743_v35, %v9358_v1  ;;  %v745_v44 = vpop.f32.mrb[54].mxu1 }
 0x1d6   :  { %v563_v54 = vadd.f32 %v562_v47, %v9337_v26  ;;  %v564_v55 = vpop.f32.mrb[59].mxu0  ;;  %1915 = vmatmul.mubr.bf16.gmra.mrb[116].mxu0 %v950_v29  ;;  %2301 = vmatmul.mubr.bf16.gmra.mrb[116].mxu1 %v950_v29  ;;  %v882_v7 = vmax.f32 %v559_v37, 0.0  ;;  %v746_v53 = vadd.f32 %v745_v44, %v9355_v61 }
 0x1d7   :  { %v565_v3 = vadd.f32 %v564_v55, %v9340_v27  ;;  %v883_v11 = vmax.f32 %v561_v45, 0.0  ;;  %v876_v52 = vmax.f32 %v742_v33, 0.0  ;;  %v877_v58 = vmax.f32 %v744_v42, 0.0 }
 0x1d8   :  { %v886_v8 = vmax.f32 %v563_v54, 0.0  ;;  %v747_v54 = vpop.f32.mrb[55].mxu1  ;;  %v880_v4 = vmax.f32 %v746_v53, 0.0 }
 0x1d9   :  { %v887_v13 = vmax.f32 %v565_v3, 0.0  ;;  %v748_v59 = vadd.f32 %v747_v54, %v9358_v1 }
 0x1da   :  { %v954_v16 = vpack.c.bf16 %v886_v8, %v882_v7 }
 0x1db   :  { %v568_v20 = vpop.f32.mrb[60].mxu0  ;;  %v955_v21 = vpack.c.bf16 %v887_v13, %v883_v11  ;;  %v881_v8 = vmax.f32 %v748_v59, 0.0  ;;  %v751_v13 = vpop.f32.mrb[56].mxu1 }
 0x1dc   :  { %v569_v29 = vadd.f32 %v568_v20, %v9337_v26  ;;  %v570_v31 = vpop.f32.mrb[61].mxu0  ;;  %v753_v20 = vpop.f32.mrb[57].mxu1 }
 0x1dd   :  { %v571_v37 = vadd.f32 %v570_v31, %v9340_v27  ;;  %v572_v39 = vpop.f32.mrb[62].mxu0  ;;  %1924 = vmatprep.mubr.bf16.mxu0 %v955_v21  ;;  %2310 = vmatprep.mubr.bf16.mxu1 %v955_v21  ;;  %v9526_v14 = vpack.c.bf16 %v881_v8, %v877_v58  ;;  %v755_v21 = vpop.f32.mrb[58].mxu1  ;;  %v8561_v58 = vld [vmem:[#allocation8 + $0x24] ss:$16 sps:$4 sm:$0xff]  }
 0x1de   :  { %v573_v45 = vadd.f32 %v572_v39, %v9337_v26  ;;  %v574_v47 = vpop.f32.mrb[63].mxu0  ;;  %1925 = vmatmul.mubr.bf16.gmra.mrb[120].mxu0 %v954_v16  ;;  %2311 = vmatmul.mubr.bf16.gmra.mrb[120].mxu1 %v954_v16  ;;  %v890_v63 = vmax.f32 %v569_v29, 0.0  ;;  %v9524_v26 = vpack.c.bf16 %v880_v4, %v876_v52  ;;  %v752_v16 = vadd.f32 %v751_v13, %v9355_v61  ;;  %v757_v31 = vpop.f32.mrb[59].mxu1  ;;  %v8556_v52 = vld [vmem:[#allocation8] ss:$16 sps:$4 sm:$0xff]  }
 0x1df   :  { %v575_v55 = vadd.f32 %v574_v47, %v9340_v27  ;;  %v891_v6 = vmax.f32 %v571_v37, 0.0  ;;  %v754_v27 = vadd.f32 %v753_v20, %v9358_v1  ;;  %v756_v29 = vadd.f32 %v755_v21, %v9355_v61  ;;  %v761_v44 = vpop.f32.mrb[60].mxu1  ;;  %v8585_v47 = vld [vmem:[#allocation8 + $0xc] ss:$16 sps:$4 sm:$0xff]   ;;  %v8586_v13 = vld [vmem:[#allocation8 + $0x28] ss:$16 sps:$4 sm:$0xff]  }
 0x1e0   :  { %v894_v3 = vmax.f32 %v573_v45, 0.0  ;;  %v884_v0 = vmax.f32 %v752_v16, 0.0  ;;  %v758_v35 = vadd.f32 %v757_v31, %v9358_v1  ;;  %v762_v53 = vadd.f32 %v761_v44, %v9355_v61  ;;  %v763_v54 = vpop.f32.mrb[61].mxu1  ;;  %3892 = vmatprep.subr.bf16.mxu1 %v8585_v47  ;;  %v8564_v20 = vld [vmem:[#allocation8 + $0x44] ss:$16 sps:$4 sm:$0xff]  }
 0x1e1   :  { %v895_v7 = vmax.f32 %v575_v55, 0.0  ;;  %v885_v33 = vmax.f32 %v754_v27, 0.0  ;;  %v888_v37 = vmax.f32 %v756_v29, 0.0  ;;  %v8583_v55 = vld [vmem:[#allocation8 + $0x8] ss:$16 sps:$4 sm:$0xff]   ;;  %v764_v59 = vadd.f32 %v763_v54, %v9358_v1 }
 0x1e2   :  { %v958_v10 = vpack.c.bf16 %v894_v3, %v890_v63  ;;  %v889_v39 = vmax.f32 %v758_v35, 0.0  ;;  %v8588_v63 = vld [vmem:[#allocation8 + $0x2c] ss:$16 sps:$4 sm:$0xff]   ;;  %v892_v3 = vmax.f32 %v762_v53, 0.0  ;;  %v8562_v21 = vld [vmem:[#allocation8 + $0x40] ss:$16 sps:$4 sm:$0xff]  }
 0x1e3   :  { %v959_v11 = vpack.c.bf16 %v895_v7, %v891_v6  ;;  %v9534_v42 = vpack.c.bf16 %v888_v37, %v884_v0  ;;  %v893_v7 = vmax.f32 %v764_v59, 0.0  ;;  %v8597_v0 = vld [vmem:[#allocation8 + $0x6c] ss:$16 sps:$4 sm:$0xff]   ;;  %v8565_v29 = vld [vmem:[#allocation8 + $0x60] ss:$16 sps:$4 sm:$0xff]  }
 0x1e4   :  { %v9536_v45 = vpack.c.bf16 %v889_v39, %v885_v33  ;;  %v8595_v31 = vld [vmem:[#allocation8 + $0x68] ss:$16 sps:$4 sm:$0xff]   ;;  %v8570_v33 = vld [vmem:[#allocation8 + $0x84] ss:$16 sps:$4 sm:$0xff]   ;;  %v8603_v35 = vld [vmem:[#allocation8 + $0x8c] ss:$16 sps:$4 sm:$0xff]  }
 0x1e5   :  { %1934 = vmatprep.mubr.bf16.mxu0 %v959_v11  ;;  %2320 = vmatprep.mubr.bf16.mxu1 %v959_v11  ;;  %v8568_v37 = vld [vmem:[#allocation8 + $0x80] ss:$16 sps:$4 sm:$0xff]   ;;  %v8601_v39 = vld [vmem:[#allocation8 + $0x88] ss:$16 sps:$4 sm:$0xff]   ;;  %v8573_v44 = vld [vmem:[#allocation8 + $0xa4] ss:$16 sps:$4 sm:$0xff]  }
 0x1e6   :  { %1935 = vmatmul.mubr.bf16.gmra.mrb[124].mxu0 %v958_v10  ;;  %2321 = vmatmul.mubr.bf16.gmra.mrb[124].mxu1 %v958_v10  ;;  %v8559_v10 = vld [vmem:[#allocation8 + $0x20] ss:$16 sps:$4 sm:$0xff]   ;;  %v8604_v47 = vld [vmem:[#allocation8 + $0xa8] ss:$16 sps:$4 sm:$0xff]   ;;  %v8612_v53 = vld [vmem:[#allocation8 + $0xcc] ss:$16 sps:$4 sm:$0xff]  }
 0x1e7   :  { %1977 = vmatprep.mubr.bf16.mxu0 %v9370_v46  ;;  %2363 = vmatprep.mubr.bf16.mxu1 %v9370_v46  ;;  %v765_v46 = vpop.f32.mrb[62].mxu1  ;;  %v8574_v54 = vld [vmem:[#allocation8 + $0xc0] ss:$16 sps:$4 sm:$0xff]   ;;  %v8613_v59 = vld [vmem:[#allocation8 + $0xe8] ss:$16 sps:$4 sm:$0xff]  }
 0x1e8   :  { %v766_v4 = vadd.f32 %v765_v46, %v9355_v61  ;;  %v767_v6 = vpop.f32.mrb[63].mxu1  ;;  %v8582_v46 = vld [vmem:[#allocation8 + $0x104] ss:$16 sps:$4 sm:$0xff]  }
 0x1e9   :  { %v768_v8 = vadd.f32 %v767_v6, %v9358_v1  ;;  %v8567_v1 = vld [vmem:[#allocation8 + $0x64] ss:$16 sps:$4 sm:$0xff]  }
 0x1ea   :  { %v896_v11 = vmax.f32 %v766_v4, 0.0  ;;  %v8619_v4 = vld [vmem:[#allocation8 + $0x108] ss:$16 sps:$4 sm:$0xff]   ;;  %v8591_v6 = vld [vmem:[#allocation8 + $0x124] ss:$16 sps:$4 sm:$0xff]  }
 0x1eb   :  { %v897_v16 = vmax.f32 %v768_v8, 0.0  ;;  %v8600_v8 = vld [vmem:[#allocation8 + $0x144] ss:$16 sps:$4 sm:$0xff]  }
 0x1ec   :  { %v9546_v27 = vpack.c.bf16 %v896_v11, %v892_v3  ;;  %v8580_v3 = vld [vmem:[#allocation8 + $0x100] ss:$16 sps:$4 sm:$0xff]  }
 0x1ed   :  { %v9548_v61 = vpack.c.bf16 %v897_v16, %v893_v7  ;;  %v8622_v7 = vld [vmem:[#allocation8 + $0x128] ss:$16 sps:$4 sm:$0xff]   ;;  %v8598_v11 = vld [vmem:[#allocation8 + $0x140] ss:$16 sps:$4 sm:$0xff]   ;;  %v8609_v16 = vld [vmem:[#allocation8 + $0x164] ss:$16 sps:$4 sm:$0xff]  }
 0x1ee   :  { %1978 = vmatmul.mubr.bf16.vlgmr.msra.gmra.mrb[64].mxu0 %v9368_v40  ;;  %2364 = vmatmul.mubr.bf16.vlgmr.msra.gmra.mrb[64].mxu1 %v9368_v40  ;;  %v8594_v40 = vld [vmem:[#allocation8 + $0x4c] ss:$16 sps:$4 sm:$0xff]  }
 0x1ef   :  { %1987 = vmatprep.mubr.bf16.mxu0 %v9382_v24  ;;  %2373 = vmatprep.mubr.bf16.mxu1 %v9382_v24  ;;  %v8592_v24 = vld [vmem:[#allocation8 + $0x48] ss:$16 sps:$4 sm:$0xff]  }
 0x1f0   :  { %3507 = vmatpush1.bf16.msra.mxu0 %v8556_v52  ;;  %3893 = vmatpush1.bf16.msra.mxu1 %v8583_v55  ;;  %v8576_v52 = vld [vmem:[#allocation8 + $0xc4] ss:$16 sps:$4 sm:$0xff]   ;;  %v8610_v55 = vld [vmem:[#allocation8 + $0xc8] ss:$16 sps:$4 sm:$0xff]  }
 0x1f1   :  { %3508 = vmatprep.subr.bf16.mxu0 %v8561_v58  ;;  %3894 = vmatprep.subr.bf16.mxu1 %v8588_v63  ;;  %v8579_v58 = vld [vmem:[#allocation8 + $0xe4] ss:$16 sps:$4 sm:$0xff]   ;;  %v8621_v63 = vld [vmem:[#allocation8 + $0x10c] ss:$16 sps:$4 sm:$0xff]  }
 0x1f4   :  { %3509 = vmatpush1.bf16.msra.mxu0 %v8559_v10  ;;  %3895 = vmatpush1.bf16.msra.mxu1 %v8586_v13  ;;  %v8630_v10 = vld [vmem:[#allocation8 + $0x14c] ss:$16 sps:$4 sm:$0xff]   ;;  %v8628_v13 = vld [vmem:[#allocation8 + $0x148] ss:$16 sps:$4 sm:$0xff]  }
 0x1f5   :  { %3510 = vmatprep.subr.bf16.mxu0 %v8564_v20  ;;  %3896 = vmatprep.subr.bf16.mxu1 %v8594_v40  ;;  %v8631_v20 = vld [vmem:[#allocation8 + $0x168] ss:$16 sps:$4 sm:$0xff]   ;;  %v8618_v40 = vld [vmem:[#allocation8 + $0x184] ss:$16 sps:$4 sm:$0xff]  }
 0x1f6   :  { %1988 = vmatmul.mubr.bf16.gmra.mrb[68].mxu0 %v9380_v17  ;;  %2374 = vmatmul.mubr.bf16.gmra.mrb[68].mxu1 %v9380_v17  ;;  %v8606_v17 = vld [vmem:[#allocation8 + $0xac] ss:$16 sps:$4 sm:$0xff]  }
 0x1f7   :  { %1997 = vmatprep.mubr.bf16.mxu0 %v9394_v5  ;;  %2383 = vmatprep.mubr.bf16.mxu1 %v9394_v5  ;;  %v8571_v5 = vld [vmem:[#allocation8 + $0xa0] ss:$16 sps:$4 sm:$0xff]  }
 0x1f8   :  { %3511 = vmatpush1.bf16.msra.mxu0 %v8562_v21  ;;  %3897 = vmatpush1.bf16.msra.mxu1 %v8592_v24  ;;  %v8639_v21 = vld [vmem:[#allocation8 + $0x18c] ss:$16 sps:$4 sm:$0xff]   ;;  %v8616_v24 = vld [vmem:[#allocation8 + $0x180] ss:$16 sps:$4 sm:$0xff]  }
 0x1f9   :  { %3512 = vmatprep.subr.bf16.mxu0 %v8567_v1  ;;  %3898 = vmatprep.subr.bf16.mxu1 %v8597_v0  ;;  %v8637_v1 = vld [vmem:[#allocation8 + $0x188] ss:$16 sps:$4 sm:$0xff]   ;;  %v8627_v0 = vld [vmem:[#allocation8 + $0x1a4] ss:$16 sps:$4 sm:$0xff]  }
 0x1fc   :  { %3513 = vmatpush1.bf16.msra.mxu0 %v8565_v29  ;;  %3899 = vmatpush1.bf16.msra.mxu1 %v8595_v31  ;;  %v8640_v29 = vld [vmem:[#allocation8 + $0x1a8] ss:$16 sps:$4 sm:$0xff]   ;;  %v8636_v31 = vld [vmem:[#allocation8 + $0x1c4] ss:$16 sps:$4 sm:$0xff]  }
 0x1fd   :  { %3514 = vmatprep.subr.bf16.mxu0 %v8570_v33  ;;  %3900 = vmatprep.subr.bf16.mxu1 %v8603_v35  ;;  %v8634_v33 = vld [vmem:[#allocation8 + $0x1c0] ss:$16 sps:$4 sm:$0xff]  }
 0x1fe   :  { %1998 = vmatmul.mubr.bf16.gmra.mrb[72].mxu0 %v9392_v60  ;;  %2384 = vmatmul.mubr.bf16.gmra.mrb[72].mxu1 %v9392_v60  ;;  %v8615_v60 = vld [vmem:[#allocation8 + $0xec] ss:$16 sps:$4 sm:$0xff]  }
 0x1ff   :  { %2007 = vmatprep.mubr.bf16.mxu0 %v9406_v49  ;;  %2393 = vmatprep.mubr.bf16.mxu1 %v9406_v49  ;;  %v8577_v49 = vld [vmem:[#allocation8 + $0xe0] ss:$16 sps:$4 sm:$0xff]  }
 0x200   :  { %3515 = vmatpush1.bf16.msra.mxu0 %v8568_v37  ;;  %3901 = vmatpush1.bf16.msra.mxu1 %v8601_v39 }
 0x201   :  { %3516 = vmatprep.subr.bf16.mxu0 %v8573_v44  ;;  %3902 = vmatprep.subr.bf16.mxu1 %v8606_v17 }
 0x204   :  { %3517 = vmatpush1.bf16.msra.mxu0 %v8571_v5  ;;  %3903 = vmatpush1.bf16.msra.mxu1 %v8604_v47 }
 0x205   :  { %3518 = vmatprep.subr.bf16.mxu0 %v8576_v52  ;;  %3904 = vmatprep.subr.bf16.mxu1 %v8612_v53 }
 0x206   :  { %2008 = vmatmul.mubr.bf16.gmra.mrb[76].mxu0 %v9404_v41  ;;  %2394 = vmatmul.mubr.bf16.gmra.mrb[76].mxu1 %v9404_v41  ;;  %v8624_v41 = vld [vmem:[#allocation8 + $0x12c] ss:$16 sps:$4 sm:$0xff]  }
 0x207   :  { %2017 = vmatprep.mubr.bf16.mxu0 %v9418_v32  ;;  %2403 = vmatprep.mubr.bf16.mxu1 %v9418_v32  ;;  %v8589_v32 = vld [vmem:[#allocation8 + $0x120] ss:$16 sps:$4 sm:$0xff]  }
 0x208   :  { %3519 = vmatpush1.bf16.msra.mxu0 %v8574_v54  ;;  %3905 = vmatpush1.bf16.msra.mxu1 %v8610_v55 }
 0x209   :  { %3520 = vmatprep.subr.bf16.mxu0 %v8579_v58  ;;  %3906 = vmatprep.subr.bf16.mxu1 %v8615_v60 }
 0x20c   :  { %3521 = vmatpush1.bf16.msra.mxu0 %v8577_v49  ;;  %3907 = vmatpush1.bf16.msra.mxu1 %v8613_v59 }
 0x20d   :  { %3522 = vmatprep.subr.bf16.mxu0 %v8582_v46  ;;  %3908 = vmatprep.subr.bf16.mxu1 %v8621_v63 }
 0x20e   :  { %2018 = vmatmul.mubr.bf16.gmra.mrb[80].mxu0 %v9416_v22  ;;  %2404 = vmatmul.mubr.bf16.gmra.mrb[80].mxu1 %v9416_v22  ;;  %v8633_v22 = vld [vmem:[#allocation8 + $0x16c] ss:$16 sps:$4 sm:$0xff]  }
 0x20f   :  { %2027 = vmatprep.mubr.bf16.mxu0 %v9430_v15  ;;  %2413 = vmatprep.mubr.bf16.mxu1 %v9430_v15  ;;  %v8607_v15 = vld [vmem:[#allocation8 + $0x160] ss:$16 sps:$4 sm:$0xff]  }
 0x210   :  { %3523 = vmatpush1.bf16.msra.mxu0 %v8580_v3  ;;  %3909 = vmatpush1.bf16.msra.mxu1 %v8619_v4 }
 0x211   :  { %3524 = vmatprep.subr.bf16.mxu0 %v8591_v6  ;;  %3910 = vmatprep.subr.bf16.mxu1 %v8624_v41 }
 0x214   :  { %3525 = vmatpush1.bf16.msra.mxu0 %v8589_v32  ;;  %3911 = vmatpush1.bf16.msra.mxu1 %v8622_v7 }
 0x215   :  { %3526 = vmatprep.subr.bf16.mxu0 %v8600_v8  ;;  %3912 = vmatprep.subr.bf16.mxu1 %v8630_v10  ;;  %v8652_v10 = vld [vmem:[#allocation8 + $0x200] ss:$16 sps:$4 sm:$0xff]  }
 0x216   :  { %2028 = vmatmul.mubr.bf16.gmra.mrb[84].mxu0 %v9428_v9  ;;  %2414 = vmatmul.mubr.bf16.gmra.mrb[84].mxu1 %v9428_v9  ;;  %v8642_v9 = vld [vmem:[#allocation8 + $0x1ac] ss:$16 sps:$4 sm:$0xff]  }
 0x217   :  { %2037 = vmatprep.mubr.bf16.mxu0 %v9442_v62  ;;  %2423 = vmatprep.mubr.bf16.mxu1 %v9442_v62  ;;  %v8625_v62 = vld [vmem:[#allocation8 + $0x1a0] ss:$16 sps:$4 sm:$0xff]  }
 0x218   :  { %3527 = vmatpush1.bf16.msra.mxu0 %v8598_v11  ;;  %3913 = vmatpush1.bf16.msra.mxu1 %v8628_v13  ;;  %v8679_v11 = vld [vmem:[#allocation8 + $0x208] ss:$16 sps:$4 sm:$0xff]  }
 0x219   :  { %3528 = vmatprep.subr.bf16.mxu0 %v8609_v16  ;;  %3914 = vmatprep.subr.bf16.mxu1 %v8633_v22 }
 0x21c   :  { %3529 = vmatpush1.bf16.msra.mxu0 %v8607_v15  ;;  %3915 = vmatpush1.bf16.msra.mxu1 %v8631_v20  ;;  %v8657_v20 = vld [vmem:[#allocation8 + $0x224] ss:$16 sps:$4 sm:$0xff]  }
 0x21d   :  { %3530 = vmatprep.subr.bf16.mxu0 %v8618_v40  ;;  %3916 = vmatprep.subr.bf16.mxu1 %v8639_v21  ;;  %v8684_v40 = vld [vmem:[#allocation8 + $0x22c] ss:$16 sps:$4 sm:$0xff]  }
 0x21e   :  { %2038 = vmatmul.mubr.bf16.gmra.mrb[88].mxu0 %v9440_v56  ;;  %2424 = vmatmul.mubr.bf16.gmra.mrb[88].mxu1 %v9440_v56  ;;  %v8648_v56 = vld [vmem:[#allocation8 + $0x1cc] ss:$16 sps:$4 sm:$0xff]  }
 0x21f   :  { %2047 = vmatprep.mubr.bf16.mxu0 %v9454_v38  ;;  %2433 = vmatprep.mubr.bf16.mxu1 %v9454_v38  ;;  %v8645_v38 = vld [vmem:[#allocation8 + $0x1e4] ss:$16 sps:$4 sm:$0xff]  }
 0x220   :  { %3531 = vmatpush1.bf16.msra.mxu0 %v8616_v24  ;;  %3917 = vmatpush1.bf16.msra.mxu1 %v8637_v1 }
 0x221   :  { %3532 = vmatprep.subr.bf16.mxu0 %v8627_v0  ;;  %3918 = vmatprep.subr.bf16.mxu1 %v8642_v9 }
 0x224   :  { %3533 = vmatpush1.bf16.msra.mxu0 %v8625_v62  ;;  %3919 = vmatpush1.bf16.msra.mxu1 %v8640_v29 }
 0x225   :  { %3534 = vmatprep.subr.bf16.mxu0 %v8636_v31  ;;  %3920 = vmatprep.subr.bf16.mxu1 %v8648_v56 }
 0x226   :  { %2048 = vmatmul.mubr.bf16.gmra.mrb[92].mxu0 %v9452_v34  ;;  %2434 = vmatmul.mubr.bf16.gmra.mrb[92].mxu1 %v9452_v34  ;;  %v8646_v34 = vld [vmem:[#allocation8 + $0x1c8] ss:$16 sps:$4 sm:$0xff]  }
 0x227   :  { %2057 = vmatprep.mubr.bf16.mxu0 %v9466_v18  ;;  %2443 = vmatprep.mubr.bf16.mxu1 %v9466_v18  ;;  %v8643_v18 = vld [vmem:[#allocation8 + $0x1e0] ss:$16 sps:$4 sm:$0xff]  }
 0x228   :  { %3535 = vmatpush1.bf16.msra.mxu0 %v8634_v33  ;;  %3921 = vmatpush1.bf16.msra.mxu1 %v8646_v34  ;;  %v8655_v34 = vld [vmem:[#allocation8 + $0x220] ss:$16 sps:$4 sm:$0xff]  }
 0x229   :  { %3536 = vmatprep.subr.bf16.mxu0 %v8645_v38  ;;  %v8660_v38 = vld [vmem:[#allocation8 + $0x244] ss:$16 sps:$4 sm:$0xff]  }
 0x22c   :  { %3537 = vmatpush1.bf16.msra.mxu0 %v8643_v18 }
 0x22e   :  { %2058 = vmatmul.mubr.bf16.gmra.mrb[96].mxu0 %v9464_v12  ;;  %2444 = vmatmul.mubr.bf16.gmra.mrb[96].mxu1 %v9464_v12  ;;  %v8651_v12 = vld [vmem:[#allocation8 + $0x1ec] ss:$16 sps:$4 sm:$0xff]  }
 0x22f   :  { %2067 = vmatprep.mubr.bf16.mxu0 %v9478_v2  ;;  %2453 = vmatprep.mubr.bf16.mxu1 %v9478_v2  ;;  %v8654_v2 = vld [vmem:[#allocation8 + $0x204] ss:$16 sps:$4 sm:$0xff]  }
 0x230   :  { %3922 = vmatprep.subr.bf16.mxu1 %v8651_v12  ;;  %3699 = vmatprep.subr.bf16.mxu0 %v8654_v2  ;;  %v8682_v12 = vld [vmem:[#allocation8 + $0x228] ss:$16 sps:$4 sm:$0xff]  }
 0x236   :  { %2068 = vmatmul.mubr.bf16.gmra.mrb[100].mxu0 %v9476_v57  ;;  %2454 = vmatmul.mubr.bf16.gmra.mrb[100].mxu1 %v9476_v57  ;;  %v8649_v57 = vld [vmem:[#allocation8 + $0x1e8] ss:$16 sps:$4 sm:$0xff]  }
 0x237   :  { %2077 = vmatprep.mubr.bf16.mxu0 %v9490_v50  ;;  %2463 = vmatprep.mubr.bf16.mxu1 %v9490_v50  ;;  %v1090_v50 = vld [vmem:[%s10349_s4] sm:$0xf] }
 0x238   :  { %3923 = vmatpush1.bf16.msra.mxu1 %v8649_v57 }
 0x23e   :  { %2078 = vmatmul.mubr.bf16.gmra.mrb[104].mxu0 %v9488_v43  ;;  %2464 = vmatmul.mubr.bf16.gmra.mrb[104].mxu1 %v9488_v43  ;;  %v8681_v43 = vld [vmem:[#allocation8 + $0x20c] ss:$16 sps:$4 sm:$0xff]  }
 0x23f   :  { %2087 = vmatprep.mubr.bf16.mxu0 %v9502_v36  ;;  %2473 = vmatprep.mubr.bf16.mxu1 %v9502_v36  ;;  %v9615_v36 = vrot.slane %v1090_v50, %v9347_v48 }
 0x240   :  { %4085 = vmatprep.subr.bf16.mxu1 %v8681_v43 }
 0x246   :  { %2088 = vmatmul.mubr.bf16.gmra.mrb[108].mxu0 %v9500_v30  ;;  %2474 = vmatmul.mubr.bf16.gmra.mrb[108].mxu1 %v9500_v30  ;;  %v9612_v30 = vrot.slane %v1090_v50, %v9329_v23 }
 0x247   :  { %2097 = vmatprep.mubr.bf16.mxu0 %v9514_v28  ;;  %2483 = vmatprep.mubr.bf16.mxu1 %v9514_v28  ;;  %v9621_v28 = vrot.slane %v1090_v50, %v9350_v51 }
 0x24e   :  { %2098 = vmatmul.mubr.bf16.gmra.mrb[112].mxu0 %v9512_v19  ;;  %2484 = vmatmul.mubr.bf16.gmra.mrb[112].mxu1 %v9512_v19  ;;  %v9618_v19 = vrot.slane %v1090_v50, %v9334_v25  ;;  %v8690_v50 = vld [vmem:[#allocation8 + $0x24c] ss:$16 sps:$4 sm:$0xff]  }
 0x24f   :  { %2107 = vmatprep.mubr.bf16.mxu0 %v9526_v14  ;;  %2493 = vmatprep.mubr.bf16.mxu1 %v9526_v14 }
 0x256   :  { %2108 = vmatmul.mubr.bf16.gmra.mrb[116].mxu0 %v9524_v26  ;;  %2494 = vmatmul.mubr.bf16.gmra.mrb[116].mxu1 %v9524_v26 }
 0x257   :  { %2117 = vmatprep.mubr.bf16.mxu0 %v9536_v45  ;;  %2503 = vmatprep.mubr.bf16.mxu1 %v9536_v45 }
 0x25e   :  { %2118 = vmatmul.mubr.bf16.gmra.mrb[120].mxu0 %v9534_v42  ;;  %2504 = vmatmul.mubr.bf16.gmra.mrb[120].mxu1 %v9534_v42 }
 0x25f   :  { %2127 = vmatprep.mubr.bf16.mxu0 %v9548_v61  ;;  %2513 = vmatprep.mubr.bf16.mxu1 %v9548_v61 }
 0x266   :  { %2128 = vmatmul.mubr.bf16.gmra.mrb[124].mxu0 %v9546_v27  ;;  %2514 = vmatmul.mubr.bf16.gmra.mrb[124].mxu1 %v9546_v27 }
 0x2c1   :  { %v1979_v26 = vpop.f32.mrb[64].mxu0  ;;  %v2365_v14 = vpop.f32.mrb[64].mxu1 }
 0x2c2   :  { %v7534_v42 = vadd.f32 %v1979_v26, %v9612_v30  ;;  %v7598_v45 = vadd.f32 %v2365_v14, %v9615_v36  ;;  %v1981_v27 = vpop.f32.mrb[65].mxu0  ;;  %v2367_v61 = vpop.f32.mrb[65].mxu1 }
 0x2c3   :  { %v7535_v35 = vadd.f32 %v1981_v27, %v9618_v19  ;;  %v7599_v37 = vadd.f32 %v2367_v61, %v9621_v28  ;;  %v1983_v39 = vpop.f32.mrb[66].mxu0  ;;  %v2369_v44 = vpop.f32.mrb[66].mxu1 }
 0x2c4   :  { %v7536_v17 = vadd.f32 %v1983_v39, %v9612_v30  ;;  %v7600_v5 = vadd.f32 %v2369_v44, %v9615_v36  ;;  %v1985_v47 = vpop.f32.mrb[67].mxu0  ;;  %v2371_v52 = vpop.f32.mrb[67].mxu1  ;;  %v2524_v55 = vmax.f32 %v7534_v42, 0.0  ;;  %v2526_v58 = vmax.f32 %v7598_v45, 0.0 }
 0x2c5   :  { %v7537_v53 = vadd.f32 %v1985_v47, %v9618_v19  ;;  %v7601_v54 = vadd.f32 %v2371_v52, %v9621_v28  ;;  %v2525_v59 = vmax.f32 %v7535_v35, 0.0  ;;  %v2527_v46 = vmax.f32 %v7599_v37, 0.0 }
 0x2c6   :  { %v2528_v60 = vmax.f32 %v7536_v17, 0.0  ;;  %v2530_v49 = vmax.f32 %v7600_v5, 0.0  ;;  %v8658_v17 = vld [vmem:[#allocation8 + $0x240] ss:$16 sps:$4 sm:$0xff]   ;;  %v8688_v5 = vld [vmem:[#allocation8 + $0x248] ss:$16 sps:$4 sm:$0xff]  }
 0x2c7   :  { %v2529_v63 = vmax.f32 %v7537_v53, 0.0  ;;  %v2531_v3 = vmax.f32 %v7601_v54, 0.0 }
 0x2c8   :  { %v2652_v4 = vpack.c.bf16 %v2528_v60, %v2524_v55  ;;  %v9631_v6 = vpack.c.bf16 %v2530_v49, %v2526_v58  ;;  %v8663_v55 = vld [vmem:[#allocation8 + $0x264] ss:$16 sps:$4 sm:$0xff]   ;;  %v8693_v58 = vld [vmem:[#allocation8 + $0x26c] ss:$16 sps:$4 sm:$0xff]  }
 0x2c9   :  { %v2653_v41 = vpack.c.bf16 %v2529_v63, %v2525_v59  ;;  %v9633_v32 = vpack.c.bf16 %v2531_v3, %v2527_v46  ;;  %v1989_v7 = vpop.f32.mrb[68].mxu0  ;;  %v2375_v8 = vpop.f32.mrb[68].mxu1 }
 0x2ca   :  { %v7538_v13 = vadd.f32 %v1989_v7, %v9612_v30  ;;  %v7602_v16 = vadd.f32 %v2375_v8, %v9615_v36  ;;  %v1991_v22 = vpop.f32.mrb[69].mxu0  ;;  %v2377_v15 = vpop.f32.mrb[69].mxu1 }
 0x2cb   :  { %v7539_v21 = vadd.f32 %v1991_v22, %v9618_v19  ;;  %v7603_v24 = vadd.f32 %v2377_v15, %v9621_v28  ;;  %v1993_v1 = vpop.f32.mrb[70].mxu0  ;;  %v2379_v0 = vpop.f32.mrb[70].mxu1  ;;  %3538 = vmatprep.mubr.bf16.mxu0 %v2653_v41  ;;  %3924 = vmatprep.mubr.bf16.mxu1 %v2653_v41 }
 0x2cc   :  { %v7540_v9 = vadd.f32 %v1993_v1, %v9612_v30  ;;  %v7604_v62 = vadd.f32 %v2379_v0, %v9615_v36  ;;  %v1995_v29 = vpop.f32.mrb[71].mxu0  ;;  %v2381_v31 = vpop.f32.mrb[71].mxu1  ;;  %3539 = vmatmul.mubr.bf16.vlgmr.msra.gmra.mrb[128].mxu0 %v2652_v4  ;;  %3925 = vmatmul.mubr.bf16.vlgmr.msra.gmra.mrb[128].mxu1 %v2652_v4  ;;  %v2532_v18 = vmax.f32 %v7538_v13, 0.0  ;;  %v2534_v57 = vmax.f32 %v7602_v16, 0.0  ;;  %v8691_v13 = vld [vmem:[#allocation8 + $0x268] ss:$16 sps:$4 sm:$0xff]  }
 0x2cd   :  { %v7541_v33 = vadd.f32 %v1995_v29, %v9618_v19  ;;  %v7605_v56 = vadd.f32 %v2381_v31, %v9621_v28  ;;  %3700 = vmatpush1.bf16.msra.mxu0 %v8652_v10  ;;  %4086 = vmatpush1.bf16.msra.mxu1 %v8679_v11  ;;  %v2533_v26 = vmax.f32 %v7539_v21, 0.0  ;;  %v2535_v14 = vmax.f32 %v7603_v24, 0.0  ;;  %v8661_v10 = vld [vmem:[#allocation8 + $0x260] ss:$16 sps:$4 sm:$0xff]   ;;  %v8666_v11 = vld [vmem:[#allocation8 + $0x284] ss:$16 sps:$4 sm:$0xff]  }
 0x2ce   :  { %v2536_v2 = vmax.f32 %v7540_v9, 0.0  ;;  %v2538_v43 = vmax.f32 %v7604_v62, 0.0  ;;  %3701 = vmatprep.subr.bf16.mxu0 %v8657_v20  ;;  %4087 = vmatprep.subr.bf16.mxu1 %v8684_v40  ;;  %v8699_v40 = vld [vmem:[#allocation8 + $0x28c] ss:$16 sps:$4 sm:$0xff]  }
 0x2cf   :  { %v2537_v42 = vmax.f32 %v7541_v33, 0.0  ;;  %v2539_v45 = vmax.f32 %v7605_v56, 0.0 }
 0x2d0   :  { %v2656_v27 = vpack.c.bf16 %v2536_v2, %v2532_v18  ;;  %v9643_v61 = vpack.c.bf16 %v2538_v43, %v2534_v57  ;;  %v8669_v43 = vld [vmem:[#allocation8 + $0x2a4] ss:$16 sps:$4 sm:$0xff]  }
 0x2d1   :  { %v2657_v35 = vpack.c.bf16 %v2537_v42, %v2533_v26  ;;  %v9645_v37 = vpack.c.bf16 %v2539_v45, %v2535_v14  ;;  %v1999_v39 = vpop.f32.mrb[72].mxu0  ;;  %v2385_v44 = vpop.f32.mrb[72].mxu1  ;;  %3702 = vmatpush1.bf16.msra.mxu0 %v8655_v34  ;;  %4088 = vmatpush1.bf16.msra.mxu1 %v8682_v12  ;;  %v8664_v34 = vld [vmem:[#allocation8 + $0x280] ss:$16 sps:$4 sm:$0xff]  }
 0x2d2   :  { %v7542_v47 = vadd.f32 %v1999_v39, %v9612_v30  ;;  %v7606_v52 = vadd.f32 %v2385_v44, %v9615_v36  ;;  %v2001_v53 = vpop.f32.mrb[73].mxu0  ;;  %v2387_v54 = vpop.f32.mrb[73].mxu1  ;;  %3703 = vmatprep.subr.bf16.mxu0 %v8660_v38  ;;  %4089 = vmatprep.subr.bf16.mxu1 %v8690_v50  ;;  %v8697_v38 = vld [vmem:[#allocation8 + $0x288] ss:$16 sps:$4 sm:$0xff]   ;;  %v8702_v50 = vld [vmem:[#allocation8 + $0x2ac] ss:$16 sps:$4 sm:$0xff]  }
 0x2d3   :  { %v7543_v60 = vadd.f32 %v2001_v53, %v9618_v19  ;;  %v7607_v49 = vadd.f32 %v2387_v54, %v9621_v28  ;;  %v2003_v59 = vpop.f32.mrb[74].mxu0  ;;  %v2389_v46 = vpop.f32.mrb[74].mxu1  ;;  %3548 = vmatprep.mubr.bf16.mxu0 %v2657_v35  ;;  %3934 = vmatprep.mubr.bf16.mxu1 %v2657_v35  ;;  %v8700_v53 = vld [vmem:[#allocation8 + $0x2a8] ss:$16 sps:$4 sm:$0xff]  }
 0x2d4   :  { %v7544_v63 = vadd.f32 %v2003_v59, %v9612_v30  ;;  %v7608_v3 = vadd.f32 %v2389_v46, %v9615_v36  ;;  %v2005_v4 = vpop.f32.mrb[75].mxu0  ;;  %v2391_v41 = vpop.f32.mrb[75].mxu1  ;;  %3549 = vmatmul.mubr.bf16.gmra.mrb[132].mxu0 %v2656_v27  ;;  %3935 = vmatmul.mubr.bf16.gmra.mrb[132].mxu1 %v2656_v27  ;;  %v2540_v16 = vmax.f32 %v7542_v47, 0.0  ;;  %v2542_v22 = vmax.f32 %v7606_v52, 0.0  ;;  %v8667_v47 = vld [vmem:[#allocation8 + $0x2a0] ss:$16 sps:$4 sm:$0xff]  }
 0x2d5   :  { %v7545_v7 = vadd.f32 %v2005_v4, %v9618_v19  ;;  %v7609_v8 = vadd.f32 %v2391_v41, %v9621_v28  ;;  %3704 = vmatpush1.bf16.msra.mxu0 %v8658_v17  ;;  %4090 = vmatpush1.bf16.msra.mxu1 %v8688_v5  ;;  %v2541_v21 = vmax.f32 %v7543_v60, 0.0  ;;  %v2543_v24 = vmax.f32 %v7607_v49, 0.0  ;;  %v8672_v52 = vld [vmem:[#allocation8 + $0x2c4] ss:$16 sps:$4 sm:$0xff]   ;;  %v8708_v49 = vld [vmem:[#allocation8 + $0x2cc] ss:$16 sps:$4 sm:$0xff]  }
 0x2d6   :  { %v2544_v15 = vmax.f32 %v7544_v63, 0.0  ;;  %v2546_v20 = vmax.f32 %v7608_v3, 0.0  ;;  %3705 = vmatprep.subr.bf16.mxu0 %v8663_v55  ;;  %4091 = vmatprep.subr.bf16.mxu1 %v8693_v58 }
 0x2d7   :  { %v2545_v1 = vmax.f32 %v7545_v7, 0.0  ;;  %v2547_v0 = vmax.f32 %v7609_v8, 0.0 }
 0x2d8   :  { %v2660_v9 = vpack.c.bf16 %v2544_v15, %v2540_v16  ;;  %v9655_v62 = vpack.c.bf16 %v2546_v20, %v2542_v22  ;;  %v8706_v16 = vld [vmem:[#allocation8 + $0x2c8] ss:$16 sps:$4 sm:$0xff]  }
 0x2d9   :  { %v2661_v29 = vpack.c.bf16 %v2545_v1, %v2541_v21  ;;  %v9657_v31 = vpack.c.bf16 %v2547_v0, %v2543_v24  ;;  %v2009_v33 = vpop.f32.mrb[76].mxu0  ;;  %v2395_v56 = vpop.f32.mrb[76].mxu1  ;;  %3706 = vmatpush1.bf16.msra.mxu0 %v8661_v10  ;;  %4092 = vmatpush1.bf16.msra.mxu1 %v8691_v13  ;;  %v8670_v13 = vld [vmem:[#allocation8 + $0x2c0] ss:$16 sps:$4 sm:$0xff]   ;;  %v8675_v21 = vld [vmem:[#allocation8 + $0x2e4] ss:$16 sps:$4 sm:$0xff]  }
 0x2da   :  { %v7546_v12 = vadd.f32 %v2009_v33, %v9612_v30  ;;  %v7610_v18 = vadd.f32 %v2395_v56, %v9615_v36  ;;  %v2011_v57 = vpop.f32.mrb[77].mxu0  ;;  %v2397_v2 = vpop.f32.mrb[77].mxu1  ;;  %3707 = vmatprep.subr.bf16.mxu0 %v8666_v11  ;;  %4093 = vmatprep.subr.bf16.mxu1 %v8699_v40  ;;  %v8711_v24 = vld [vmem:[#allocation8 + $0x2ec] ss:$16 sps:$4 sm:$0xff]  }
 0x2db   :  { %v7547_v26 = vadd.f32 %v2011_v57, %v9618_v19  ;;  %v7611_v14 = vadd.f32 %v2397_v2, %v9621_v28  ;;  %v2013_v42 = vpop.f32.mrb[78].mxu0  ;;  %v2399_v45 = vpop.f32.mrb[78].mxu1  ;;  %3558 = vmatprep.mubr.bf16.mxu0 %v2661_v29  ;;  %3944 = vmatprep.mubr.bf16.mxu1 %v2661_v29  ;;  %v8673_v57 = vld [vmem:[#allocation8 + $0x2e0] ss:$16 sps:$4 sm:$0xff]   ;;  %v8678_v2 = vld [vmem:[#allocation8 + $0x304] ss:$16 sps:$4 sm:$0xff]  }
 0x2dc   :  { %v7548_v27 = vadd.f32 %v2013_v42, %v9612_v30  ;;  %v7612_v35 = vadd.f32 %v2399_v45, %v9615_v36  ;;  %v2015_v39 = vpop.f32.mrb[79].mxu0  ;;  %v2401_v44 = vpop.f32.mrb[79].mxu1  ;;  %3559 = vmatmul.mubr.bf16.gmra.mrb[136].mxu0 %v2660_v9  ;;  %3945 = vmatmul.mubr.bf16.gmra.mrb[136].mxu1 %v2660_v9  ;;  %v2548_v54 = vmax.f32 %v7546_v12, 0.0  ;;  %v2550_v55 = vmax.f32 %v7610_v18, 0.0  ;;  %v8717_v45 = vld [vmem:[#allocation8 + $0x30c] ss:$16 sps:$4 sm:$0xff]  }
 0x2dd   :  { %v7549_v17 = vadd.f32 %v2015_v39, %v9618_v19  ;;  %v7613_v5 = vadd.f32 %v2401_v44, %v9621_v28  ;;  %3708 = vmatpush1.bf16.msra.mxu0 %v8664_v34  ;;  %4094 = vmatpush1.bf16.msra.mxu1 %v8697_v38  ;;  %v2549_v59 = vmax.f32 %v7547_v26, 0.0  ;;  %v2551_v46 = vmax.f32 %v7611_v14, 0.0 }
 0x2de   :  { %v2552_v58 = vmax.f32 %v7548_v27, 0.0  ;;  %v2554_v60 = vmax.f32 %v7612_v35, 0.0  ;;  %3709 = vmatprep.subr.bf16.mxu0 %v8669_v43  ;;  %4095 = vmatprep.subr.bf16.mxu1 %v8702_v50  ;;  %v8709_v43 = vld [vmem:[#allocation8 + $0x2e8] ss:$16 sps:$4 sm:$0xff]  }
 0x2df   :  { %v2553_v63 = vmax.f32 %v7549_v17, 0.0  ;;  %v2555_v3 = vmax.f32 %v7613_v5, 0.0 }
 0x2e0   :  { %v2664_v4 = vpack.c.bf16 %v2552_v58, %v2548_v54  ;;  %v9667_v41 = vpack.c.bf16 %v2554_v60, %v2550_v55  ;;  %v8676_v55 = vld [vmem:[#allocation8 + $0x300] ss:$16 sps:$4 sm:$0xff]   ;;  %v8715_v58 = vld [vmem:[#allocation8 + $0x308] ss:$16 sps:$4 sm:$0xff]  }
 0x2e1   :  { %v2665_v7 = vpack.c.bf16 %v2553_v63, %v2549_v59  ;;  %v9669_v8 = vpack.c.bf16 %v2555_v3, %v2551_v46  ;;  %v2019_v10 = vpop.f32.mrb[80].mxu0  ;;  %v2405_v11 = vpop.f32.mrb[80].mxu1  ;;  %3710 = vmatpush1.bf16.msra.mxu0 %v8667_v47  ;;  %4096 = vmatpush1.bf16.msra.mxu1 %v8700_v53  ;;  %v8687_v63 = vld [vmem:[#allocation8 + $0x324] ss:$16 sps:$4 sm:$0xff]   ;;  %v8720_v3 = vld [vmem:[#allocation8 + $0x32c] ss:$16 sps:$4 sm:$0xff]  }
 0x2e2   :  { %v7550_v22 = vadd.f32 %v2019_v10, %v9612_v30  ;;  %v7614_v15 = vadd.f32 %v2405_v11, %v9615_v36  ;;  %v2021_v20 = vpop.f32.mrb[81].mxu0  ;;  %v2407_v40 = vpop.f32.mrb[81].mxu1  ;;  %3711 = vmatprep.subr.bf16.mxu0 %v8672_v52  ;;  %4097 = vmatprep.subr.bf16.mxu1 %v8708_v49 }
 0x2e3   :  { %v7551_v1 = vadd.f32 %v2021_v20, %v9618_v19  ;;  %v7615_v0 = vadd.f32 %v2407_v40, %v9621_v28  ;;  %v2023_v9 = vpop.f32.mrb[82].mxu0  ;;  %v2409_v29 = vpop.f32.mrb[82].mxu1  ;;  %3568 = vmatprep.mubr.bf16.mxu0 %v2665_v7  ;;  %3954 = vmatprep.mubr.bf16.mxu1 %v2665_v7 }
 0x2e4   :  { %v7552_v33 = vadd.f32 %v2023_v9, %v9612_v30  ;;  %v7616_v56 = vadd.f32 %v2409_v29, %v9615_v36  ;;  %v2025_v34 = vpop.f32.mrb[83].mxu0  ;;  %v2411_v38 = vpop.f32.mrb[83].mxu1  ;;  %3569 = vmatmul.mubr.bf16.gmra.mrb[140].mxu0 %v2664_v4  ;;  %3955 = vmatmul.mubr.bf16.gmra.mrb[140].mxu1 %v2664_v4  ;;  %v2556_v50 = vmax.f32 %v7550_v22, 0.0  ;;  %v2558_v26 = vmax.f32 %v7614_v15, 0.0 }
 0x2e5   :  { %v7553_v12 = vadd.f32 %v2025_v34, %v9618_v19  ;;  %v7617_v18 = vadd.f32 %v2411_v38, %v9621_v28  ;;  %3712 = vmatpush1.bf16.msra.mxu0 %v8670_v13  ;;  %4098 = vmatpush1.bf16.msra.mxu1 %v8706_v16  ;;  %v2557_v27 = vmax.f32 %v7551_v1, 0.0  ;;  %v2559_v35 = vmax.f32 %v7615_v0, 0.0  ;;  %v8718_v1 = vld [vmem:[#allocation8 + $0x328] ss:$16 sps:$4 sm:$0xff]  }
 0x2e6   :  { %v2560_v14 = vmax.f32 %v7552_v33, 0.0  ;;  %v2562_v42 = vmax.f32 %v7616_v56, 0.0  ;;  %3713 = vmatprep.subr.bf16.mxu0 %v8675_v21  ;;  %4099 = vmatprep.subr.bf16.mxu1 %v8711_v24  ;;  %v8685_v21 = vld [vmem:[#allocation8 + $0x320] ss:$16 sps:$4 sm:$0xff]   ;;  %v8696_v24 = vld [vmem:[#allocation8 + $0x344] ss:$16 sps:$4 sm:$0xff]  }
 0x2e7   :  { %v2561_v39 = vmax.f32 %v7553_v12, 0.0  ;;  %v2563_v44 = vmax.f32 %v7617_v18, 0.0  ;;  %v8726_v56 = vld [vmem:[#allocation8 + $0x34c] ss:$16 sps:$4 sm:$0xff]  }
 0x2e8   :  { %v2668_v17 = vpack.c.bf16 %v2560_v14, %v2556_v50  ;;  %v9679_v5 = vpack.c.bf16 %v2562_v42, %v2558_v26  ;;  %v8694_v42 = vld [vmem:[#allocation8 + $0x340] ss:$16 sps:$4 sm:$0xff]  }
 0x2e9   :  { %v2669_v47 = vpack.c.bf16 %v2561_v39, %v2557_v27  ;;  %v9681_v52 = vpack.c.bf16 %v2563_v44, %v2559_v35  ;;  %v2029_v53 = vpop.f32.mrb[84].mxu0  ;;  %v2415_v54 = vpop.f32.mrb[84].mxu1  ;;  %3714 = vmatpush1.bf16.msra.mxu0 %v8673_v57  ;;  %4100 = vmatpush1.bf16.msra.mxu1 %v8709_v43 }
 0x2ea   :  { %v7554_v60 = vadd.f32 %v2029_v53, %v9612_v30  ;;  %v7618_v49 = vadd.f32 %v2415_v54, %v9615_v36  ;;  %v2031_v59 = vpop.f32.mrb[85].mxu0  ;;  %v2417_v46 = vpop.f32.mrb[85].mxu1  ;;  %3715 = vmatprep.subr.bf16.mxu0 %v8678_v2  ;;  %4101 = vmatprep.subr.bf16.mxu1 %v8717_v45  ;;  %v8724_v45 = vld [vmem:[#allocation8 + $0x348] ss:$16 sps:$4 sm:$0xff]  }
 0x2eb   :  { %v7555_v4 = vadd.f32 %v2031_v59, %v9618_v19  ;;  %v7619_v7 = vadd.f32 %v2417_v46, %v9621_v28  ;;  %v2033_v10 = vpop.f32.mrb[86].mxu0  ;;  %v2419_v11 = vpop.f32.mrb[86].mxu1  ;;  %3578 = vmatprep.mubr.bf16.mxu0 %v2669_v47  ;;  %3964 = vmatprep.mubr.bf16.mxu1 %v2669_v47  ;;  %v8729_v47 = vld [vmem:[#allocation8 + $0x36c] ss:$16 sps:$4 sm:$0xff]  }
 0x2ec   :  { %v7556_v13 = vadd.f32 %v2033_v10, %v9612_v30  ;;  %v7620_v16 = vadd.f32 %v2419_v11, %v9615_v36  ;;  %v2035_v22 = vpop.f32.mrb[87].mxu0  ;;  %v2421_v15 = vpop.f32.mrb[87].mxu1  ;;  %3579 = vmatmul.mubr.bf16.gmra.mrb[144].mxu0 %v2668_v17  ;;  %3965 = vmatmul.mubr.bf16.gmra.mrb[144].mxu1 %v2668_v17  ;;  %v2564_v0 = vmax.f32 %v7554_v60, 0.0  ;;  %v2566_v9 = vmax.f32 %v7618_v49, 0.0  ;;  %v8705_v17 = vld [vmem:[#allocation8 + $0x364] ss:$16 sps:$4 sm:$0xff]  }
 0x2ed   :  { %v7557_v20 = vadd.f32 %v2035_v22, %v9618_v19  ;;  %v7621_v40 = vadd.f32 %v2421_v15, %v9621_v28  ;;  %3716 = vmatpush1.bf16.msra.mxu0 %v8676_v55  ;;  %4102 = vmatpush1.bf16.msra.mxu1 %v8715_v58  ;;  %v2565_v34 = vmax.f32 %v7555_v4, 0.0  ;;  %v2567_v38 = vmax.f32 %v7619_v7, 0.0  ;;  %v8703_v4 = vld [vmem:[#allocation8 + $0x360] ss:$16 sps:$4 sm:$0xff]   ;;  %v8714_v7 = vld [vmem:[#allocation8 + $0x384] ss:$16 sps:$4 sm:$0xff]  }
 0x2ee   :  { %v2568_v29 = vmax.f32 %v7556_v13, 0.0  ;;  %v2570_v33 = vmax.f32 %v7620_v16, 0.0  ;;  %3717 = vmatprep.subr.bf16.mxu0 %v8687_v63  ;;  %4103 = vmatprep.subr.bf16.mxu1 %v8720_v3  ;;  %v8727_v10 = vld [vmem:[#allocation8 + $0x368] ss:$16 sps:$4 sm:$0xff]   ;;  %v8735_v15 = vld [vmem:[#allocation8 + $0x38c] ss:$16 sps:$4 sm:$0xff]  }
 0x2ef   :  { %v2569_v12 = vmax.f32 %v7557_v20, 0.0  ;;  %v2571_v18 = vmax.f32 %v7621_v40, 0.0 }
 0x2f0   :  { %v2672_v57 = vpack.c.bf16 %v2568_v29, %v2564_v0  ;;  %v9691_v2 = vpack.c.bf16 %v2570_v33, %v2566_v9 }
 0x2f1   :  { %v2673_v43 = vpack.c.bf16 %v2569_v12, %v2565_v34  ;;  %v9693_v50 = vpack.c.bf16 %v2571_v18, %v2567_v38  ;;  %v2039_v26 = vpop.f32.mrb[88].mxu0  ;;  %v2425_v14 = vpop.f32.mrb[88].mxu1  ;;  %3718 = vmatpush1.bf16.msra.mxu0 %v8685_v21  ;;  %4104 = vmatpush1.bf16.msra.mxu1 %v8718_v1  ;;  %v8712_v34 = vld [vmem:[#allocation8 + $0x380] ss:$16 sps:$4 sm:$0xff]   ;;  %v8733_v38 = vld [vmem:[#allocation8 + $0x388] ss:$16 sps:$4 sm:$0xff]  }
 0x2f2   :  { %v7558_v27 = vadd.f32 %v2039_v26, %v9612_v30  ;;  %v7622_v35 = vadd.f32 %v2425_v14, %v9615_v36  ;;  %v2041_v39 = vpop.f32.mrb[89].mxu0  ;;  %v2427_v44 = vpop.f32.mrb[89].mxu1  ;;  %3719 = vmatprep.subr.bf16.mxu0 %v8696_v24  ;;  %4105 = vmatprep.subr.bf16.mxu1 %v8726_v56  ;;  %v8723_v26 = vld [vmem:[#allocation8 + $0x3a4] ss:$16 sps:$4 sm:$0xff]   ;;  %v8738_v14 = vld [vmem:[#allocation8 + $0x3ac] ss:$16 sps:$4 sm:$0xff]  }
 0x2f3   :  { %v7559_v53 = vadd.f32 %v2041_v39, %v9618_v19  ;;  %v7623_v54 = vadd.f32 %v2427_v44, %v9621_v28  ;;  %v2043_v55 = vpop.f32.mrb[90].mxu0  ;;  %v2429_v58 = vpop.f32.mrb[90].mxu1  ;;  %3588 = vmatprep.mubr.bf16.mxu0 %v2673_v43  ;;  %3974 = vmatprep.mubr.bf16.mxu1 %v2673_v43 }
 0x2f4   :  { %v7560_v60 = vadd.f32 %v2043_v55, %v9612_v30  ;;  %v7624_v49 = vadd.f32 %v2429_v58, %v9615_v36  ;;  %v2045_v59 = vpop.f32.mrb[91].mxu0  ;;  %v2431_v46 = vpop.f32.mrb[91].mxu1  ;;  %3589 = vmatmul.mubr.bf16.gmra.mrb[148].mxu0 %v2672_v57  ;;  %3975 = vmatmul.mubr.bf16.gmra.mrb[148].mxu1 %v2672_v57  ;;  %v2572_v11 = vmax.f32 %v7558_v27, 0.0  ;;  %v2574_v13 = vmax.f32 %v7622_v35, 0.0  ;;  %v8721_v55 = vld [vmem:[#allocation8 + $0x3a0] ss:$16 sps:$4 sm:$0xff]  }
 0x2f5   :  { %v7561_v63 = vadd.f32 %v2045_v59, %v9618_v19  ;;  %v7625_v3 = vadd.f32 %v2431_v46, %v9621_v28  ;;  %3720 = vmatpush1.bf16.msra.mxu0 %v8694_v42  ;;  %4106 = vmatpush1.bf16.msra.mxu1 %v8724_v45  ;;  %v2573_v20 = vmax.f32 %v7559_v53, 0.0  ;;  %v2575_v40 = vmax.f32 %v7623_v54, 0.0  ;;  %v8732_v58 = vld [vmem:[#allocation8 + $0x3c4] ss:$16 sps:$4 sm:$0xff]  }
 0x2f6   :  { %v2576_v16 = vmax.f32 %v7560_v60, 0.0  ;;  %v2578_v22 = vmax.f32 %v7624_v49, 0.0  ;;  %3721 = vmatprep.subr.bf16.mxu0 %v8705_v17  ;;  %4107 = vmatprep.subr.bf16.mxu1 %v8729_v47  ;;  %v8736_v60 = vld [vmem:[#allocation8 + $0x3a8] ss:$16 sps:$4 sm:$0xff]  }
 0x2f7   :  { %v2577_v21 = vmax.f32 %v7561_v63, 0.0  ;;  %v2579_v24 = vmax.f32 %v7625_v3, 0.0  ;;  %v8744_v3 = vld [vmem:[#allocation8 + $0x3cc] ss:$16 sps:$4 sm:$0xff]  }
 0x2f8   :  { %v2676_v1 = vpack.c.bf16 %v2576_v16, %v2572_v11  ;;  %v9703_v0 = vpack.c.bf16 %v2578_v22, %v2574_v13 }
 0x2f9   :  { %v2677_v9 = vpack.c.bf16 %v2577_v21, %v2573_v20  ;;  %v9705_v29 = vpack.c.bf16 %v2579_v24, %v2575_v40  ;;  %v2049_v33 = vpop.f32.mrb[92].mxu0  ;;  %v2435_v56 = vpop.f32.mrb[92].mxu1  ;;  %3722 = vmatpush1.bf16.msra.mxu0 %v8703_v4  ;;  %4108 = vmatpush1.bf16.msra.mxu1 %v8727_v10  ;;  %v8730_v21 = vld [vmem:[#allocation8 + $0x3c0] ss:$16 sps:$4 sm:$0xff]   ;;  %v8742_v24 = vld [vmem:[#allocation8 + $0x3c8] ss:$16 sps:$4 sm:$0xff]  }
 0x2fa   :  { %v7562_v12 = vadd.f32 %v2049_v33, %v9612_v30  ;;  %v7626_v18 = vadd.f32 %v2435_v56, %v9615_v36  ;;  %v2051_v57 = vpop.f32.mrb[93].mxu0  ;;  %v2437_v43 = vpop.f32.mrb[93].mxu1  ;;  %3723 = vmatprep.subr.bf16.mxu0 %v8714_v7  ;;  %4109 = vmatprep.subr.bf16.mxu1 %v8735_v15 }
 0x2fb   :  { %v7563_v42 = vadd.f32 %v2051_v57, %v9618_v19  ;;  %v7627_v45 = vadd.f32 %v2437_v43, %v9621_v28  ;;  %v2053_v27 = vpop.f32.mrb[94].mxu0  ;;  %v2439_v35 = vpop.f32.mrb[94].mxu1  ;;  %3598 = vmatprep.mubr.bf16.mxu0 %v2677_v9  ;;  %3984 = vmatprep.mubr.bf16.mxu1 %v2677_v9 }
 0x2fc   :  { %v7564_v39 = vadd.f32 %v2053_v27, %v9612_v30  ;;  %v7628_v44 = vadd.f32 %v2439_v35, %v9615_v36  ;;  %v2055_v17 = vpop.f32.mrb[95].mxu0  ;;  %v2441_v47 = vpop.f32.mrb[95].mxu1  ;;  %3599 = vmatmul.mubr.bf16.gmra.mrb[152].mxu0 %v2676_v1  ;;  %3985 = vmatmul.mubr.bf16.gmra.mrb[152].mxu1 %v2676_v1  ;;  %v2580_v49 = vmax.f32 %v7562_v12, 0.0  ;;  %v2582_v59 = vmax.f32 %v7626_v18, 0.0 }
 0x2fd   :  { %v7565_v53 = vadd.f32 %v2055_v17, %v9618_v19  ;;  %v7629_v54 = vadd.f32 %v2441_v47, %v9621_v28  ;;  %3724 = vmatpush1.bf16.msra.mxu0 %v8712_v34  ;;  %4110 = vmatpush1.bf16.msra.mxu1 %v8733_v38  ;;  %v2581_v4 = vmax.f32 %v7563_v42, 0.0  ;;  %v2583_v7 = vmax.f32 %v7627_v45, 0.0  ;;  %v8741_v34 = vld [vmem:[#allocation8 + $0x3e4] ss:$16 sps:$4 sm:$0xff]   ;;  %v8747_v38 = vld [vmem:[#allocation8 + $0x3ec] ss:$16 sps:$4 sm:$0xff]  }
 0x2fe   :  { %v2584_v46 = vmax.f32 %v7564_v39, 0.0  ;;  %v2586_v63 = vmax.f32 %v7628_v44, 0.0  ;;  %3725 = vmatprep.subr.bf16.mxu0 %v8723_v26  ;;  %4111 = vmatprep.subr.bf16.mxu1 %v8738_v14  ;;  %v8739_v39 = vld [vmem:[#allocation8 + $0x3e0] ss:$16 sps:$4 sm:$0xff]   ;;  %v8745_v44 = vld [vmem:[#allocation8 + $0x3e8] ss:$16 sps:$4 sm:$0xff]  }
 0x2ff   :  { %v2585_v10 = vmax.f32 %v7565_v53, 0.0  ;;  %v2587_v11 = vmax.f32 %v7629_v54, 0.0 }
 0x300   :  { %v2680_v13 = vpack.c.bf16 %v2584_v46, %v2580_v49  ;;  %v9715_v16 = vpack.c.bf16 %v2586_v63, %v2582_v59 }
 0x301   :  { %v2681_v22 = vpack.c.bf16 %v2585_v10, %v2581_v4  ;;  %v9717_v15 = vpack.c.bf16 %v2587_v11, %v2583_v7  ;;  %v2059_v20 = vpop.f32.mrb[96].mxu0  ;;  %v2445_v40 = vpop.f32.mrb[96].mxu1  ;;  %3726 = vmatpush1.bf16.msra.mxu0 %v8721_v55  ;;  %4112 = vmatpush1.bf16.msra.mxu1 %v8736_v60 }
 0x302   :  { %v7566_v1 = vadd.f32 %v2059_v20, %v9612_v30  ;;  %v7630_v9 = vadd.f32 %v2445_v40, %v9615_v36  ;;  %v2061_v33 = vpop.f32.mrb[97].mxu0  ;;  %v2447_v56 = vpop.f32.mrb[97].mxu1  ;;  %3727 = vmatprep.subr.bf16.mxu0 %v8732_v58  ;;  %4113 = vmatprep.subr.bf16.mxu1 %v8744_v3 }
 0x303   :  { %v7567_v12 = vadd.f32 %v2061_v33, %v9618_v19  ;;  %v7631_v18 = vadd.f32 %v2447_v56, %v9621_v28  ;;  %v2063_v57 = vpop.f32.mrb[98].mxu0  ;;  %v2449_v43 = vpop.f32.mrb[98].mxu1  ;;  %3608 = vmatprep.mubr.bf16.mxu0 %v2681_v22  ;;  %3994 = vmatprep.mubr.bf16.mxu1 %v2681_v22 }
 0x304   :  { %v7568_v26 = vadd.f32 %v2063_v57, %v9612_v30  ;;  %v7632_v14 = vadd.f32 %v2449_v43, %v9615_v36  ;;  %v2065_v42 = vpop.f32.mrb[99].mxu0  ;;  %v2451_v45 = vpop.f32.mrb[99].mxu1  ;;  %3609 = vmatmul.mubr.bf16.gmra.mrb[156].mxu0 %v2680_v13  ;;  %3995 = vmatmul.mubr.bf16.gmra.mrb[156].mxu1 %v2680_v13  ;;  %v2588_v17 = vmax.f32 %v7566_v1, 0.0  ;;  %v2590_v47 = vmax.f32 %v7630_v9, 0.0 }
 0x305   :  { %v7569_v27 = vadd.f32 %v2065_v42, %v9618_v19  ;;  %v7633_v35 = vadd.f32 %v2451_v45, %v9621_v28  ;;  %3728 = vmatpush1.bf16.msra.mxu0 %v8730_v21  ;;  %4114 = vmatpush1.bf16.msra.mxu1 %v8742_v24  ;;  %v2589_v55 = vmax.f32 %v7567_v12, 0.0  ;;  %v2591_v58 = vmax.f32 %v7631_v18, 0.0 }
 0x306   :  { %v2592_v53 = vmax.f32 %v7568_v26, 0.0  ;;  %v2594_v54 = vmax.f32 %v7632_v14, 0.0  ;;  %3729 = vmatprep.subr.bf16.mxu0 %v8741_v34  ;;  %4115 = vmatprep.subr.bf16.mxu1 %v8747_v38 }
 0x307   :  { %v2593_v60 = vmax.f32 %v7569_v27, 0.0  ;;  %v2595_v49 = vmax.f32 %v7633_v35, 0.0 }
 0x308   :  { %v2684_v59 = vpack.c.bf16 %v2592_v53, %v2588_v17  ;;  %v9727_v46 = vpack.c.bf16 %v2594_v54, %v2590_v47 }
 0x309   :  { %v2685_v63 = vpack.c.bf16 %v2593_v60, %v2589_v55  ;;  %v9729_v3 = vpack.c.bf16 %v2595_v49, %v2591_v58  ;;  %v2069_v4 = vpop.f32.mrb[100].mxu0  ;;  %v2455_v7 = vpop.f32.mrb[100].mxu1  ;;  %3730 = vmatpush1.bf16.msra.mxu0 %v8739_v39  ;;  %4116 = vmatpush1.bf16.msra.mxu1 %v8745_v44 }
 0x30a   :  { %v7570_v10 = vadd.f32 %v2069_v4, %v9612_v30  ;;  %v7634_v11 = vadd.f32 %v2455_v7, %v9615_v36  ;;  %v2071_v13 = vpop.f32.mrb[101].mxu0  ;;  %v2457_v22 = vpop.f32.mrb[101].mxu1 }
 0x30b   :  { %v7571_v20 = vadd.f32 %v2071_v13, %v9618_v19  ;;  %v7635_v40 = vadd.f32 %v2457_v22, %v9621_v28  ;;  %v2073_v21 = vpop.f32.mrb[102].mxu0  ;;  %v2459_v24 = vpop.f32.mrb[102].mxu1  ;;  %3618 = vmatprep.mubr.bf16.mxu0 %v2685_v63  ;;  %4004 = vmatprep.mubr.bf16.mxu1 %v2685_v63 }
 0x30c   :  { %v7572_v1 = vadd.f32 %v2073_v21, %v9612_v30  ;;  %v7636_v9 = vadd.f32 %v2459_v24, %v9615_v36  ;;  %v2075_v33 = vpop.f32.mrb[103].mxu0  ;;  %v2461_v56 = vpop.f32.mrb[103].mxu1  ;;  %3619 = vmatmul.mubr.bf16.gmra.mrb[160].mxu0 %v2684_v59  ;;  %4005 = vmatmul.mubr.bf16.gmra.mrb[160].mxu1 %v2684_v59  ;;  %v2596_v12 = vmax.f32 %v7570_v10, 0.0  ;;  %v2598_v18 = vmax.f32 %v7634_v11, 0.0 }
 0x30d   :  { %v7573_v34 = vadd.f32 %v2075_v33, %v9618_v19  ;;  %v7637_v38 = vadd.f32 %v2461_v56, %v9621_v28  ;;  %v2597_v26 = vmax.f32 %v7571_v20, 0.0  ;;  %v2599_v14 = vmax.f32 %v7635_v40, 0.0 }
 0x30e   :  { %v2600_v57 = vmax.f32 %v7572_v1, 0.0  ;;  %v2602_v43 = vmax.f32 %v7636_v9, 0.0 }
 0x30f   :  { %v2601_v42 = vmax.f32 %v7573_v34, 0.0  ;;  %v2603_v45 = vmax.f32 %v7637_v38, 0.0 }
 0x310   :  { %v2688_v27 = vpack.c.bf16 %v2600_v57, %v2596_v12  ;;  %v9739_v35 = vpack.c.bf16 %v2602_v43, %v2598_v18 }
 0x311   :  { %v2689_v39 = vpack.c.bf16 %v2601_v42, %v2597_v26  ;;  %v9741_v44 = vpack.c.bf16 %v2603_v45, %v2599_v14  ;;  %v2079_v17 = vpop.f32.mrb[104].mxu0  ;;  %v2465_v47 = vpop.f32.mrb[104].mxu1 }
 0x312   :  { %v7574_v53 = vadd.f32 %v2079_v17, %v9612_v30  ;;  %v7638_v54 = vadd.f32 %v2465_v47, %v9615_v36  ;;  %v2081_v55 = vpop.f32.mrb[105].mxu0  ;;  %v2467_v58 = vpop.f32.mrb[105].mxu1 }
 0x313   :  { %v7575_v60 = vadd.f32 %v2081_v55, %v9618_v19  ;;  %v7639_v49 = vadd.f32 %v2467_v58, %v9621_v28  ;;  %v2083_v59 = vpop.f32.mrb[106].mxu0  ;;  %v2469_v63 = vpop.f32.mrb[106].mxu1  ;;  %3628 = vmatprep.mubr.bf16.mxu0 %v2689_v39  ;;  %4014 = vmatprep.mubr.bf16.mxu1 %v2689_v39 }
 0x314   :  { %v7576_v4 = vadd.f32 %v2083_v59, %v9612_v30  ;;  %v7640_v7 = vadd.f32 %v2469_v63, %v9615_v36  ;;  %v2085_v10 = vpop.f32.mrb[107].mxu0  ;;  %v2471_v11 = vpop.f32.mrb[107].mxu1  ;;  %3629 = vmatmul.mubr.bf16.gmra.mrb[164].mxu0 %v2688_v27  ;;  %4015 = vmatmul.mubr.bf16.gmra.mrb[164].mxu1 %v2688_v27  ;;  %v2604_v20 = vmax.f32 %v7574_v53, 0.0  ;;  %v2606_v40 = vmax.f32 %v7638_v54, 0.0 }
 0x315   :  { %v7577_v13 = vadd.f32 %v2085_v10, %v9618_v19  ;;  %v7641_v22 = vadd.f32 %v2471_v11, %v9621_v28  ;;  %v2605_v1 = vmax.f32 %v7575_v60, 0.0  ;;  %v2607_v9 = vmax.f32 %v7639_v49, 0.0 }
 0x316   :  { %v2608_v21 = vmax.f32 %v7576_v4, 0.0  ;;  %v2610_v24 = vmax.f32 %v7640_v7, 0.0 }
 0x317   :  { %v2609_v33 = vmax.f32 %v7577_v13, 0.0  ;;  %v2611_v56 = vmax.f32 %v7641_v22, 0.0 }
 0x318   :  { %v2692_v34 = vpack.c.bf16 %v2608_v21, %v2604_v20  ;;  %v9751_v38 = vpack.c.bf16 %v2610_v24, %v2606_v40 }
 0x319   :  { %v2693_v12 = vpack.c.bf16 %v2609_v33, %v2605_v1  ;;  %v9753_v18 = vpack.c.bf16 %v2611_v56, %v2607_v9  ;;  %v2089_v57 = vpop.f32.mrb[108].mxu0  ;;  %v2475_v43 = vpop.f32.mrb[108].mxu1 }
 0x31a   :  { %v7578_v26 = vadd.f32 %v2089_v57, %v9612_v30  ;;  %v7642_v14 = vadd.f32 %v2475_v43, %v9615_v36  ;;  %v2091_v42 = vpop.f32.mrb[109].mxu0  ;;  %v2477_v45 = vpop.f32.mrb[109].mxu1 }
 0x31b   :  { %v7579_v27 = vadd.f32 %v2091_v42, %v9618_v19  ;;  %v7643_v39 = vadd.f32 %v2477_v45, %v9621_v28  ;;  %v2093_v17 = vpop.f32.mrb[110].mxu0  ;;  %v2479_v47 = vpop.f32.mrb[110].mxu1  ;;  %3638 = vmatprep.mubr.bf16.mxu0 %v2693_v12  ;;  %4024 = vmatprep.mubr.bf16.mxu1 %v2693_v12 }
 0x31c   :  { %v7580_v53 = vadd.f32 %v2093_v17, %v9612_v30  ;;  %v7644_v54 = vadd.f32 %v2479_v47, %v9615_v36  ;;  %v2095_v55 = vpop.f32.mrb[111].mxu0  ;;  %v2481_v58 = vpop.f32.mrb[111].mxu1  ;;  %3639 = vmatmul.mubr.bf16.gmra.mrb[168].mxu0 %v2692_v34  ;;  %4025 = vmatmul.mubr.bf16.gmra.mrb[168].mxu1 %v2692_v34  ;;  %v2612_v59 = vmax.f32 %v7578_v26, 0.0  ;;  %v2614_v63 = vmax.f32 %v7642_v14, 0.0 }
 0x31d   :  { %v7581_v60 = vadd.f32 %v2095_v55, %v9618_v19  ;;  %v7645_v49 = vadd.f32 %v2481_v58, %v9621_v28  ;;  %v2613_v10 = vmax.f32 %v7579_v27, 0.0  ;;  %v2615_v11 = vmax.f32 %v7643_v39, 0.0 }
 0x31e   :  { %v2616_v4 = vmax.f32 %v7580_v53, 0.0  ;;  %v2618_v7 = vmax.f32 %v7644_v54, 0.0  ;;  %v8750_v53 = vld [vmem:[#allocation10 + $0x4] ss:$16 sps:$4 sm:$0xff]  }
 0x31f   :  { %v2617_v13 = vmax.f32 %v7581_v60, 0.0  ;;  %v2619_v22 = vmax.f32 %v7645_v49, 0.0  ;;  %v8753_v49 = vld [vmem:[#allocation10 + $0xc] ss:$16 sps:$4 sm:$0xff]   ;;  %5260 = vmatprep.subr.bf16.mxu0 %v8750_v53 }
 0x320   :  { %v2696_v20 = vpack.c.bf16 %v2616_v4, %v2612_v59  ;;  %v9763_v40 = vpack.c.bf16 %v2618_v7, %v2614_v63  ;;  %5646 = vmatprep.subr.bf16.mxu1 %v8753_v49 }
 0x321   :  { %v2697_v21 = vpack.c.bf16 %v2617_v13, %v2613_v10  ;;  %v9765_v24 = vpack.c.bf16 %v2619_v22, %v2615_v11  ;;  %v2099_v1 = vpop.f32.mrb[112].mxu0  ;;  %v2485_v9 = vpop.f32.mrb[112].mxu1 }
 0x322   :  { %v7582_v33 = vadd.f32 %v2099_v1, %v9612_v30  ;;  %v7646_v56 = vadd.f32 %v2485_v9, %v9615_v36  ;;  %v2101_v34 = vpop.f32.mrb[113].mxu0  ;;  %v2487_v12 = vpop.f32.mrb[113].mxu1 }
 0x323   :  { %v7583_v57 = vadd.f32 %v2101_v34, %v9618_v19  ;;  %v7647_v43 = vadd.f32 %v2487_v12, %v9621_v28  ;;  %v2103_v26 = vpop.f32.mrb[114].mxu0  ;;  %v2489_v14 = vpop.f32.mrb[114].mxu1  ;;  %3648 = vmatprep.mubr.bf16.mxu0 %v2697_v21  ;;  %4034 = vmatprep.mubr.bf16.mxu1 %v2697_v21 }
 0x324   :  { %v7584_v42 = vadd.f32 %v2103_v26, %v9612_v30  ;;  %v7648_v45 = vadd.f32 %v2489_v14, %v9615_v36  ;;  %v2105_v27 = vpop.f32.mrb[115].mxu0  ;;  %v2491_v39 = vpop.f32.mrb[115].mxu1  ;;  %3649 = vmatmul.mubr.bf16.gmra.mrb[172].mxu0 %v2696_v20  ;;  %4035 = vmatmul.mubr.bf16.gmra.mrb[172].mxu1 %v2696_v20  ;;  %v2620_v54 = vmax.f32 %v7582_v33, 0.0  ;;  %v2622_v55 = vmax.f32 %v7646_v56, 0.0 }
 0x325   :  { %v7585_v17 = vadd.f32 %v2105_v27, %v9618_v19  ;;  %v7649_v47 = vadd.f32 %v2491_v39, %v9621_v28  ;;  %v2621_v59 = vmax.f32 %v7583_v57, 0.0  ;;  %v2623_v63 = vmax.f32 %v7647_v43, 0.0 }
 0x326   :  { %v2624_v58 = vmax.f32 %v7584_v42, 0.0  ;;  %v2626_v60 = vmax.f32 %v7648_v45, 0.0 }
 0x327   :  { %v2625_v4 = vmax.f32 %v7585_v17, 0.0  ;;  %v2627_v7 = vmax.f32 %v7649_v47, 0.0 }
 0x328   :  { %v2700_v10 = vpack.c.bf16 %v2624_v58, %v2620_v54  ;;  %v9775_v11 = vpack.c.bf16 %v2626_v60, %v2622_v55 }
 0x329   :  { %v2701_v13 = vpack.c.bf16 %v2625_v4, %v2621_v59  ;;  %v9777_v22 = vpack.c.bf16 %v2627_v7, %v2623_v63  ;;  %v2109_v20 = vpop.f32.mrb[116].mxu0  ;;  %v2495_v21 = vpop.f32.mrb[116].mxu1 }
 0x32a   :  { %v7586_v1 = vadd.f32 %v2109_v20, %v9612_v30  ;;  %v7650_v9 = vadd.f32 %v2495_v21, %v9615_v36  ;;  %v2111_v33 = vpop.f32.mrb[117].mxu0  ;;  %v2497_v56 = vpop.f32.mrb[117].mxu1 }
 0x32b   :  { %v7587_v34 = vadd.f32 %v2111_v33, %v9618_v19  ;;  %v7651_v12 = vadd.f32 %v2497_v56, %v9621_v28  ;;  %v2113_v57 = vpop.f32.mrb[118].mxu0  ;;  %v2499_v43 = vpop.f32.mrb[118].mxu1  ;;  %3658 = vmatprep.mubr.bf16.mxu0 %v2701_v13  ;;  %4044 = vmatprep.mubr.bf16.mxu1 %v2701_v13 }
 0x32c   :  { %v7588_v26 = vadd.f32 %v2113_v57, %v9612_v30  ;;  %v7652_v14 = vadd.f32 %v2499_v43, %v9615_v36  ;;  %v2115_v42 = vpop.f32.mrb[119].mxu0  ;;  %v2501_v45 = vpop.f32.mrb[119].mxu1  ;;  %3659 = vmatmul.mubr.bf16.gmra.mrb[176].mxu0 %v2700_v10  ;;  %4045 = vmatmul.mubr.bf16.gmra.mrb[176].mxu1 %v2700_v10  ;;  %v2628_v17 = vmax.f32 %v7586_v1, 0.0  ;;  %v2630_v47 = vmax.f32 %v7650_v9, 0.0 }
 0x32d   :  { %v7589_v27 = vadd.f32 %v2115_v42, %v9618_v19  ;;  %v7653_v39 = vadd.f32 %v2501_v45, %v9621_v28  ;;  %v2629_v55 = vmax.f32 %v7587_v34, 0.0  ;;  %v2631_v58 = vmax.f32 %v7651_v12, 0.0 }
 0x32e   :  { %v2632_v53 = vmax.f32 %v7588_v26, 0.0  ;;  %v2634_v54 = vmax.f32 %v7652_v14, 0.0 }
 0x32f   :  { %v2633_v60 = vmax.f32 %v7589_v27, 0.0  ;;  %v2635_v49 = vmax.f32 %v7653_v39, 0.0 }
 0x330   :  { %v2704_v59 = vpack.c.bf16 %v2632_v53, %v2628_v17  ;;  %v9787_v63 = vpack.c.bf16 %v2634_v54, %v2630_v47 }
 0x331   :  { %v2705_v4 = vpack.c.bf16 %v2633_v60, %v2629_v55  ;;  %v9789_v7 = vpack.c.bf16 %v2635_v49, %v2631_v58  ;;  %v2119_v13 = vpop.f32.mrb[120].mxu0  ;;  %v2505_v10 = vpop.f32.mrb[120].mxu1 }
 0x332   :  { %v7590_v20 = vadd.f32 %v2119_v13, %v9612_v30  ;;  %v7654_v21 = vadd.f32 %v2505_v10, %v9615_v36  ;;  %v2121_v1 = vpop.f32.mrb[121].mxu0  ;;  %v2507_v9 = vpop.f32.mrb[121].mxu1 }
 0x333   :  { %v7591_v33 = vadd.f32 %v2121_v1, %v9618_v19  ;;  %v7655_v56 = vadd.f32 %v2507_v9, %v9621_v28  ;;  %v2123_v34 = vpop.f32.mrb[122].mxu0  ;;  %v2509_v12 = vpop.f32.mrb[122].mxu1  ;;  %3668 = vmatprep.mubr.bf16.mxu0 %v2705_v4  ;;  %4054 = vmatprep.mubr.bf16.mxu1 %v2705_v4 }
 0x334   :  { %v7592_v57 = vadd.f32 %v2123_v34, %v9612_v30  ;;  %v7656_v43 = vadd.f32 %v2509_v12, %v9615_v36  ;;  %v2125_v26 = vpop.f32.mrb[123].mxu0  ;;  %v2511_v14 = vpop.f32.mrb[123].mxu1  ;;  %3669 = vmatmul.mubr.bf16.gmra.mrb[180].mxu0 %v2704_v59  ;;  %4055 = vmatmul.mubr.bf16.gmra.mrb[180].mxu1 %v2704_v59  ;;  %v2636_v27 = vmax.f32 %v7590_v20, 0.0  ;;  %v2638_v39 = vmax.f32 %v7654_v21, 0.0 }
 0x335   :  { %v7593_v42 = vadd.f32 %v2125_v26, %v9618_v19  ;;  %v7657_v45 = vadd.f32 %v2511_v14, %v9621_v28  ;;  %v2637_v53 = vmax.f32 %v7591_v33, 0.0  ;;  %v2639_v54 = vmax.f32 %v7655_v56, 0.0 }
 0x336   :  { %v2640_v17 = vmax.f32 %v7592_v57, 0.0  ;;  %v2642_v47 = vmax.f32 %v7656_v43, 0.0 }
 0x337   :  { %v2641_v55 = vmax.f32 %v7593_v42, 0.0  ;;  %v2643_v58 = vmax.f32 %v7657_v45, 0.0 }
 0x338   :  { %v2708_v60 = vpack.c.bf16 %v2640_v17, %v2636_v27  ;;  %v9799_v49 = vpack.c.bf16 %v2642_v47, %v2638_v39 }
 0x339   :  { %v2709_v4 = vpack.c.bf16 %v2641_v55, %v2637_v53  ;;  %v9801_v13 = vpack.c.bf16 %v2643_v58, %v2639_v54  ;;  %v2129_v10 = vpop.f32.mrb[124].mxu0  ;;  %v2515_v59 = vpop.f32.mrb[124].mxu1 }
 0x33a   :  { %v7594_v1 = vadd.f32 %v2129_v10, %v9612_v30  ;;  %v7658_v9 = vadd.f32 %v2515_v59, %v9615_v36  ;;  %v2131_v20 = vpop.f32.mrb[125].mxu0  ;;  %v2517_v21 = vpop.f32.mrb[125].mxu1  ;;  %v8759_v59 = vld [vmem:[#allocation10 + $0x2c] ss:$16 sps:$4 sm:$0xff]  }
 0x33b   :  { %v7595_v34 = vadd.f32 %v2131_v20, %v9618_v19  ;;  %v7659_v33 = vadd.f32 %v2517_v21, %v9621_v28  ;;  %v2133_v56 = vpop.f32.mrb[126].mxu0  ;;  %v2519_v12 = vpop.f32.mrb[126].mxu1  ;;  %3678 = vmatprep.mubr.bf16.mxu0 %v2709_v4  ;;  %4064 = vmatprep.mubr.bf16.mxu1 %v2709_v4  ;;  %v8762_v20 = vld [vmem:[#allocation10 + $0x44] ss:$16 sps:$4 sm:$0xff]   ;;  %v8760_v21 = vld [vmem:[#allocation10 + $0x40] ss:$16 sps:$4 sm:$0xff]  }
 0x33c   :  { %v7596_v57 = vadd.f32 %v2133_v56, %v9612_v30  ;;  %v7660_v43 = vadd.f32 %v2519_v12, %v9615_v36  ;;  %v2135_v26 = vpop.f32.mrb[127].mxu0  ;;  %v2521_v14 = vpop.f32.mrb[127].mxu1  ;;  %3679 = vmatmul.mubr.bf16.gmra.mrb[184].mxu0 %v2708_v60  ;;  %4065 = vmatmul.mubr.bf16.gmra.mrb[184].mxu1 %v2708_v60  ;;  %v2644_v27 = vmax.f32 %v7594_v1, 0.0  ;;  %v2646_v39 = vmax.f32 %v7658_v9, 0.0  ;;  %v8756_v60 = vld [vmem:[#allocation10 + $0x24] ss:$16 sps:$4 sm:$0xff]  }
 0x33d   :  { %v7597_v42 = vadd.f32 %v2135_v26, %v9618_v19  ;;  %v7661_v45 = vadd.f32 %v2521_v14, %v9621_v28  ;;  %v2645_v53 = vmax.f32 %v7595_v34, 0.0  ;;  %v2647_v54 = vmax.f32 %v7659_v33, 0.0  ;;  %v8748_v19 = vld [vmem:[#allocation10] ss:$16 sps:$4 sm:$0xff]   ;;  %v8751_v28 = vld [vmem:[#allocation10 + $0x8] ss:$16 sps:$4 sm:$0xff]  }
 0x33e   :  { %v2648_v17 = vmax.f32 %v7596_v57, 0.0  ;;  %v2650_v47 = vmax.f32 %v7660_v43, 0.0  ;;  %v8754_v1 = vld [vmem:[#allocation10 + $0x20] ss:$16 sps:$4 sm:$0xff]   ;;  %v8757_v9 = vld [vmem:[#allocation10 + $0x28] ss:$16 sps:$4 sm:$0xff]  }
 0x33f   :  { %v2649_v55 = vmax.f32 %v7597_v42, 0.0  ;;  %v2651_v58 = vmax.f32 %v7661_v45, 0.0  ;;  %v8763_v34 = vld [vmem:[#allocation10 + $0x48] ss:$16 sps:$4 sm:$0xff]   ;;  %v8768_v33 = vld [vmem:[#allocation10 + $0x64] ss:$16 sps:$4 sm:$0xff]  }
 0x340   :  { %v2712_v4 = vpack.c.bf16 %v2648_v17, %v2644_v27  ;;  %v9811_v30 = vpack.c.bf16 %v2650_v47, %v2646_v39  ;;  %v8769_v56 = vld [vmem:[#allocation10 + $0x68] ss:$16 sps:$4 sm:$0xff]   ;;  %v8774_v12 = vld [vmem:[#allocation10 + $0x84] ss:$16 sps:$4 sm:$0xff]   ;;  %v8777_v57 = vld [vmem:[#allocation10 + $0x8c] ss:$16 sps:$4 sm:$0xff]  }
 0x341   :  { %v2713_v36 = vpack.c.bf16 %v2649_v55, %v2645_v53  ;;  %v9813_v10 = vpack.c.bf16 %v2651_v58, %v2647_v54  ;;  %v8772_v43 = vld [vmem:[#allocation10 + $0x80] ss:$16 sps:$4 sm:$0xff]   ;;  %v8775_v26 = vld [vmem:[#allocation10 + $0x88] ss:$16 sps:$4 sm:$0xff]   ;;  %v8780_v14 = vld [vmem:[#allocation10 + $0xa4] ss:$16 sps:$4 sm:$0xff]  }
 0x342   :  { %v8781_v42 = vld [vmem:[#allocation10 + $0xa8] ss:$16 sps:$4 sm:$0xff]   ;;  %v8786_v45 = vld [vmem:[#allocation10 + $0xc4] ss:$16 sps:$4 sm:$0xff]   ;;  %v8789_v27 = vld [vmem:[#allocation10 + $0xcc] ss:$16 sps:$4 sm:$0xff]  }
 0x343   :  { %3688 = vmatprep.mubr.bf16.mxu0 %v2713_v36  ;;  %4074 = vmatprep.mubr.bf16.mxu1 %v2713_v36  ;;  %v8784_v39 = vld [vmem:[#allocation10 + $0xc0] ss:$16 sps:$4 sm:$0xff]   ;;  %v8787_v17 = vld [vmem:[#allocation10 + $0xc8] ss:$16 sps:$4 sm:$0xff]   ;;  %v8792_v47 = vld [vmem:[#allocation10 + $0xe4] ss:$16 sps:$4 sm:$0xff]  }
 0x344   :  { %3689 = vmatmul.mubr.bf16.gmra.mrb[188].mxu0 %v2712_v4  ;;  %4075 = vmatmul.mubr.bf16.gmra.mrb[188].mxu1 %v2712_v4  ;;  %v8793_v53 = vld [vmem:[#allocation10 + $0xe8] ss:$16 sps:$4 sm:$0xff]   ;;  %v8798_v54 = vld [vmem:[#allocation10 + $0x104] ss:$16 sps:$4 sm:$0xff]   ;;  %v8801_v55 = vld [vmem:[#allocation10 + $0x10c] ss:$16 sps:$4 sm:$0xff]  }
 0x345   :  { %3731 = vmatprep.mubr.bf16.mxu0 %v9633_v32  ;;  %4117 = vmatprep.mubr.bf16.mxu1 %v9633_v32  ;;  %v8765_v32 = vld [vmem:[#allocation10 + $0x4c] ss:$16 sps:$4 sm:$0xff]   ;;  %v8796_v58 = vld [vmem:[#allocation10 + $0x100] ss:$16 sps:$4 sm:$0xff]   ;;  %v8799_v4 = vld [vmem:[#allocation10 + $0x108] ss:$16 sps:$4 sm:$0xff]  }
 0x346   :  { %v8804_v36 = vld [vmem:[#allocation10 + $0x124] ss:$16 sps:$4 sm:$0xff]  }
 0x34c   :  { %3732 = vmatmul.mubr.bf16.vlgmr.msra.gmra.mrb[128].mxu0 %v9631_v6  ;;  %4118 = vmatmul.mubr.bf16.vlgmr.msra.gmra.mrb[128].mxu1 %v9631_v6  ;;  %v8771_v6 = vld [vmem:[#allocation10 + $0x6c] ss:$16 sps:$4 sm:$0xff]  }
 0x34d   :  { %3741 = vmatprep.mubr.bf16.mxu0 %v9645_v37  ;;  %4127 = vmatprep.mubr.bf16.mxu1 %v9645_v37  ;;  %v8766_v37 = vld [vmem:[#allocation10 + $0x60] ss:$16 sps:$4 sm:$0xff]  }
 0x34e   :  { %5261 = vmatpush1.bf16.msra.mxu0 %v8748_v19  ;;  %5647 = vmatpush1.bf16.msra.mxu1 %v8751_v28  ;;  %v8805_v19 = vld [vmem:[#allocation10 + $0x128] ss:$16 sps:$4 sm:$0xff]   ;;  %v8810_v28 = vld [vmem:[#allocation10 + $0x144] ss:$16 sps:$4 sm:$0xff]  }
 0x34f   :  { %5262 = vmatprep.subr.bf16.mxu0 %v8756_v60  ;;  %5648 = vmatprep.subr.bf16.mxu1 %v8759_v59  ;;  %v8813_v60 = vld [vmem:[#allocation10 + $0x14c] ss:$16 sps:$4 sm:$0xff]   ;;  %v8808_v59 = vld [vmem:[#allocation10 + $0x140] ss:$16 sps:$4 sm:$0xff]  }
 0x352   :  { %5263 = vmatpush1.bf16.msra.mxu0 %v8754_v1  ;;  %5649 = vmatpush1.bf16.msra.mxu1 %v8757_v9  ;;  %v8811_v1 = vld [vmem:[#allocation10 + $0x148] ss:$16 sps:$4 sm:$0xff]   ;;  %v8816_v9 = vld [vmem:[#allocation10 + $0x164] ss:$16 sps:$4 sm:$0xff]  }
 0x353   :  { %5264 = vmatprep.subr.bf16.mxu0 %v8762_v20  ;;  %5650 = vmatprep.subr.bf16.mxu1 %v8765_v32  ;;  %v8817_v20 = vld [vmem:[#allocation10 + $0x168] ss:$16 sps:$4 sm:$0xff]   ;;  %v8822_v32 = vld [vmem:[#allocation10 + $0x184] ss:$16 sps:$4 sm:$0xff]  }
 0x354   :  { %3742 = vmatmul.mubr.bf16.gmra.mrb[132].mxu0 %v9643_v61  ;;  %4128 = vmatmul.mubr.bf16.gmra.mrb[132].mxu1 %v9643_v61  ;;  %v8783_v61 = vld [vmem:[#allocation10 + $0xac] ss:$16 sps:$4 sm:$0xff]  }
 0x355   :  { %3751 = vmatprep.mubr.bf16.mxu0 %v9657_v31  ;;  %4137 = vmatprep.mubr.bf16.mxu1 %v9657_v31  ;;  %v8778_v31 = vld [vmem:[#allocation10 + $0xa0] ss:$16 sps:$4 sm:$0xff]  }
 0x356   :  { %5265 = vmatpush1.bf16.msra.mxu0 %v8760_v21  ;;  %5651 = vmatpush1.bf16.msra.mxu1 %v8763_v34  ;;  %v8825_v21 = vld [vmem:[#allocation10 + $0x18c] ss:$16 sps:$4 sm:$0xff]   ;;  %v8820_v34 = vld [vmem:[#allocation10 + $0x180] ss:$16 sps:$4 sm:$0xff]  }
 0x357   :  { %5266 = vmatprep.subr.bf16.mxu0 %v8768_v33  ;;  %5652 = vmatprep.subr.bf16.mxu1 %v8771_v6  ;;  %v8823_v33 = vld [vmem:[#allocation10 + $0x188] ss:$16 sps:$4 sm:$0xff]   ;;  %v8828_v6 = vld [vmem:[#allocation10 + $0x1a4] ss:$16 sps:$4 sm:$0xff]  }
 0x35a   :  { %5267 = vmatpush1.bf16.msra.mxu0 %v8766_v37  ;;  %5653 = vmatpush1.bf16.msra.mxu1 %v8769_v56  ;;  %v8829_v37 = vld [vmem:[#allocation10 + $0x1a8] ss:$16 sps:$4 sm:$0xff]   ;;  %v8834_v56 = vld [vmem:[#allocation10 + $0x1c4] ss:$16 sps:$4 sm:$0xff]  }
 0x35b   :  { %5268 = vmatprep.subr.bf16.mxu0 %v8774_v12  ;;  %5654 = vmatprep.subr.bf16.mxu1 %v8777_v57  ;;  %v8837_v12 = vld [vmem:[#allocation10 + $0x1cc] ss:$16 sps:$4 sm:$0xff]   ;;  %v8832_v57 = vld [vmem:[#allocation10 + $0x1c0] ss:$16 sps:$4 sm:$0xff]  }
 0x35c   :  { %3752 = vmatmul.mubr.bf16.gmra.mrb[136].mxu0 %v9655_v62  ;;  %4138 = vmatmul.mubr.bf16.gmra.mrb[136].mxu1 %v9655_v62  ;;  %v8795_v62 = vld [vmem:[#allocation10 + $0xec] ss:$16 sps:$4 sm:$0xff]  }
 0x35d   :  { %3761 = vmatprep.mubr.bf16.mxu0 %v9669_v8  ;;  %4147 = vmatprep.mubr.bf16.mxu1 %v9669_v8  ;;  %v8790_v8 = vld [vmem:[#allocation10 + $0xe0] ss:$16 sps:$4 sm:$0xff]  }
 0x35e   :  { %5269 = vmatpush1.bf16.msra.mxu0 %v8772_v43  ;;  %5655 = vmatpush1.bf16.msra.mxu1 %v8775_v26  ;;  %v8835_v43 = vld [vmem:[#allocation10 + $0x1c8] ss:$16 sps:$4 sm:$0xff]  }
 0x35f   :  { %5270 = vmatprep.subr.bf16.mxu0 %v8780_v14  ;;  %5656 = vmatprep.subr.bf16.mxu1 %v8783_v61 }
 0x362   :  { %5271 = vmatpush1.bf16.msra.mxu0 %v8778_v31  ;;  %5657 = vmatpush1.bf16.msra.mxu1 %v8781_v42 }
 0x363   :  { %5272 = vmatprep.subr.bf16.mxu0 %v8786_v45  ;;  %5658 = vmatprep.subr.bf16.mxu1 %v8789_v27 }
 0x364   :  { %3762 = vmatmul.mubr.bf16.gmra.mrb[140].mxu0 %v9667_v41  ;;  %4148 = vmatmul.mubr.bf16.gmra.mrb[140].mxu1 %v9667_v41  ;;  %v8807_v41 = vld [vmem:[#allocation10 + $0x12c] ss:$16 sps:$4 sm:$0xff]  }
 0x365   :  { %3771 = vmatprep.mubr.bf16.mxu0 %v9681_v52  ;;  %4157 = vmatprep.mubr.bf16.mxu1 %v9681_v52  ;;  %v8802_v52 = vld [vmem:[#allocation10 + $0x120] ss:$16 sps:$4 sm:$0xff]  }
 0x366   :  { %5273 = vmatpush1.bf16.msra.mxu0 %v8784_v39  ;;  %5659 = vmatpush1.bf16.msra.mxu1 %v8787_v17 }
 0x367   :  { %5274 = vmatprep.subr.bf16.mxu0 %v8792_v47  ;;  %5660 = vmatprep.subr.bf16.mxu1 %v8795_v62 }
 0x36a   :  { %5275 = vmatpush1.bf16.msra.mxu0 %v8790_v8  ;;  %5661 = vmatpush1.bf16.msra.mxu1 %v8793_v53 }
 0x36b   :  { %5276 = vmatprep.subr.bf16.mxu0 %v8798_v54  ;;  %5662 = vmatprep.subr.bf16.mxu1 %v8801_v55 }
 0x36c   :  { %3772 = vmatmul.mubr.bf16.gmra.mrb[144].mxu0 %v9679_v5  ;;  %4158 = vmatmul.mubr.bf16.gmra.mrb[144].mxu1 %v9679_v5  ;;  %v8819_v5 = vld [vmem:[#allocation10 + $0x16c] ss:$16 sps:$4 sm:$0xff]  }
 0x36d   :  { %3781 = vmatprep.mubr.bf16.mxu0 %v9693_v50  ;;  %4167 = vmatprep.mubr.bf16.mxu1 %v9693_v50  ;;  %v8814_v50 = vld [vmem:[#allocation10 + $0x160] ss:$16 sps:$4 sm:$0xff]  }
 0x36e   :  { %5277 = vmatpush1.bf16.msra.mxu0 %v8796_v58  ;;  %5663 = vmatpush1.bf16.msra.mxu1 %v8799_v4 }
 0x36f   :  { %5278 = vmatprep.subr.bf16.mxu0 %v8804_v36  ;;  %5664 = vmatprep.subr.bf16.mxu1 %v8807_v41 }
 0x372   :  { %5279 = vmatpush1.bf16.msra.mxu0 %v8802_v52  ;;  %5665 = vmatpush1.bf16.msra.mxu1 %v8805_v19 }
 0x373   :  { %5280 = vmatprep.subr.bf16.mxu0 %v8810_v28  ;;  %5666 = vmatprep.subr.bf16.mxu1 %v8813_v60  ;;  %v8844_v60 = vld [vmem:[#allocation10 + $0x200] ss:$16 sps:$4 sm:$0xff]  }
 0x374   :  { %3782 = vmatmul.mubr.bf16.gmra.mrb[148].mxu0 %v9691_v2  ;;  %4168 = vmatmul.mubr.bf16.gmra.mrb[148].mxu1 %v9691_v2  ;;  %v8831_v2 = vld [vmem:[#allocation10 + $0x1ac] ss:$16 sps:$4 sm:$0xff]  }
 0x375   :  { %3791 = vmatprep.mubr.bf16.mxu0 %v9705_v29  ;;  %4177 = vmatprep.mubr.bf16.mxu1 %v9705_v29  ;;  %v8826_v29 = vld [vmem:[#allocation10 + $0x1a0] ss:$16 sps:$4 sm:$0xff]  }
 0x376   :  { %5281 = vmatpush1.bf16.msra.mxu0 %v8808_v59  ;;  %5667 = vmatpush1.bf16.msra.mxu1 %v8811_v1  ;;  %v8847_v59 = vld [vmem:[#allocation10 + $0x208] ss:$16 sps:$4 sm:$0xff]  }
 0x377   :  { %5282 = vmatprep.subr.bf16.mxu0 %v8816_v9  ;;  %5668 = vmatprep.subr.bf16.mxu1 %v8819_v5 }
 0x37a   :  { %5283 = vmatpush1.bf16.msra.mxu0 %v8814_v50  ;;  %5669 = vmatpush1.bf16.msra.mxu1 %v8817_v20  ;;  %v8852_v20 = vld [vmem:[#allocation10 + $0x224] ss:$16 sps:$4 sm:$0xff]  }
 0x37b   :  { %5284 = vmatprep.subr.bf16.mxu0 %v8822_v32  ;;  %5670 = vmatprep.subr.bf16.mxu1 %v8825_v21  ;;  %v8855_v32 = vld [vmem:[#allocation10 + $0x22c] ss:$16 sps:$4 sm:$0xff]  }
 0x37c   :  { %3792 = vmatmul.mubr.bf16.gmra.mrb[152].mxu0 %v9703_v0  ;;  %4178 = vmatmul.mubr.bf16.gmra.mrb[152].mxu1 %v9703_v0  ;;  %v8840_v0 = vld [vmem:[#allocation10 + $0x1e4] ss:$16 sps:$4 sm:$0xff]  }
 0x37d   :  { %3801 = vmatprep.mubr.bf16.mxu0 %v9717_v15  ;;  %4187 = vmatprep.mubr.bf16.mxu1 %v9717_v15  ;;  %v8838_v15 = vld [vmem:[#allocation10 + $0x1e0] ss:$16 sps:$4 sm:$0xff]  }
 0x37e   :  { %5285 = vmatpush1.bf16.msra.mxu0 %v8820_v34  ;;  %5671 = vmatpush1.bf16.msra.mxu1 %v8823_v33 }
 0x37f   :  { %5286 = vmatprep.subr.bf16.mxu0 %v8828_v6  ;;  %5672 = vmatprep.subr.bf16.mxu1 %v8831_v2 }
 0x382   :  { %5287 = vmatpush1.bf16.msra.mxu0 %v8826_v29  ;;  %5673 = vmatpush1.bf16.msra.mxu1 %v8829_v37 }
 0x383   :  { %5288 = vmatprep.subr.bf16.mxu0 %v8834_v56  ;;  %5674 = vmatprep.subr.bf16.mxu1 %v8837_v12 }
 0x384   :  { %3802 = vmatmul.mubr.bf16.gmra.mrb[156].mxu0 %v9715_v16  ;;  %4188 = vmatmul.mubr.bf16.gmra.mrb[156].mxu1 %v9715_v16  ;;  %v8843_v16 = vld [vmem:[#allocation10 + $0x1ec] ss:$16 sps:$4 sm:$0xff]  }
 0x385   :  { %3811 = vmatprep.mubr.bf16.mxu0 %v9729_v3  ;;  %4197 = vmatprep.mubr.bf16.mxu1 %v9729_v3  ;;  %v8846_v3 = vld [vmem:[#allocation10 + $0x204] ss:$16 sps:$4 sm:$0xff]  }
 0x386   :  { %5289 = vmatpush1.bf16.msra.mxu0 %v8832_v57  ;;  %5675 = vmatpush1.bf16.msra.mxu1 %v8835_v43  ;;  %v8850_v43 = vld [vmem:[#allocation10 + $0x220] ss:$16 sps:$4 sm:$0xff]  }
 0x387   :  { %5290 = vmatprep.subr.bf16.mxu0 %v8840_v0  ;;  %5676 = vmatprep.subr.bf16.mxu1 %v8843_v16  ;;  %v8853_v0 = vld [vmem:[#allocation10 + $0x228] ss:$16 sps:$4 sm:$0xff]   ;;  %v8858_v16 = vld [vmem:[#allocation10 + $0x244] ss:$16 sps:$4 sm:$0xff]  }
 0x38a   :  { %5291 = vmatpush1.bf16.msra.mxu0 %v8838_v15 }
 0x38b   :  { %5453 = vmatprep.subr.bf16.mxu0 %v8846_v3 }
 0x38c   :  { %3812 = vmatmul.mubr.bf16.gmra.mrb[160].mxu0 %v9727_v46  ;;  %4198 = vmatmul.mubr.bf16.gmra.mrb[160].mxu1 %v9727_v46  ;;  %v8841_v46 = vld [vmem:[#allocation10 + $0x1e8] ss:$16 sps:$4 sm:$0xff]  }
 0x38d   :  { %3821 = vmatprep.mubr.bf16.mxu0 %v9741_v44  ;;  %4207 = vmatprep.mubr.bf16.mxu1 %v9741_v44  ;;  %v2844_v44 = vld [vmem:[%s10351_s6] sm:$0xf] }
 0x38e   :  { %5677 = vmatpush1.bf16.msra.mxu1 %v8841_v46 }
 0x394   :  { %3822 = vmatmul.mubr.bf16.gmra.mrb[164].mxu0 %v9739_v35  ;;  %4208 = vmatmul.mubr.bf16.gmra.mrb[164].mxu1 %v9739_v35  ;;  %v8849_v35 = vld [vmem:[#allocation10 + $0x20c] ss:$16 sps:$4 sm:$0xff]  }
 0x395   :  { %3831 = vmatprep.mubr.bf16.mxu0 %v9753_v18  ;;  %4217 = vmatprep.mubr.bf16.mxu1 %v9753_v18  ;;  %v9886_v18 = vrot.slane %v2844_v44, %v9347_v48 }
 0x396   :  { %5839 = vmatprep.subr.bf16.mxu1 %v8849_v35 }
 0x39c   :  { %3832 = vmatmul.mubr.bf16.gmra.mrb[168].mxu0 %v9751_v38  ;;  %4218 = vmatmul.mubr.bf16.gmra.mrb[168].mxu1 %v9751_v38  ;;  %v9883_v38 = vrot.slane %v2844_v44, %v9329_v23 }
 0x39d   :  { %3841 = vmatprep.mubr.bf16.mxu0 %v9765_v24  ;;  %4227 = vmatprep.mubr.bf16.mxu1 %v9765_v24  ;;  %v9892_v24 = vrot.slane %v2844_v44, %v9350_v51 }
 0x3a4   :  { %3842 = vmatmul.mubr.bf16.gmra.mrb[172].mxu0 %v9763_v40  ;;  %4228 = vmatmul.mubr.bf16.gmra.mrb[172].mxu1 %v9763_v40  ;;  %v9889_v40 = vrot.slane %v2844_v44, %v9334_v25  ;;  %v8861_v44 = vld [vmem:[#allocation10 + $0x24c] ss:$16 sps:$4 sm:$0xff]  }
 0x3a5   :  { %3851 = vmatprep.mubr.bf16.mxu0 %v9777_v22  ;;  %4237 = vmatprep.mubr.bf16.mxu1 %v9777_v22 }
 0x3ac   :  { %3852 = vmatmul.mubr.bf16.gmra.mrb[176].mxu0 %v9775_v11  ;;  %4238 = vmatmul.mubr.bf16.gmra.mrb[176].mxu1 %v9775_v11 }
 0x3ad   :  { %3861 = vmatprep.mubr.bf16.mxu0 %v9789_v7  ;;  %4247 = vmatprep.mubr.bf16.mxu1 %v9789_v7 }
 0x3b4   :  { %3862 = vmatmul.mubr.bf16.gmra.mrb[180].mxu0 %v9787_v63  ;;  %4248 = vmatmul.mubr.bf16.gmra.mrb[180].mxu1 %v9787_v63 }
 0x3b5   :  { %3871 = vmatprep.mubr.bf16.mxu0 %v9801_v13  ;;  %4257 = vmatprep.mubr.bf16.mxu1 %v9801_v13 }
 0x3bc   :  { %3872 = vmatmul.mubr.bf16.gmra.mrb[184].mxu0 %v9799_v49  ;;  %4258 = vmatmul.mubr.bf16.gmra.mrb[184].mxu1 %v9799_v49 }
 0x3bd   :  { %3881 = vmatprep.mubr.bf16.mxu0 %v9813_v10  ;;  %4267 = vmatprep.mubr.bf16.mxu1 %v9813_v10 }
 0x3c4   :  { %3882 = vmatmul.mubr.bf16.gmra.mrb[188].mxu0 %v9811_v30  ;;  %4268 = vmatmul.mubr.bf16.gmra.mrb[188].mxu1 %v9811_v30 }
 0x41f   :  { %v3733_v11 = vpop.f32.mrb[128].mxu0  ;;  %v4119_v22 = vpop.f32.mrb[128].mxu1 }
 0x420   :  { %v7662_v63 = vadd.f32 %v3733_v11, %v9883_v38  ;;  %v7726_v7 = vadd.f32 %v4119_v22, %v9886_v18  ;;  %v3735_v49 = vpop.f32.mrb[129].mxu0  ;;  %v4121_v13 = vpop.f32.mrb[129].mxu1 }
 0x421   :  { %v7663_v30 = vadd.f32 %v3735_v49, %v9889_v40  ;;  %v7727_v10 = vadd.f32 %v4121_v13, %v9892_v24  ;;  %v3737_v26 = vpop.f32.mrb[130].mxu0  ;;  %v4123_v14 = vpop.f32.mrb[130].mxu1 }
 0x422   :  { %v7664_v61 = vadd.f32 %v3737_v26, %v9883_v38  ;;  %v7728_v31 = vadd.f32 %v4123_v14, %v9886_v18  ;;  %v3739_v42 = vpop.f32.mrb[131].mxu0  ;;  %v4125_v45 = vpop.f32.mrb[131].mxu1  ;;  %v4278_v17 = vmax.f32 %v7662_v63, 0.0  ;;  %v4280_v47 = vmax.f32 %v7726_v7, 0.0 }
 0x423   :  { %v7665_v27 = vadd.f32 %v3739_v42, %v9889_v40  ;;  %v7729_v39 = vadd.f32 %v4125_v45, %v9892_v24  ;;  %v4279_v53 = vmax.f32 %v7663_v30, 0.0  ;;  %v4281_v54 = vmax.f32 %v7727_v10, 0.0 }
 0x424   :  { %v4282_v62 = vmax.f32 %v7664_v61, 0.0  ;;  %v4284_v8 = vmax.f32 %v7728_v31, 0.0  ;;  %v8856_v61 = vld [vmem:[#allocation10 + $0x240] ss:$16 sps:$4 sm:$0xff]   ;;  %v8859_v31 = vld [vmem:[#allocation10 + $0x248] ss:$16 sps:$4 sm:$0xff]  }
 0x425   :  { %v4283_v55 = vmax.f32 %v7665_v27, 0.0  ;;  %v4285_v58 = vmax.f32 %v7729_v39, 0.0 }
 0x426   :  { %v4406_v4 = vpack.c.bf16 %v4282_v62, %v4278_v17  ;;  %v9902_v36 = vpack.c.bf16 %v4284_v8, %v4280_v47  ;;  %v8864_v17 = vld [vmem:[#allocation10 + $0x264] ss:$16 sps:$4 sm:$0xff]   ;;  %v8867_v47 = vld [vmem:[#allocation10 + $0x26c] ss:$16 sps:$4 sm:$0xff]  }
 0x427   :  { %v4407_v41 = vpack.c.bf16 %v4283_v55, %v4279_v53  ;;  %v9904_v52 = vpack.c.bf16 %v4285_v58, %v4281_v54  ;;  %v3743_v19 = vpop.f32.mrb[132].mxu0  ;;  %v4129_v28 = vpop.f32.mrb[132].mxu1 }
 0x428   :  { %v7666_v1 = vadd.f32 %v3743_v19, %v9883_v38  ;;  %v7730_v9 = vadd.f32 %v4129_v28, %v9886_v18  ;;  %v3745_v5 = vpop.f32.mrb[133].mxu0  ;;  %v4131_v50 = vpop.f32.mrb[133].mxu1 }
 0x429   :  { %v7667_v21 = vadd.f32 %v3745_v5, %v9889_v40  ;;  %v7731_v34 = vadd.f32 %v4131_v50, %v9892_v24  ;;  %v3747_v33 = vpop.f32.mrb[134].mxu0  ;;  %v4133_v6 = vpop.f32.mrb[134].mxu1  ;;  %5292 = vmatprep.mubr.bf16.mxu0 %v4407_v41  ;;  %5678 = vmatprep.mubr.bf16.mxu1 %v4407_v41 }
 0x42a   :  { %v7668_v2 = vadd.f32 %v3747_v33, %v9883_v38  ;;  %v7732_v29 = vadd.f32 %v4133_v6, %v9886_v18  ;;  %v3749_v37 = vpop.f32.mrb[135].mxu0  ;;  %v4135_v56 = vpop.f32.mrb[135].mxu1  ;;  %5293 = vmatmul.mubr.bf16.vlgmr.msra.gmra.mrb[192].mxu0 %v4406_v4  ;;  %5679 = vmatmul.mubr.bf16.vlgmr.msra.gmra.mrb[192].mxu1 %v4406_v4  ;;  %v4286_v15 = vmax.f32 %v7666_v1, 0.0  ;;  %v4288_v46 = vmax.f32 %v7730_v9, 0.0  ;;  %v8870_v1 = vld [vmem:[#allocation10 + $0x284] ss:$16 sps:$4 sm:$0xff]  }
 0x42b   :  { %v7669_v12 = vadd.f32 %v3749_v37, %v9889_v40  ;;  %v7733_v57 = vadd.f32 %v4135_v56, %v9892_v24  ;;  %5454 = vmatpush1.bf16.msra.mxu0 %v8844_v60  ;;  %5840 = vmatpush1.bf16.msra.mxu1 %v8847_v59  ;;  %v4287_v11 = vmax.f32 %v7667_v21, 0.0  ;;  %v4289_v22 = vmax.f32 %v7731_v34, 0.0  ;;  %v8862_v60 = vld [vmem:[#allocation10 + $0x260] ss:$16 sps:$4 sm:$0xff]   ;;  %v8865_v59 = vld [vmem:[#allocation10 + $0x268] ss:$16 sps:$4 sm:$0xff]  }
 0x42c   :  { %v4290_v3 = vmax.f32 %v7668_v2, 0.0  ;;  %v4292_v35 = vmax.f32 %v7732_v29, 0.0  ;;  %5455 = vmatprep.subr.bf16.mxu0 %v8852_v20  ;;  %5841 = vmatprep.subr.bf16.mxu1 %v8855_v32  ;;  %v8873_v32 = vld [vmem:[#allocation10 + $0x28c] ss:$16 sps:$4 sm:$0xff]  }
 0x42d   :  { %v4291_v63 = vmax.f32 %v7669_v12, 0.0  ;;  %v4293_v7 = vmax.f32 %v7733_v57, 0.0 }
 0x42e   :  { %v4410_v49 = vpack.c.bf16 %v4290_v3, %v4286_v15  ;;  %v9914_v13 = vpack.c.bf16 %v4292_v35, %v4288_v46  ;;  %v8876_v35 = vld [vmem:[#allocation10 + $0x2a4] ss:$16 sps:$4 sm:$0xff]  }
 0x42f   :  { %v4411_v30 = vpack.c.bf16 %v4291_v63, %v4287_v11  ;;  %v9916_v10 = vpack.c.bf16 %v4293_v7, %v4289_v22  ;;  %v3753_v26 = vpop.f32.mrb[136].mxu0  ;;  %v4139_v14 = vpop.f32.mrb[136].mxu1  ;;  %5456 = vmatpush1.bf16.msra.mxu0 %v8850_v43  ;;  %5842 = vmatpush1.bf16.msra.mxu1 %v8853_v0  ;;  %v8868_v43 = vld [vmem:[#allocation10 + $0x280] ss:$16 sps:$4 sm:$0xff]   ;;  %v8871_v0 = vld [vmem:[#allocation10 + $0x288] ss:$16 sps:$4 sm:$0xff]  }
 0x430   :  { %v7670_v42 = vadd.f32 %v3753_v26, %v9883_v38  ;;  %v7734_v45 = vadd.f32 %v4139_v14, %v9886_v18  ;;  %v3755_v27 = vpop.f32.mrb[137].mxu0  ;;  %v4141_v39 = vpop.f32.mrb[137].mxu1  ;;  %5457 = vmatprep.subr.bf16.mxu0 %v8858_v16  ;;  %5843 = vmatprep.subr.bf16.mxu1 %v8861_v44  ;;  %v8879_v44 = vld [vmem:[#allocation10 + $0x2ac] ss:$16 sps:$4 sm:$0xff]  }
 0x431   :  { %v7671_v62 = vadd.f32 %v3755_v27, %v9889_v40  ;;  %v7735_v8 = vadd.f32 %v4141_v39, %v9892_v24  ;;  %v3757_v53 = vpop.f32.mrb[138].mxu0  ;;  %v4143_v54 = vpop.f32.mrb[138].mxu1  ;;  %5302 = vmatprep.mubr.bf16.mxu0 %v4411_v30  ;;  %5688 = vmatprep.mubr.bf16.mxu1 %v4411_v30  ;;  %v8882_v27 = vld [vmem:[#allocation10 + $0x2c4] ss:$16 sps:$4 sm:$0xff]  }
 0x432   :  { %v7672_v55 = vadd.f32 %v3757_v53, %v9883_v38  ;;  %v7736_v58 = vadd.f32 %v4143_v54, %v9886_v18  ;;  %v3759_v4 = vpop.f32.mrb[139].mxu0  ;;  %v4145_v41 = vpop.f32.mrb[139].mxu1  ;;  %5303 = vmatmul.mubr.bf16.gmra.mrb[196].mxu0 %v4410_v49  ;;  %5689 = vmatmul.mubr.bf16.gmra.mrb[196].mxu1 %v4410_v49  ;;  %v4294_v9 = vmax.f32 %v7670_v42, 0.0  ;;  %v4296_v5 = vmax.f32 %v7734_v45, 0.0  ;;  %v8874_v42 = vld [vmem:[#allocation10 + $0x2a0] ss:$16 sps:$4 sm:$0xff]  }
 0x433   :  { %v7673_v19 = vadd.f32 %v3759_v4, %v9889_v40  ;;  %v7737_v28 = vadd.f32 %v4145_v41, %v9892_v24  ;;  %5458 = vmatpush1.bf16.msra.mxu0 %v8856_v61  ;;  %5844 = vmatpush1.bf16.msra.mxu1 %v8859_v31  ;;  %v4295_v21 = vmax.f32 %v7671_v62, 0.0  ;;  %v4297_v34 = vmax.f32 %v7735_v8, 0.0  ;;  %v8877_v45 = vld [vmem:[#allocation10 + $0x2a8] ss:$16 sps:$4 sm:$0xff]   ;;  %v8885_v8 = vld [vmem:[#allocation10 + $0x2cc] ss:$16 sps:$4 sm:$0xff]  }
 0x434   :  { %v4298_v50 = vmax.f32 %v7672_v55, 0.0  ;;  %v4300_v20 = vmax.f32 %v7736_v58, 0.0  ;;  %5459 = vmatprep.subr.bf16.mxu0 %v8864_v17  ;;  %5845 = vmatprep.subr.bf16.mxu1 %v8867_v47 }
 0x435   :  { %v4299_v33 = vmax.f32 %v7673_v19, 0.0  ;;  %v4301_v6 = vmax.f32 %v7737_v28, 0.0 }
 0x436   :  { %v4414_v2 = vpack.c.bf16 %v4298_v50, %v4294_v9  ;;  %v9926_v29 = vpack.c.bf16 %v4300_v20, %v4296_v5  ;;  %v8883_v9 = vld [vmem:[#allocation10 + $0x2c8] ss:$16 sps:$4 sm:$0xff]  }
 0x437   :  { %v4415_v37 = vpack.c.bf16 %v4299_v33, %v4295_v21  ;;  %v9928_v56 = vpack.c.bf16 %v4301_v6, %v4297_v34  ;;  %v3763_v12 = vpop.f32.mrb[140].mxu0  ;;  %v4149_v57 = vpop.f32.mrb[140].mxu1  ;;  %5460 = vmatpush1.bf16.msra.mxu0 %v8862_v60  ;;  %5846 = vmatpush1.bf16.msra.mxu1 %v8865_v59  ;;  %v8888_v21 = vld [vmem:[#allocation10 + $0x2e4] ss:$16 sps:$4 sm:$0xff]   ;;  %v8891_v34 = vld [vmem:[#allocation10 + $0x2ec] ss:$16 sps:$4 sm:$0xff]  }
 0x438   :  { %v7674_v16 = vadd.f32 %v3763_v12, %v9883_v38  ;;  %v7738_v15 = vadd.f32 %v4149_v57, %v9886_v18  ;;  %v3765_v46 = vpop.f32.mrb[141].mxu0  ;;  %v4151_v3 = vpop.f32.mrb[141].mxu1  ;;  %5461 = vmatprep.subr.bf16.mxu0 %v8870_v1  ;;  %5847 = vmatprep.subr.bf16.mxu1 %v8873_v32  ;;  %v8880_v1 = vld [vmem:[#allocation10 + $0x2c0] ss:$16 sps:$4 sm:$0xff]  }
 0x439   :  { %v7675_v11 = vadd.f32 %v3765_v46, %v9889_v40  ;;  %v7739_v22 = vadd.f32 %v4151_v3, %v9892_v24  ;;  %v3767_v63 = vpop.f32.mrb[142].mxu0  ;;  %v4153_v7 = vpop.f32.mrb[142].mxu1  ;;  %5312 = vmatprep.mubr.bf16.mxu0 %v4415_v37  ;;  %5698 = vmatprep.mubr.bf16.mxu1 %v4415_v37  ;;  %v8886_v46 = vld [vmem:[#allocation10 + $0x2e0] ss:$16 sps:$4 sm:$0xff]   ;;  %v8889_v3 = vld [vmem:[#allocation10 + $0x2e8] ss:$16 sps:$4 sm:$0xff]  }
 0x43a   :  { %v7676_v49 = vadd.f32 %v3767_v63, %v9883_v38  ;;  %v7740_v30 = vadd.f32 %v4153_v7, %v9886_v18  ;;  %v3769_v26 = vpop.f32.mrb[143].mxu0  ;;  %v4155_v14 = vpop.f32.mrb[143].mxu1  ;;  %5313 = vmatmul.mubr.bf16.gmra.mrb[200].mxu0 %v4414_v2  ;;  %5699 = vmatmul.mubr.bf16.gmra.mrb[200].mxu1 %v4414_v2  ;;  %v4302_v39 = vmax.f32 %v7674_v16, 0.0  ;;  %v4304_v17 = vmax.f32 %v7738_v15, 0.0  ;;  %v8897_v7 = vld [vmem:[#allocation10 + $0x30c] ss:$16 sps:$4 sm:$0xff]  }
 0x43b   :  { %v7677_v61 = vadd.f32 %v3769_v26, %v9889_v40  ;;  %v7741_v31 = vadd.f32 %v4155_v14, %v9892_v24  ;;  %5462 = vmatpush1.bf16.msra.mxu0 %v8868_v43  ;;  %5848 = vmatpush1.bf16.msra.mxu1 %v8871_v0  ;;  %v4303_v53 = vmax.f32 %v7675_v11, 0.0  ;;  %v4305_v54 = vmax.f32 %v7739_v22, 0.0 }
 0x43c   :  { %v4306_v47 = vmax.f32 %v7676_v49, 0.0  ;;  %v4308_v62 = vmax.f32 %v7740_v30, 0.0  ;;  %5463 = vmatprep.subr.bf16.mxu0 %v8876_v35  ;;  %5849 = vmatprep.subr.bf16.mxu1 %v8879_v44  ;;  %v8894_v35 = vld [vmem:[#allocation10 + $0x304] ss:$16 sps:$4 sm:$0xff]  }
 0x43d   :  { %v4307_v55 = vmax.f32 %v7677_v61, 0.0  ;;  %v4309_v58 = vmax.f32 %v7741_v31, 0.0 }
 0x43e   :  { %v4418_v4 = vpack.c.bf16 %v4306_v47, %v4302_v39  ;;  %v9938_v41 = vpack.c.bf16 %v4308_v62, %v4304_v17  ;;  %v8892_v17 = vld [vmem:[#allocation10 + $0x300] ss:$16 sps:$4 sm:$0xff]   ;;  %v8895_v47 = vld [vmem:[#allocation10 + $0x308] ss:$16 sps:$4 sm:$0xff]  }
 0x43f   :  { %v4419_v19 = vpack.c.bf16 %v4307_v55, %v4303_v53  ;;  %v9940_v28 = vpack.c.bf16 %v4309_v58, %v4305_v54  ;;  %v3773_v60 = vpop.f32.mrb[144].mxu0  ;;  %v4159_v59 = vpop.f32.mrb[144].mxu1  ;;  %5464 = vmatpush1.bf16.msra.mxu0 %v8874_v42  ;;  %5850 = vmatpush1.bf16.msra.mxu1 %v8877_v45  ;;  %v8900_v55 = vld [vmem:[#allocation10 + $0x324] ss:$16 sps:$4 sm:$0xff]   ;;  %v8903_v58 = vld [vmem:[#allocation10 + $0x32c] ss:$16 sps:$4 sm:$0xff]  }
 0x440   :  { %v7678_v5 = vadd.f32 %v3773_v60, %v9883_v38  ;;  %v7742_v50 = vadd.f32 %v4159_v59, %v9886_v18  ;;  %v3775_v20 = vpop.f32.mrb[145].mxu0  ;;  %v4161_v32 = vpop.f32.mrb[145].mxu1  ;;  %5465 = vmatprep.subr.bf16.mxu0 %v8882_v27  ;;  %5851 = vmatprep.subr.bf16.mxu1 %v8885_v8 }
 0x441   :  { %v7679_v33 = vadd.f32 %v3775_v20, %v9889_v40  ;;  %v7743_v6 = vadd.f32 %v4161_v32, %v9892_v24  ;;  %v3777_v2 = vpop.f32.mrb[146].mxu0  ;;  %v4163_v37 = vpop.f32.mrb[146].mxu1  ;;  %5322 = vmatprep.mubr.bf16.mxu0 %v4419_v19  ;;  %5708 = vmatprep.mubr.bf16.mxu1 %v4419_v19 }
 0x442   :  { %v7680_v12 = vadd.f32 %v3777_v2, %v9883_v38  ;;  %v7744_v57 = vadd.f32 %v4163_v37, %v9886_v18  ;;  %v3779_v43 = vpop.f32.mrb[147].mxu0  ;;  %v4165_v0 = vpop.f32.mrb[147].mxu1  ;;  %5323 = vmatmul.mubr.bf16.gmra.mrb[204].mxu0 %v4418_v4  ;;  %5709 = vmatmul.mubr.bf16.gmra.mrb[204].mxu1 %v4418_v4  ;;  %v4310_v44 = vmax.f32 %v7678_v5, 0.0  ;;  %v4312_v11 = vmax.f32 %v7742_v50, 0.0 }
 0x443   :  { %v7681_v16 = vadd.f32 %v3779_v43, %v9889_v40  ;;  %v7745_v15 = vadd.f32 %v4165_v0, %v9892_v24  ;;  %5466 = vmatpush1.bf16.msra.mxu0 %v8880_v1  ;;  %5852 = vmatpush1.bf16.msra.mxu1 %v8883_v9  ;;  %v4311_v49 = vmax.f32 %v7679_v33, 0.0  ;;  %v4313_v30 = vmax.f32 %v7743_v6, 0.0  ;;  %v8906_v33 = vld [vmem:[#allocation10 + $0x344] ss:$16 sps:$4 sm:$0xff]  }
 0x444   :  { %v4314_v22 = vmax.f32 %v7680_v12, 0.0  ;;  %v4316_v63 = vmax.f32 %v7744_v57, 0.0  ;;  %5467 = vmatprep.subr.bf16.mxu0 %v8888_v21  ;;  %5853 = vmatprep.subr.bf16.mxu1 %v8891_v34  ;;  %v8898_v21 = vld [vmem:[#allocation10 + $0x320] ss:$16 sps:$4 sm:$0xff]   ;;  %v8901_v34 = vld [vmem:[#allocation10 + $0x328] ss:$16 sps:$4 sm:$0xff]  }
 0x445   :  { %v4315_v26 = vmax.f32 %v7681_v16, 0.0  ;;  %v4317_v14 = vmax.f32 %v7745_v15, 0.0  ;;  %v8909_v57 = vld [vmem:[#allocation10 + $0x34c] ss:$16 sps:$4 sm:$0xff]  }
 0x446   :  { %v4422_v61 = vpack.c.bf16 %v4314_v22, %v4310_v44  ;;  %v9950_v31 = vpack.c.bf16 %v4316_v63, %v4312_v11  ;;  %v8904_v63 = vld [vmem:[#allocation10 + $0x340] ss:$16 sps:$4 sm:$0xff]  }
 0x447   :  { %v4423_v42 = vpack.c.bf16 %v4315_v26, %v4311_v49  ;;  %v9952_v45 = vpack.c.bf16 %v4317_v14, %v4313_v30  ;;  %v3783_v27 = vpop.f32.mrb[148].mxu0  ;;  %v4169_v39 = vpop.f32.mrb[148].mxu1  ;;  %5468 = vmatpush1.bf16.msra.mxu0 %v8886_v46  ;;  %5854 = vmatpush1.bf16.msra.mxu1 %v8889_v3 }
 0x448   :  { %v7682_v62 = vadd.f32 %v3783_v27, %v9883_v38  ;;  %v7746_v8 = vadd.f32 %v4169_v39, %v9886_v18  ;;  %v3785_v53 = vpop.f32.mrb[149].mxu0  ;;  %v4171_v54 = vpop.f32.mrb[149].mxu1  ;;  %5469 = vmatprep.subr.bf16.mxu0 %v8894_v35  ;;  %5855 = vmatprep.subr.bf16.mxu1 %v8897_v7  ;;  %v8907_v7 = vld [vmem:[#allocation10 + $0x348] ss:$16 sps:$4 sm:$0xff]  }
 0x449   :  { %v7683_v4 = vadd.f32 %v3785_v53, %v9889_v40  ;;  %v7747_v19 = vadd.f32 %v4171_v54, %v9892_v24  ;;  %v3787_v60 = vpop.f32.mrb[150].mxu0  ;;  %v4173_v59 = vpop.f32.mrb[150].mxu1  ;;  %5332 = vmatprep.mubr.bf16.mxu0 %v4423_v42  ;;  %5718 = vmatprep.mubr.bf16.mxu1 %v4423_v42  ;;  %v8915_v42 = vld [vmem:[#allocation10 + $0x36c] ss:$16 sps:$4 sm:$0xff]  }
 0x44a   :  { %v7684_v1 = vadd.f32 %v3787_v60, %v9883_v38  ;;  %v7748_v9 = vadd.f32 %v4173_v59, %v9886_v18  ;;  %v3789_v5 = vpop.f32.mrb[151].mxu0  ;;  %v4175_v50 = vpop.f32.mrb[151].mxu1  ;;  %5333 = vmatmul.mubr.bf16.gmra.mrb[208].mxu0 %v4422_v61  ;;  %5719 = vmatmul.mubr.bf16.gmra.mrb[208].mxu1 %v4422_v61  ;;  %v4318_v6 = vmax.f32 %v7682_v62, 0.0  ;;  %v4320_v2 = vmax.f32 %v7746_v8, 0.0  ;;  %v8912_v61 = vld [vmem:[#allocation10 + $0x364] ss:$16 sps:$4 sm:$0xff]  }
 0x44b   :  { %v7685_v20 = vadd.f32 %v3789_v5, %v9889_v40  ;;  %v7749_v32 = vadd.f32 %v4175_v50, %v9892_v24  ;;  %5470 = vmatpush1.bf16.msra.mxu0 %v8892_v17  ;;  %5856 = vmatpush1.bf16.msra.mxu1 %v8895_v47  ;;  %v4319_v43 = vmax.f32 %v7683_v4, 0.0  ;;  %v4321_v0 = vmax.f32 %v7747_v19, 0.0  ;;  %v8910_v4 = vld [vmem:[#allocation10 + $0x360] ss:$16 sps:$4 sm:$0xff]   ;;  %v8913_v19 = vld [vmem:[#allocation10 + $0x368] ss:$16 sps:$4 sm:$0xff]  }
 0x44c   :  { %v4322_v37 = vmax.f32 %v7684_v1, 0.0  ;;  %v4324_v12 = vmax.f32 %v7748_v9, 0.0  ;;  %5471 = vmatprep.subr.bf16.mxu0 %v8900_v55  ;;  %5857 = vmatprep.subr.bf16.mxu1 %v8903_v58  ;;  %v8918_v60 = vld [vmem:[#allocation10 + $0x384] ss:$16 sps:$4 sm:$0xff]   ;;  %v8921_v50 = vld [vmem:[#allocation10 + $0x38c] ss:$16 sps:$4 sm:$0xff]  }
 0x44d   :  { %v4323_v16 = vmax.f32 %v7685_v20, 0.0  ;;  %v4325_v15 = vmax.f32 %v7749_v32, 0.0 }
 0x44e   :  { %v4426_v46 = vpack.c.bf16 %v4322_v37, %v4318_v6  ;;  %v9962_v3 = vpack.c.bf16 %v4324_v12, %v4320_v2 }
 0x44f   :  { %v4427_v35 = vpack.c.bf16 %v4323_v16, %v4319_v43  ;;  %v9964_v44 = vpack.c.bf16 %v4325_v15, %v4321_v0  ;;  %v3793_v11 = vpop.f32.mrb[152].mxu0  ;;  %v4179_v22 = vpop.f32.mrb[152].mxu1  ;;  %5472 = vmatpush1.bf16.msra.mxu0 %v8898_v21  ;;  %5858 = vmatpush1.bf16.msra.mxu1 %v8901_v34  ;;  %v8916_v43 = vld [vmem:[#allocation10 + $0x380] ss:$16 sps:$4 sm:$0xff]   ;;  %v8919_v0 = vld [vmem:[#allocation10 + $0x388] ss:$16 sps:$4 sm:$0xff]  }
 0x450   :  { %v7686_v49 = vadd.f32 %v3793_v11, %v9883_v38  ;;  %v7750_v30 = vadd.f32 %v4179_v22, %v9886_v18  ;;  %v3795_v26 = vpop.f32.mrb[153].mxu0  ;;  %v4181_v14 = vpop.f32.mrb[153].mxu1  ;;  %5473 = vmatprep.subr.bf16.mxu0 %v8906_v33  ;;  %5859 = vmatprep.subr.bf16.mxu1 %v8909_v57  ;;  %v8924_v11 = vld [vmem:[#allocation10 + $0x3a4] ss:$16 sps:$4 sm:$0xff]   ;;  %v8927_v22 = vld [vmem:[#allocation10 + $0x3ac] ss:$16 sps:$4 sm:$0xff]  }
 0x451   :  { %v7687_v27 = vadd.f32 %v3795_v26, %v9889_v40  ;;  %v7751_v39 = vadd.f32 %v4181_v14, %v9892_v24  ;;  %v3797_v17 = vpop.f32.mrb[154].mxu0  ;;  %v4183_v47 = vpop.f32.mrb[154].mxu1  ;;  %5342 = vmatprep.mubr.bf16.mxu0 %v4427_v35  ;;  %5728 = vmatprep.mubr.bf16.mxu1 %v4427_v35 }
 0x452   :  { %v7688_v62 = vadd.f32 %v3797_v17, %v9883_v38  ;;  %v7752_v8 = vadd.f32 %v4183_v47, %v9886_v18  ;;  %v3799_v53 = vpop.f32.mrb[155].mxu0  ;;  %v4185_v54 = vpop.f32.mrb[155].mxu1  ;;  %5343 = vmatmul.mubr.bf16.gmra.mrb[212].mxu0 %v4426_v46  ;;  %5729 = vmatmul.mubr.bf16.gmra.mrb[212].mxu1 %v4426_v46  ;;  %v4326_v59 = vmax.f32 %v7686_v49, 0.0  ;;  %v4328_v1 = vmax.f32 %v7750_v30, 0.0  ;;  %v8922_v17 = vld [vmem:[#allocation10 + $0x3a0] ss:$16 sps:$4 sm:$0xff]  }
 0x453   :  { %v7689_v55 = vadd.f32 %v3799_v53, %v9889_v40  ;;  %v7753_v58 = vadd.f32 %v4185_v54, %v9892_v24  ;;  %5474 = vmatpush1.bf16.msra.mxu0 %v8904_v63  ;;  %5860 = vmatpush1.bf16.msra.mxu1 %v8907_v7  ;;  %v4327_v20 = vmax.f32 %v7687_v27, 0.0  ;;  %v4329_v32 = vmax.f32 %v7751_v39, 0.0  ;;  %v8925_v47 = vld [vmem:[#allocation10 + $0x3a8] ss:$16 sps:$4 sm:$0xff]  }
 0x454   :  { %v4330_v9 = vmax.f32 %v7688_v62, 0.0  ;;  %v4332_v5 = vmax.f32 %v7752_v8, 0.0  ;;  %5475 = vmatprep.subr.bf16.mxu0 %v8912_v61  ;;  %5861 = vmatprep.subr.bf16.mxu1 %v8915_v42  ;;  %v8930_v62 = vld [vmem:[#allocation10 + $0x3c4] ss:$16 sps:$4 sm:$0xff]  }
 0x455   :  { %v4331_v21 = vmax.f32 %v7689_v55, 0.0  ;;  %v4333_v34 = vmax.f32 %v7753_v58, 0.0  ;;  %v8933_v58 = vld [vmem:[#allocation10 + $0x3cc] ss:$16 sps:$4 sm:$0xff]  }
 0x456   :  { %v4430_v33 = vpack.c.bf16 %v4330_v9, %v4326_v59  ;;  %v9974_v6 = vpack.c.bf16 %v4332_v5, %v4328_v1 }
 0x457   :  { %v4431_v2 = vpack.c.bf16 %v4331_v21, %v4327_v20  ;;  %v9976_v37 = vpack.c.bf16 %v4333_v34, %v4329_v32  ;;  %v3803_v12 = vpop.f32.mrb[156].mxu0  ;;  %v4189_v57 = vpop.f32.mrb[156].mxu1  ;;  %5476 = vmatpush1.bf16.msra.mxu0 %v8910_v4  ;;  %5862 = vmatpush1.bf16.msra.mxu1 %v8913_v19  ;;  %v8928_v21 = vld [vmem:[#allocation10 + $0x3c0] ss:$16 sps:$4 sm:$0xff]   ;;  %v8931_v34 = vld [vmem:[#allocation10 + $0x3c8] ss:$16 sps:$4 sm:$0xff]  }
 0x458   :  { %v7690_v16 = vadd.f32 %v3803_v12, %v9883_v38  ;;  %v7754_v15 = vadd.f32 %v4189_v57, %v9886_v18  ;;  %v3805_v46 = vpop.f32.mrb[157].mxu0  ;;  %v4191_v35 = vpop.f32.mrb[157].mxu1  ;;  %5477 = vmatprep.subr.bf16.mxu0 %v8918_v60  ;;  %5863 = vmatprep.subr.bf16.mxu1 %v8921_v50 }
 0x459   :  { %v7691_v63 = vadd.f32 %v3805_v46, %v9889_v40  ;;  %v7755_v7 = vadd.f32 %v4191_v35, %v9892_v24  ;;  %v3807_v49 = vpop.f32.mrb[158].mxu0  ;;  %v4193_v30 = vpop.f32.mrb[158].mxu1  ;;  %5352 = vmatprep.mubr.bf16.mxu0 %v4431_v2  ;;  %5738 = vmatprep.mubr.bf16.mxu1 %v4431_v2 }
 0x45a   :  { %v7692_v26 = vadd.f32 %v3807_v49, %v9883_v38  ;;  %v7756_v14 = vadd.f32 %v4193_v30, %v9886_v18  ;;  %v3809_v61 = vpop.f32.mrb[159].mxu0  ;;  %v4195_v42 = vpop.f32.mrb[159].mxu1  ;;  %5353 = vmatmul.mubr.bf16.gmra.mrb[216].mxu0 %v4430_v33  ;;  %5739 = vmatmul.mubr.bf16.gmra.mrb[216].mxu1 %v4430_v33  ;;  %v4334_v8 = vmax.f32 %v7690_v16, 0.0  ;;  %v4336_v53 = vmax.f32 %v7754_v15, 0.0 }
 0x45b   :  { %v7693_v27 = vadd.f32 %v3809_v61, %v9889_v40  ;;  %v7757_v39 = vadd.f32 %v4195_v42, %v9892_v24  ;;  %5478 = vmatpush1.bf16.msra.mxu0 %v8916_v43  ;;  %5864 = vmatpush1.bf16.msra.mxu1 %v8919_v0  ;;  %v4335_v4 = vmax.f32 %v7691_v63, 0.0  ;;  %v4337_v19 = vmax.f32 %v7755_v7, 0.0  ;;  %v8936_v43 = vld [vmem:[#allocation10 + $0x3e4] ss:$16 sps:$4 sm:$0xff]   ;;  %v8939_v0 = vld [vmem:[#allocation10 + $0x3ec] ss:$16 sps:$4 sm:$0xff]  }
 0x45c   :  { %v4338_v54 = vmax.f32 %v7692_v26, 0.0  ;;  %v4340_v55 = vmax.f32 %v7756_v14, 0.0  ;;  %5479 = vmatprep.subr.bf16.mxu0 %v8924_v11  ;;  %5865 = vmatprep.subr.bf16.mxu1 %v8927_v22  ;;  %v8934_v26 = vld [vmem:[#allocation10 + $0x3e0] ss:$16 sps:$4 sm:$0xff]   ;;  %v8937_v14 = vld [vmem:[#allocation10 + $0x3e8] ss:$16 sps:$4 sm:$0xff]  }
 0x45d   :  { %v4339_v60 = vmax.f32 %v7693_v27, 0.0  ;;  %v4341_v59 = vmax.f32 %v7757_v39, 0.0 }
 0x45e   :  { %v4434_v1 = vpack.c.bf16 %v4338_v54, %v4334_v8  ;;  %v9986_v9 = vpack.c.bf16 %v4340_v55, %v4336_v53 }
 0x45f   :  { %v4435_v5 = vpack.c.bf16 %v4339_v60, %v4335_v4  ;;  %v9988_v50 = vpack.c.bf16 %v4341_v59, %v4337_v19  ;;  %v3813_v20 = vpop.f32.mrb[160].mxu0  ;;  %v4199_v32 = vpop.f32.mrb[160].mxu1  ;;  %5480 = vmatpush1.bf16.msra.mxu0 %v8922_v17  ;;  %5866 = vmatpush1.bf16.msra.mxu1 %v8925_v47 }
 0x460   :  { %v7694_v33 = vadd.f32 %v3813_v20, %v9883_v38  ;;  %v7758_v2 = vadd.f32 %v4199_v32, %v9886_v18  ;;  %v3815_v12 = vpop.f32.mrb[161].mxu0  ;;  %v4201_v57 = vpop.f32.mrb[161].mxu1  ;;  %5481 = vmatprep.subr.bf16.mxu0 %v8930_v62  ;;  %5867 = vmatprep.subr.bf16.mxu1 %v8933_v58 }
 0x461   :  { %v7695_v16 = vadd.f32 %v3815_v12, %v9889_v40  ;;  %v7759_v15 = vadd.f32 %v4201_v57, %v9892_v24  ;;  %v3817_v46 = vpop.f32.mrb[162].mxu0  ;;  %v4203_v35 = vpop.f32.mrb[162].mxu1  ;;  %5362 = vmatprep.mubr.bf16.mxu0 %v4435_v5  ;;  %5748 = vmatprep.mubr.bf16.mxu1 %v4435_v5 }
 0x462   :  { %v7696_v11 = vadd.f32 %v3817_v46, %v9883_v38  ;;  %v7760_v22 = vadd.f32 %v4203_v35, %v9886_v18  ;;  %v3819_v63 = vpop.f32.mrb[163].mxu0  ;;  %v4205_v7 = vpop.f32.mrb[163].mxu1  ;;  %5363 = vmatmul.mubr.bf16.gmra.mrb[220].mxu0 %v4434_v1  ;;  %5749 = vmatmul.mubr.bf16.gmra.mrb[220].mxu1 %v4434_v1  ;;  %v4342_v61 = vmax.f32 %v7694_v33, 0.0  ;;  %v4344_v42 = vmax.f32 %v7758_v2, 0.0 }
 0x463   :  { %v7697_v49 = vadd.f32 %v3819_v63, %v9889_v40  ;;  %v7761_v30 = vadd.f32 %v4205_v7, %v9892_v24  ;;  %5482 = vmatpush1.bf16.msra.mxu0 %v8928_v21  ;;  %5868 = vmatpush1.bf16.msra.mxu1 %v8931_v34  ;;  %v4343_v17 = vmax.f32 %v7695_v16, 0.0  ;;  %v4345_v47 = vmax.f32 %v7759_v15, 0.0 }
 0x464   :  { %v4346_v27 = vmax.f32 %v7696_v11, 0.0  ;;  %v4348_v39 = vmax.f32 %v7760_v22, 0.0  ;;  %5483 = vmatprep.subr.bf16.mxu0 %v8936_v43  ;;  %5869 = vmatprep.subr.bf16.mxu1 %v8939_v0 }
 0x465   :  { %v4347_v62 = vmax.f32 %v7697_v49, 0.0  ;;  %v4349_v8 = vmax.f32 %v7761_v30, 0.0 }
 0x466   :  { %v4438_v53 = vpack.c.bf16 %v4346_v27, %v4342_v61  ;;  %v9998_v54 = vpack.c.bf16 %v4348_v39, %v4344_v42 }
 0x467   :  { %v4439_v55 = vpack.c.bf16 %v4347_v62, %v4343_v17  ;;  %v10000_v58 = vpack.c.bf16 %v4349_v8, %v4345_v47  ;;  %v3823_v4 = vpop.f32.mrb[164].mxu0  ;;  %v4209_v19 = vpop.f32.mrb[164].mxu1  ;;  %5484 = vmatpush1.bf16.msra.mxu0 %v8934_v26  ;;  %5870 = vmatpush1.bf16.msra.mxu1 %v8937_v14 }
 0x468   :  { %v7698_v60 = vadd.f32 %v3823_v4, %v9883_v38  ;;  %v7762_v59 = vadd.f32 %v4209_v19, %v9886_v18  ;;  %v3825_v1 = vpop.f32.mrb[165].mxu0  ;;  %v4211_v5 = vpop.f32.mrb[165].mxu1 }
 0x469   :  { %v7699_v20 = vadd.f32 %v3825_v1, %v9889_v40  ;;  %v7763_v32 = vadd.f32 %v4211_v5, %v9892_v24  ;;  %v3827_v21 = vpop.f32.mrb[166].mxu0  ;;  %v4213_v34 = vpop.f32.mrb[166].mxu1  ;;  %5372 = vmatprep.mubr.bf16.mxu0 %v4439_v55  ;;  %5758 = vmatprep.mubr.bf16.mxu1 %v4439_v55 }
 0x46a   :  { %v7700_v33 = vadd.f32 %v3827_v21, %v9883_v38  ;;  %v7764_v2 = vadd.f32 %v4213_v34, %v9886_v18  ;;  %v3829_v12 = vpop.f32.mrb[167].mxu0  ;;  %v4215_v57 = vpop.f32.mrb[167].mxu1  ;;  %5373 = vmatmul.mubr.bf16.gmra.mrb[224].mxu0 %v4438_v53  ;;  %5759 = vmatmul.mubr.bf16.gmra.mrb[224].mxu1 %v4438_v53  ;;  %v4350_v16 = vmax.f32 %v7698_v60, 0.0  ;;  %v4352_v15 = vmax.f32 %v7762_v59, 0.0 }
 0x46b   :  { %v7701_v43 = vadd.f32 %v3829_v12, %v9889_v40  ;;  %v7765_v0 = vadd.f32 %v4215_v57, %v9892_v24  ;;  %v4351_v11 = vmax.f32 %v7699_v20, 0.0  ;;  %v4353_v22 = vmax.f32 %v7763_v32, 0.0 }
 0x46c   :  { %v4354_v46 = vmax.f32 %v7700_v33, 0.0  ;;  %v4356_v35 = vmax.f32 %v7764_v2, 0.0 }
 0x46d   :  { %v4355_v63 = vmax.f32 %v7701_v43, 0.0  ;;  %v4357_v7 = vmax.f32 %v7765_v0, 0.0 }
 0x46e   :  { %v4442_v49 = vpack.c.bf16 %v4354_v46, %v4350_v16  ;;  %v10010_v30 = vpack.c.bf16 %v4356_v35, %v4352_v15 }
 0x46f   :  { %v4443_v26 = vpack.c.bf16 %v4355_v63, %v4351_v11  ;;  %v10012_v14 = vpack.c.bf16 %v4357_v7, %v4353_v22  ;;  %v3833_v61 = vpop.f32.mrb[168].mxu0  ;;  %v4219_v42 = vpop.f32.mrb[168].mxu1 }
 0x470   :  { %v7702_v27 = vadd.f32 %v3833_v61, %v9883_v38  ;;  %v7766_v39 = vadd.f32 %v4219_v42, %v9886_v18  ;;  %v3835_v17 = vpop.f32.mrb[169].mxu0  ;;  %v4221_v47 = vpop.f32.mrb[169].mxu1 }
 0x471   :  { %v7703_v62 = vadd.f32 %v3835_v17, %v9889_v40  ;;  %v7767_v8 = vadd.f32 %v4221_v47, %v9892_v24  ;;  %v3837_v53 = vpop.f32.mrb[170].mxu0  ;;  %v4223_v55 = vpop.f32.mrb[170].mxu1  ;;  %5382 = vmatprep.mubr.bf16.mxu0 %v4443_v26  ;;  %5768 = vmatprep.mubr.bf16.mxu1 %v4443_v26 }
 0x472   :  { %v7704_v4 = vadd.f32 %v3837_v53, %v9883_v38  ;;  %v7768_v19 = vadd.f32 %v4223_v55, %v9886_v18  ;;  %v3839_v60 = vpop.f32.mrb[171].mxu0  ;;  %v4225_v59 = vpop.f32.mrb[171].mxu1  ;;  %5383 = vmatmul.mubr.bf16.gmra.mrb[228].mxu0 %v4442_v49  ;;  %5769 = vmatmul.mubr.bf16.gmra.mrb[228].mxu1 %v4442_v49  ;;  %v4358_v20 = vmax.f32 %v7702_v27, 0.0  ;;  %v4360_v32 = vmax.f32 %v7766_v39, 0.0 }
 0x473   :  { %v7705_v1 = vadd.f32 %v3839_v60, %v9889_v40  ;;  %v7769_v5 = vadd.f32 %v4225_v59, %v9892_v24  ;;  %v4359_v33 = vmax.f32 %v7703_v62, 0.0  ;;  %v4361_v2 = vmax.f32 %v7767_v8, 0.0 }
 0x474   :  { %v4362_v21 = vmax.f32 %v7704_v4, 0.0  ;;  %v4364_v34 = vmax.f32 %v7768_v19, 0.0 }
 0x475   :  { %v4363_v12 = vmax.f32 %v7705_v1, 0.0  ;;  %v4365_v57 = vmax.f32 %v7769_v5, 0.0 }
 0x476   :  { %v4446_v43 = vpack.c.bf16 %v4362_v21, %v4358_v20  ;;  %v10022_v0 = vpack.c.bf16 %v4364_v34, %v4360_v32 }
 0x477   :  { %v4447_v16 = vpack.c.bf16 %v4363_v12, %v4359_v33  ;;  %v10024_v15 = vpack.c.bf16 %v4365_v57, %v4361_v2  ;;  %v3843_v46 = vpop.f32.mrb[172].mxu0  ;;  %v4229_v35 = vpop.f32.mrb[172].mxu1 }
 0x478   :  { %v7706_v11 = vadd.f32 %v3843_v46, %v9883_v38  ;;  %v7770_v22 = vadd.f32 %v4229_v35, %v9886_v18  ;;  %v3845_v63 = vpop.f32.mrb[173].mxu0  ;;  %v4231_v7 = vpop.f32.mrb[173].mxu1 }
 0x479   :  { %v7707_v49 = vadd.f32 %v3845_v63, %v9889_v40  ;;  %v7771_v26 = vadd.f32 %v4231_v7, %v9892_v24  ;;  %v3847_v61 = vpop.f32.mrb[174].mxu0  ;;  %v4233_v42 = vpop.f32.mrb[174].mxu1  ;;  %5392 = vmatprep.mubr.bf16.mxu0 %v4447_v16  ;;  %5778 = vmatprep.mubr.bf16.mxu1 %v4447_v16 }
 0x47a   :  { %v7708_v27 = vadd.f32 %v3847_v61, %v9883_v38  ;;  %v7772_v39 = vadd.f32 %v4233_v42, %v9886_v18  ;;  %v3849_v17 = vpop.f32.mrb[175].mxu0  ;;  %v4235_v47 = vpop.f32.mrb[175].mxu1  ;;  %5393 = vmatmul.mubr.bf16.gmra.mrb[232].mxu0 %v4446_v43  ;;  %5779 = vmatmul.mubr.bf16.gmra.mrb[232].mxu1 %v4446_v43  ;;  %v4366_v53 = vmax.f32 %v7706_v11, 0.0  ;;  %v4368_v55 = vmax.f32 %v7770_v22, 0.0 }
 0x47b   :  { %v7709_v62 = vadd.f32 %v3849_v17, %v9889_v40  ;;  %v7773_v8 = vadd.f32 %v4235_v47, %v9892_v24  ;;  %v4367_v60 = vmax.f32 %v7707_v49, 0.0  ;;  %v4369_v59 = vmax.f32 %v7771_v26, 0.0 }
 0x47c   :  { %v4370_v4 = vmax.f32 %v7708_v27, 0.0  ;;  %v4372_v19 = vmax.f32 %v7772_v39, 0.0  ;;  %v8940_v27 = vld [vmem:[#allocation11 + $0x40] sm:$0xff]  }
 0x47d   :  { %v4371_v1 = vmax.f32 %v7709_v62, 0.0  ;;  %v4373_v5 = vmax.f32 %v7773_v8, 0.0  ;;  %v8942_v39 = vld [vmem:[#allocation11 + $0xc0] sm:$0xff]   ;;  %7310 = vmatprep.subr.bf16.mxu0 %v8940_v27 }
 0x47e   :  { %v4450_v20 = vpack.c.bf16 %v4370_v4, %v4366_v53  ;;  %v10034_v32 = vpack.c.bf16 %v4372_v19, %v4368_v55  ;;  %7422 = vmatprep.subr.bf16.mxu1 %v8942_v39 }
 0x47f   :  { %v4451_v21 = vpack.c.bf16 %v4371_v1, %v4367_v60  ;;  %v10036_v34 = vpack.c.bf16 %v4373_v5, %v4369_v59  ;;  %v3853_v33 = vpop.f32.mrb[176].mxu0  ;;  %v4239_v2 = vpop.f32.mrb[176].mxu1 }
 0x480   :  { %v7710_v12 = vadd.f32 %v3853_v33, %v9883_v38  ;;  %v7774_v57 = vadd.f32 %v4239_v2, %v9886_v18  ;;  %v3855_v43 = vpop.f32.mrb[177].mxu0  ;;  %v4241_v16 = vpop.f32.mrb[177].mxu1 }
 0x481   :  { %v7711_v46 = vadd.f32 %v3855_v43, %v9889_v40  ;;  %v7775_v35 = vadd.f32 %v4241_v16, %v9892_v24  ;;  %v3857_v11 = vpop.f32.mrb[178].mxu0  ;;  %v4243_v22 = vpop.f32.mrb[178].mxu1  ;;  %5402 = vmatprep.mubr.bf16.mxu0 %v4451_v21  ;;  %5788 = vmatprep.mubr.bf16.mxu1 %v4451_v21 }
 0x482   :  { %v7712_v63 = vadd.f32 %v3857_v11, %v9883_v38  ;;  %v7776_v7 = vadd.f32 %v4243_v22, %v9886_v18  ;;  %v3859_v49 = vpop.f32.mrb[179].mxu0  ;;  %v4245_v26 = vpop.f32.mrb[179].mxu1  ;;  %5403 = vmatmul.mubr.bf16.gmra.mrb[236].mxu0 %v4450_v20  ;;  %5789 = vmatmul.mubr.bf16.gmra.mrb[236].mxu1 %v4450_v20  ;;  %v4374_v17 = vmax.f32 %v7710_v12, 0.0  ;;  %v4376_v47 = vmax.f32 %v7774_v57, 0.0 }
 0x483   :  { %v7713_v61 = vadd.f32 %v3859_v49, %v9889_v40  ;;  %v7777_v42 = vadd.f32 %v4245_v26, %v9892_v24  ;;  %v4375_v53 = vmax.f32 %v7711_v46, 0.0  ;;  %v4377_v55 = vmax.f32 %v7775_v35, 0.0 }
 0x484   :  { %v4378_v62 = vmax.f32 %v7712_v63, 0.0  ;;  %v4380_v8 = vmax.f32 %v7776_v7, 0.0 }
 0x485   :  { %v4379_v4 = vmax.f32 %v7713_v61, 0.0  ;;  %v4381_v19 = vmax.f32 %v7777_v42, 0.0 }
 0x486   :  { %v4454_v60 = vpack.c.bf16 %v4378_v62, %v4374_v17  ;;  %v10046_v59 = vpack.c.bf16 %v4380_v8, %v4376_v47 }
 0x487   :  { %v4455_v1 = vpack.c.bf16 %v4379_v4, %v4375_v53  ;;  %v10048_v5 = vpack.c.bf16 %v4381_v19, %v4377_v55  ;;  %v3863_v20 = vpop.f32.mrb[180].mxu0  ;;  %v4249_v21 = vpop.f32.mrb[180].mxu1 }
 0x488   :  { %v7714_v33 = vadd.f32 %v3863_v20, %v9883_v38  ;;  %v7778_v2 = vadd.f32 %v4249_v21, %v9886_v18  ;;  %v3865_v12 = vpop.f32.mrb[181].mxu0  ;;  %v4251_v57 = vpop.f32.mrb[181].mxu1 }
 0x489   :  { %v7715_v43 = vadd.f32 %v3865_v12, %v9889_v40  ;;  %v7779_v16 = vadd.f32 %v4251_v57, %v9892_v24  ;;  %v3867_v46 = vpop.f32.mrb[182].mxu0  ;;  %v4253_v35 = vpop.f32.mrb[182].mxu1  ;;  %5412 = vmatprep.mubr.bf16.mxu0 %v4455_v1  ;;  %5798 = vmatprep.mubr.bf16.mxu1 %v4455_v1 }
 0x48a   :  { %v7716_v11 = vadd.f32 %v3867_v46, %v9883_v38  ;;  %v7780_v22 = vadd.f32 %v4253_v35, %v9886_v18  ;;  %v3869_v63 = vpop.f32.mrb[183].mxu0  ;;  %v4255_v7 = vpop.f32.mrb[183].mxu1  ;;  %5413 = vmatmul.mubr.bf16.gmra.mrb[240].mxu0 %v4454_v60  ;;  %5799 = vmatmul.mubr.bf16.gmra.mrb[240].mxu1 %v4454_v60  ;;  %v4382_v61 = vmax.f32 %v7714_v33, 0.0  ;;  %v4384_v42 = vmax.f32 %v7778_v2, 0.0 }
 0x48b   :  { %v7717_v49 = vadd.f32 %v3869_v63, %v9889_v40  ;;  %v7781_v26 = vadd.f32 %v4255_v7, %v9892_v24  ;;  %v4383_v17 = vmax.f32 %v7715_v43, 0.0  ;;  %v4385_v47 = vmax.f32 %v7779_v16, 0.0 }
 0x48c   :  { %v4386_v27 = vmax.f32 %v7716_v11, 0.0  ;;  %v4388_v39 = vmax.f32 %v7780_v22, 0.0 }
 0x48d   :  { %v4387_v62 = vmax.f32 %v7717_v49, 0.0  ;;  %v4389_v8 = vmax.f32 %v7781_v26, 0.0 }
 0x48e   :  { %v4458_v53 = vpack.c.bf16 %v4386_v27, %v4382_v61  ;;  %v10058_v55 = vpack.c.bf16 %v4388_v39, %v4384_v42 }
 0x48f   :  { %v4459_v4 = vpack.c.bf16 %v4387_v62, %v4383_v17  ;;  %v10060_v19 = vpack.c.bf16 %v4389_v8, %v4385_v47  ;;  %v3873_v1 = vpop.f32.mrb[184].mxu0  ;;  %v4259_v60 = vpop.f32.mrb[184].mxu1 }
 0x490   :  { %v7718_v20 = vadd.f32 %v3873_v1, %v9883_v38  ;;  %v7782_v21 = vadd.f32 %v4259_v60, %v9886_v18  ;;  %v3875_v33 = vpop.f32.mrb[185].mxu0  ;;  %v4261_v2 = vpop.f32.mrb[185].mxu1 }
 0x491   :  { %v7719_v12 = vadd.f32 %v3875_v33, %v9889_v40  ;;  %v7783_v57 = vadd.f32 %v4261_v2, %v9892_v24  ;;  %v3877_v43 = vpop.f32.mrb[186].mxu0  ;;  %v4263_v16 = vpop.f32.mrb[186].mxu1  ;;  %5422 = vmatprep.mubr.bf16.mxu0 %v4459_v4  ;;  %5808 = vmatprep.mubr.bf16.mxu1 %v4459_v4 }
 0x492   :  { %v7720_v46 = vadd.f32 %v3877_v43, %v9883_v38  ;;  %v7784_v35 = vadd.f32 %v4263_v16, %v9886_v18  ;;  %v3879_v11 = vpop.f32.mrb[187].mxu0  ;;  %v4265_v22 = vpop.f32.mrb[187].mxu1  ;;  %5423 = vmatmul.mubr.bf16.gmra.mrb[244].mxu0 %v4458_v53  ;;  %5809 = vmatmul.mubr.bf16.gmra.mrb[244].mxu1 %v4458_v53  ;;  %v4390_v49 = vmax.f32 %v7718_v20, 0.0  ;;  %v4392_v26 = vmax.f32 %v7782_v21, 0.0 }
 0x493   :  { %v7721_v63 = vadd.f32 %v3879_v11, %v9889_v40  ;;  %v7785_v7 = vadd.f32 %v4265_v22, %v9892_v24  ;;  %v4391_v27 = vmax.f32 %v7719_v12, 0.0  ;;  %v4393_v39 = vmax.f32 %v7783_v57, 0.0 }
 0x494   :  { %v4394_v61 = vmax.f32 %v7720_v46, 0.0  ;;  %v4396_v42 = vmax.f32 %v7784_v35, 0.0 }
 0x495   :  { %v4395_v17 = vmax.f32 %v7721_v63, 0.0  ;;  %v4397_v47 = vmax.f32 %v7785_v7, 0.0 }
 0x496   :  { %v4462_v62 = vpack.c.bf16 %v4394_v61, %v4390_v49  ;;  %v10070_v8 = vpack.c.bf16 %v4396_v42, %v4392_v26 }
 0x497   :  { %v4463_v4 = vpack.c.bf16 %v4395_v17, %v4391_v27  ;;  %v10072_v1 = vpack.c.bf16 %v4397_v47, %v4393_v39  ;;  %v3883_v60 = vpop.f32.mrb[188].mxu0  ;;  %v4269_v53 = vpop.f32.mrb[188].mxu1 }
 0x498   :  { %v7722_v33 = vadd.f32 %v3883_v60, %v9883_v38  ;;  %v7786_v2 = vadd.f32 %v4269_v53, %v9886_v18  ;;  %v3885_v20 = vpop.f32.mrb[189].mxu0  ;;  %v4271_v21 = vpop.f32.mrb[189].mxu1  ;;  %v8946_v53 = vld [vmem:[#allocation11 + $0xc8] sm:$0xff]  }
 0x499   :  { %v7723_v43 = vadd.f32 %v3885_v20, %v9889_v40  ;;  %v7787_v12 = vadd.f32 %v4271_v21, %v9892_v24  ;;  %v3887_v57 = vpop.f32.mrb[190].mxu0  ;;  %v4273_v16 = vpop.f32.mrb[190].mxu1  ;;  %5432 = vmatprep.mubr.bf16.mxu0 %v4463_v4  ;;  %5818 = vmatprep.mubr.bf16.mxu1 %v4463_v4  ;;  %v8948_v20 = vld [vmem:[#allocation11 + $0x50] sm:$0xff]  }
 0x49a   :  { %v7724_v46 = vadd.f32 %v3887_v57, %v9883_v38  ;;  %v7788_v35 = vadd.f32 %v4273_v16, %v9886_v18  ;;  %v3889_v11 = vpop.f32.mrb[191].mxu0  ;;  %v4275_v22 = vpop.f32.mrb[191].mxu1  ;;  %5433 = vmatmul.mubr.bf16.gmra.mrb[248].mxu0 %v4462_v62  ;;  %5819 = vmatmul.mubr.bf16.gmra.mrb[248].mxu1 %v4462_v62  ;;  %v4398_v49 = vmax.f32 %v7722_v33, 0.0  ;;  %v4400_v26 = vmax.f32 %v7786_v2, 0.0  ;;  %v8944_v62 = vld [vmem:[#allocation11 + $0x48] sm:$0xff]   ;;  %v8949_v21 = vld [vmem:[#allocation11 + $0x10] sm:$0xff]  }
 0x49b   :  { %v7725_v63 = vadd.f32 %v3889_v11, %v9889_v40  ;;  %v7789_v7 = vadd.f32 %v4275_v22, %v9892_v24  ;;  %v4399_v27 = vmax.f32 %v7723_v43, 0.0  ;;  %v4401_v39 = vmax.f32 %v7787_v12, 0.0  ;;  %v8941_v40 = vld [vmem:[#allocation11] sm:$0xff]   ;;  %v8945_v33 = vld [vmem:[#allocation11 + $0x8] sm:$0xff]   ;;  %v8951_v43 = vld [vmem:[#allocation11 + $0x90] sm:$0xff]  }
 0x49c   :  { %v4402_v61 = vmax.f32 %v7724_v46, 0.0  ;;  %v4404_v42 = vmax.f32 %v7788_v35, 0.0  ;;  %v8943_v24 = vld [vmem:[#allocation11 + $0x80] sm:$0xff]   ;;  %v8947_v2 = vld [vmem:[#allocation11 + $0x88] sm:$0xff]   ;;  %v8952_v12 = vld [vmem:[#allocation11 + $0x58] sm:$0xff]  }
 0x49d   :  { %v4403_v17 = vmax.f32 %v7725_v63, 0.0  ;;  %v4405_v47 = vmax.f32 %v7789_v7, 0.0  ;;  %v8955_v57 = vld [vmem:[#allocation11 + $0x98] sm:$0xff]   ;;  %v8956_v16 = vld [vmem:[#allocation11 + $0x60] sm:$0xff]   ;;  %v8960_v22 = vld [vmem:[#allocation11 + $0x68] sm:$0xff]  }
 0x49e   :  { %v4466_v4 = vpack.c.bf16 %v4402_v61, %v4398_v49  ;;  %v10082_v38 = vpack.c.bf16 %v4404_v42, %v4400_v26  ;;  %v8958_v46 = vld [vmem:[#allocation11 + $0xe0] sm:$0xff]   ;;  %v8963_v63 = vld [vmem:[#allocation11 + $0xa8] sm:$0xff]   ;;  %v8964_v7 = vld [vmem:[#allocation11 + $0x70] sm:$0xff]  }
 0x49f   :  { %v4467_v18 = vpack.c.bf16 %v4403_v17, %v4399_v27  ;;  %v10084_v60 = vpack.c.bf16 %v4405_v47, %v4401_v39  ;;  %v8957_v35 = vld [vmem:[#allocation11 + $0x20] sm:$0xff]   ;;  %v8966_v49 = vld [vmem:[#allocation11 + $0xf0] sm:$0xff]   ;;  %v8968_v42 = vld [vmem:[#allocation11 + $0x78] sm:$0xff]  }
 0x4a0   :  { %v8959_v11 = vld [vmem:[#allocation11 + $0xa0] sm:$0xff]   ;;  %v8965_v26 = vld [vmem:[#allocation11 + $0x30] sm:$0xff]   ;;  %v8971_v27 = vld [vmem:[#allocation11 + $0xb8] sm:$0xff]  }
 0x4a1   :  { %5442 = vmatprep.mubr.bf16.mxu0 %v4467_v18  ;;  %5828 = vmatprep.mubr.bf16.mxu1 %v4467_v18  ;;  %v8967_v61 = vld [vmem:[#allocation11 + $0xb0] sm:$0xff]  }
 0x4a2   :  { %5443 = vmatmul.mubr.bf16.gmra.mrb[252].mxu0 %v4466_v4  ;;  %5829 = vmatmul.mubr.bf16.gmra.mrb[252].mxu1 %v4466_v4 }
 0x4a3   :  { %5485 = vmatprep.mubr.bf16.mxu0 %v9904_v52  ;;  %5871 = vmatprep.mubr.bf16.mxu1 %v9904_v52  ;;  %v8950_v52 = vld [vmem:[#allocation11 + $0xd0] sm:$0xff]  }
 0x4aa   :  { %5486 = vmatmul.mubr.bf16.vlgmr.msra.gmra.mrb[192].mxu0 %v9902_v36  ;;  %5872 = vmatmul.mubr.bf16.vlgmr.msra.gmra.mrb[192].mxu1 %v9902_v36  ;;  %v8954_v36 = vld [vmem:[#allocation11 + $0xd8] sm:$0xff]  }
 0x4ab   :  { %5495 = vmatprep.mubr.bf16.mxu0 %v9916_v10  ;;  %5881 = vmatprep.mubr.bf16.mxu1 %v9916_v10  ;;  %v8953_v10 = vld [vmem:[#allocation11 + $0x18] sm:$0xff]  }
 0x4ac   :  { %7311 = vmatpush3.bf16.msra.mxu0 %v8941_v40  ;;  %7423 = vmatpush3.bf16.msra.mxu1 %v8943_v24 }
 0x4ad   :  { %7312 = vmatprep.subr.bf16.mxu0 %v8944_v62  ;;  %7424 = vmatprep.subr.bf16.mxu1 %v8946_v53 }
 0x4b0   :  { %7313 = vmatpush3.bf16.msra.mxu0 %v8945_v33  ;;  %7425 = vmatpush3.bf16.msra.mxu1 %v8947_v2 }
 0x4b1   :  { %7314 = vmatprep.subr.bf16.mxu0 %v8948_v20  ;;  %7426 = vmatprep.subr.bf16.mxu1 %v8950_v52 }
 0x4b2   :  { %5496 = vmatmul.mubr.bf16.gmra.mrb[196].mxu0 %v9914_v13  ;;  %5882 = vmatmul.mubr.bf16.gmra.mrb[196].mxu1 %v9914_v13  ;;  %v8962_v13 = vld [vmem:[#allocation11 + $0xe8] sm:$0xff]  }
 0x4b3   :  { %5505 = vmatprep.mubr.bf16.mxu0 %v9928_v56  ;;  %5891 = vmatprep.mubr.bf16.mxu1 %v9928_v56  ;;  %v8961_v56 = vld [vmem:[#allocation11 + $0x28] sm:$0xff]  }
 0x4b4   :  { %7315 = vmatpush3.bf16.msra.mxu0 %v8949_v21  ;;  %7427 = vmatpush3.bf16.msra.mxu1 %v8951_v43 }
 0x4b5   :  { %7316 = vmatprep.subr.bf16.mxu0 %v8952_v12  ;;  %7428 = vmatprep.subr.bf16.mxu1 %v8954_v36 }
 0x4b8   :  { %7317 = vmatpush3.bf16.msra.mxu0 %v8953_v10  ;;  %7429 = vmatpush3.bf16.msra.mxu1 %v8955_v57 }
 0x4b9   :  { %7318 = vmatprep.subr.bf16.mxu0 %v8956_v16  ;;  %7430 = vmatprep.subr.bf16.mxu1 %v8958_v46 }
 0x4ba   :  { %5506 = vmatmul.mubr.bf16.gmra.mrb[200].mxu0 %v9926_v29  ;;  %5892 = vmatmul.mubr.bf16.gmra.mrb[200].mxu1 %v9926_v29  ;;  %v8970_v29 = vld [vmem:[#allocation11 + $0xf8] sm:$0xff]  }
 0x4bb   :  { %5515 = vmatprep.mubr.bf16.mxu0 %v9940_v28  ;;  %5901 = vmatprep.mubr.bf16.mxu1 %v9940_v28  ;;  %v8969_v28 = vld [vmem:[#allocation11 + $0x38] sm:$0xff]  }
 0x4bc   :  { %7319 = vmatpush3.bf16.msra.mxu0 %v8957_v35  ;;  %7431 = vmatpush3.bf16.msra.mxu1 %v8959_v11 }
 0x4bd   :  { %7320 = vmatprep.subr.bf16.mxu0 %v8960_v22  ;;  %7432 = vmatprep.subr.bf16.mxu1 %v8962_v13 }
 0x4c0   :  { %7321 = vmatpush3.bf16.msra.mxu0 %v8961_v56  ;;  %7433 = vmatpush3.bf16.msra.mxu1 %v8963_v63 }
 0x4c1   :  { %7322 = vmatprep.subr.bf16.mxu0 %v8964_v7  ;;  %7434 = vmatprep.subr.bf16.mxu1 %v8966_v49 }
 0x4c2   :  { %5516 = vmatmul.mubr.bf16.gmra.mrb[204].mxu0 %v9938_v41  ;;  %5902 = vmatmul.mubr.bf16.gmra.mrb[204].mxu1 %v9938_v41  ;;  %v4598_v41 = vld [vmem:[%s10353_s8] sm:$0xf] }
 0x4c3   :  { %5525 = vmatprep.mubr.bf16.mxu0 %v9952_v45  ;;  %5911 = vmatprep.mubr.bf16.mxu1 %v9952_v45  ;;  %v10157_v45 = vrot.slane %v4598_v41, %v9347_v48 }
 0x4c4   :  { %7323 = vmatpush3.bf16.msra.mxu0 %v8965_v26  ;;  %7435 = vmatpush3.bf16.msra.mxu1 %v8967_v61 }
 0x4c5   :  { %7324 = vmatprep.subr.bf16.mxu0 %v8968_v42  ;;  %7436 = vmatprep.subr.bf16.mxu1 %v8970_v29 }
 0x4c8   :  { %7325 = vmatpush3.bf16.msra.mxu0 %v8969_v28  ;;  %7437 = vmatpush3.bf16.msra.mxu1 %v8971_v27 }
 0x4ca   :  { %5526 = vmatmul.mubr.bf16.gmra.mrb[208].mxu0 %v9950_v31  ;;  %5912 = vmatmul.mubr.bf16.gmra.mrb[208].mxu1 %v9950_v31  ;;  %v10154_v31 = vrot.slane %v4598_v41, %v9329_v23 }
 0x4cb   :  { %5535 = vmatprep.mubr.bf16.mxu0 %v9964_v44  ;;  %5921 = vmatprep.mubr.bf16.mxu1 %v9964_v44  ;;  %v10163_v44 = vrot.slane %v4598_v41, %v9350_v51 }
 0x4d2   :  { %5536 = vmatmul.mubr.bf16.gmra.mrb[212].mxu0 %v9962_v3  ;;  %5922 = vmatmul.mubr.bf16.gmra.mrb[212].mxu1 %v9962_v3  ;;  %v10160_v3 = vrot.slane %v4598_v41, %v9334_v25 }
 0x4d3   :  { %5545 = vmatprep.mubr.bf16.mxu0 %v9976_v37  ;;  %5931 = vmatprep.mubr.bf16.mxu1 %v9976_v37 }
 0x4da   :  { %5546 = vmatmul.mubr.bf16.gmra.mrb[216].mxu0 %v9974_v6  ;;  %5932 = vmatmul.mubr.bf16.gmra.mrb[216].mxu1 %v9974_v6 }
 0x4db   :  { %5555 = vmatprep.mubr.bf16.mxu0 %v9988_v50  ;;  %5941 = vmatprep.mubr.bf16.mxu1 %v9988_v50 }
 0x4e2   :  { %5556 = vmatmul.mubr.bf16.gmra.mrb[220].mxu0 %v9986_v9  ;;  %5942 = vmatmul.mubr.bf16.gmra.mrb[220].mxu1 %v9986_v9 }
 0x4e3   :  { %5565 = vmatprep.mubr.bf16.mxu0 %v10000_v58  ;;  %5951 = vmatprep.mubr.bf16.mxu1 %v10000_v58 }
 0x4ea   :  { %5566 = vmatmul.mubr.bf16.gmra.mrb[224].mxu0 %v9998_v54  ;;  %5952 = vmatmul.mubr.bf16.gmra.mrb[224].mxu1 %v9998_v54 }
 0x4eb   :  { %5575 = vmatprep.mubr.bf16.mxu0 %v10012_v14  ;;  %5961 = vmatprep.mubr.bf16.mxu1 %v10012_v14 }
 0x4f2   :  { %5576 = vmatmul.mubr.bf16.gmra.mrb[228].mxu0 %v10010_v30  ;;  %5962 = vmatmul.mubr.bf16.gmra.mrb[228].mxu1 %v10010_v30 }
 0x4f3   :  { %5585 = vmatprep.mubr.bf16.mxu0 %v10024_v15  ;;  %5971 = vmatprep.mubr.bf16.mxu1 %v10024_v15 }
 0x4fa   :  { %5586 = vmatmul.mubr.bf16.gmra.mrb[232].mxu0 %v10022_v0  ;;  %5972 = vmatmul.mubr.bf16.gmra.mrb[232].mxu1 %v10022_v0 }
 0x4fb   :  { %5595 = vmatprep.mubr.bf16.mxu0 %v10036_v34  ;;  %5981 = vmatprep.mubr.bf16.mxu1 %v10036_v34 }
 0x502   :  { %5596 = vmatmul.mubr.bf16.gmra.mrb[236].mxu0 %v10034_v32  ;;  %5982 = vmatmul.mubr.bf16.gmra.mrb[236].mxu1 %v10034_v32 }
 0x503   :  { %5605 = vmatprep.mubr.bf16.mxu0 %v10048_v5  ;;  %5991 = vmatprep.mubr.bf16.mxu1 %v10048_v5 }
 0x50a   :  { %5606 = vmatmul.mubr.bf16.gmra.mrb[240].mxu0 %v10046_v59  ;;  %5992 = vmatmul.mubr.bf16.gmra.mrb[240].mxu1 %v10046_v59 }
 0x50b   :  { %5615 = vmatprep.mubr.bf16.mxu0 %v10060_v19  ;;  %6001 = vmatprep.mubr.bf16.mxu1 %v10060_v19 }
 0x512   :  { %5616 = vmatmul.mubr.bf16.gmra.mrb[244].mxu0 %v10058_v55  ;;  %6002 = vmatmul.mubr.bf16.gmra.mrb[244].mxu1 %v10058_v55 }
 0x513   :  { %5625 = vmatprep.mubr.bf16.mxu0 %v10072_v1  ;;  %6011 = vmatprep.mubr.bf16.mxu1 %v10072_v1 }
 0x51a   :  { %5626 = vmatmul.mubr.bf16.gmra.mrb[248].mxu0 %v10070_v8  ;;  %6012 = vmatmul.mubr.bf16.gmra.mrb[248].mxu1 %v10070_v8 }
 0x51b   :  { %5635 = vmatprep.mubr.bf16.mxu0 %v10084_v60  ;;  %6021 = vmatprep.mubr.bf16.mxu1 %v10084_v60 }
 0x522   :  { %5636 = vmatmul.mubr.bf16.gmra.mrb[252].mxu0 %v10082_v38  ;;  %6022 = vmatmul.mubr.bf16.gmra.mrb[252].mxu1 %v10082_v38 }
 0x57d   :  { %v5487_v6 = vpop.f32.mrb[192].mxu0  ;;  %v5873_v37 = vpop.f32.mrb[192].mxu1 }
 0x57e   :  { %v7790_v9 = vadd.f32 %v5487_v6, %v10154_v31  ;;  %v7854_v50 = vadd.f32 %v5873_v37, %v10157_v45  ;;  %v5489_v54 = vpop.f32.mrb[193].mxu0  ;;  %v5875_v58 = vpop.f32.mrb[193].mxu1 }
 0x57f   :  { %v7791_v23 = vadd.f32 %v5489_v54, %v10160_v3  ;;  %v7855_v30 = vadd.f32 %v5875_v58, %v10163_v44  ;;  %v5491_v48 = vpop.f32.mrb[194].mxu0  ;;  %v5877_v14 = vpop.f32.mrb[194].mxu1 }
 0x580   :  { %v7792_v25 = vadd.f32 %v5491_v48, %v10154_v31  ;;  %v7856_v0 = vadd.f32 %v5877_v14, %v10157_v45  ;;  %v5493_v51 = vpop.f32.mrb[195].mxu0  ;;  %v5879_v15 = vpop.f32.mrb[195].mxu1  ;;  %v6032_v59 = vmax.f32 %v7790_v9, 0.0  ;;  %v6034_v5 = vmax.f32 %v7854_v50, 0.0 }
 0x581   :  { %v7793_v32 = vadd.f32 %v5493_v51, %v10160_v3  ;;  %v7857_v34 = vadd.f32 %v5879_v15, %v10163_v44  ;;  %v6033_v8 = vmax.f32 %v7791_v23, 0.0  ;;  %v6035_v1 = vmax.f32 %v7855_v30, 0.0 }
 0x582   :  { %v6036_v55 = vmax.f32 %v7792_v25, 0.0  ;;  %v6038_v19 = vmax.f32 %v7856_v0, 0.0 }
 0x583   :  { %v6037_v39 = vmax.f32 %v7793_v32, 0.0  ;;  %v6039_v17 = vmax.f32 %v7857_v34, 0.0 }
 0x584   :  { %v6160_v47 = vpack.c.bf16 %v6036_v55, %v6032_v59  ;;  %v6162_v4 = vpack.c.bf16 %v6038_v19, %v6034_v5 }
 0x585   :  { %v6161_v38 = vpack.c.bf16 %v6037_v39, %v6033_v8  ;;  %v6163_v18 = vpack.c.bf16 %v6039_v17, %v6035_v1  ;;  %v5497_v60 = vpop.f32.mrb[196].mxu0  ;;  %v5883_v40 = vpop.f32.mrb[196].mxu1 }
 0x586   :  { %v7794_v24 = vadd.f32 %v5497_v60, %v10154_v31  ;;  %v7858_v62 = vadd.f32 %v5883_v40, %v10157_v45  ;;  %v5499_v53 = vpop.f32.mrb[197].mxu0  ;;  %v5885_v33 = vpop.f32.mrb[197].mxu1 }
 0x587   :  { %v7795_v2 = vadd.f32 %v5499_v53, %v10160_v3  ;;  %v7859_v20 = vadd.f32 %v5885_v33, %v10163_v44  ;;  %v5501_v52 = vpop.f32.mrb[198].mxu0  ;;  %v5887_v21 = vpop.f32.mrb[198].mxu1  ;;  %6519 = vmatprep.mubr.bf16.mxu0 %v6161_v38  ;;  %6680 = vmatprep.mubr.bf16.mxu1 %v6163_v18 }
 0x588   :  { %v7796_v43 = vadd.f32 %v5501_v52, %v10154_v31  ;;  %v7860_v12 = vadd.f32 %v5887_v21, %v10157_v45  ;;  %v5503_v36 = vpop.f32.mrb[199].mxu0  ;;  %v5889_v10 = vpop.f32.mrb[199].mxu1  ;;  %6520 = vmatmul.mubr.bf16.vlgmr.msra.gmra.mrb[0].mxu0 %v6160_v47  ;;  %6681 = vmatmul.mubr.bf16.vlgmr.msra.gmra.mrb[0].mxu1 %v6162_v4  ;;  %v6040_v46 = vmax.f32 %v7794_v24, 0.0  ;;  %v6042_v35 = vmax.f32 %v7858_v62, 0.0 }
 0x589   :  { %v7797_v57 = vadd.f32 %v5503_v36, %v10160_v3  ;;  %v7861_v16 = vadd.f32 %v5889_v10, %v10163_v44  ;;  %v6041_v13 = vmax.f32 %v7795_v2, 0.0  ;;  %v6043_v56 = vmax.f32 %v7859_v20, 0.0 }
 0x58a   :  { %v6044_v11 = vmax.f32 %v7796_v43, 0.0  ;;  %v6046_v22 = vmax.f32 %v7860_v12, 0.0 }
 0x58b   :  { %v6045_v63 = vmax.f32 %v7797_v57, 0.0  ;;  %v6047_v7 = vmax.f32 %v7861_v16, 0.0 }
 0x58c   :  { %v6164_v49 = vpack.c.bf16 %v6044_v11, %v6040_v46  ;;  %v6166_v26 = vpack.c.bf16 %v6046_v22, %v6042_v35 }
 0x58d   :  { %v6165_v61 = vpack.c.bf16 %v6045_v63, %v6041_v13  ;;  %v6167_v42 = vpack.c.bf16 %v6047_v7, %v6043_v56  ;;  %v5507_v29 = vpop.f32.mrb[200].mxu0  ;;  %v5893_v28 = vpop.f32.mrb[200].mxu1 }
 0x58e   :  { %v7798_v27 = vadd.f32 %v5507_v29, %v10154_v31  ;;  %v7862_v41 = vadd.f32 %v5893_v28, %v10157_v45  ;;  %v5509_v6 = vpop.f32.mrb[201].mxu0  ;;  %v5895_v37 = vpop.f32.mrb[201].mxu1 }
 0x58f   :  { %v7799_v9 = vadd.f32 %v5509_v6, %v10160_v3  ;;  %v7863_v50 = vadd.f32 %v5895_v37, %v10163_v44  ;;  %v5511_v54 = vpop.f32.mrb[202].mxu0  ;;  %v5897_v58 = vpop.f32.mrb[202].mxu1  ;;  %6527 = vmatprep.mubr.bf16.mxu0 %v6165_v61  ;;  %6688 = vmatprep.mubr.bf16.mxu1 %v6167_v42 }
 0x590   :  { %v7800_v23 = vadd.f32 %v5511_v54, %v10154_v31  ;;  %v7864_v30 = vadd.f32 %v5897_v58, %v10157_v45  ;;  %v5513_v48 = vpop.f32.mrb[203].mxu0  ;;  %v5899_v14 = vpop.f32.mrb[203].mxu1  ;;  %6528 = vmatmul.mubr.bf16.gmra.mrb[4].mxu0 %v6164_v49  ;;  %6689 = vmatmul.mubr.bf16.gmra.mrb[4].mxu1 %v6166_v26  ;;  %v6048_v51 = vmax.f32 %v7798_v27, 0.0  ;;  %v6050_v15 = vmax.f32 %v7862_v41, 0.0 }
 0x591   :  { %v7801_v25 = vadd.f32 %v5513_v48, %v10160_v3  ;;  %v7865_v0 = vadd.f32 %v5899_v14, %v10163_v44  ;;  %v6049_v59 = vmax.f32 %v7799_v9, 0.0  ;;  %v6051_v5 = vmax.f32 %v7863_v50, 0.0 }
 0x592   :  { %v6052_v32 = vmax.f32 %v7800_v23, 0.0  ;;  %v6054_v34 = vmax.f32 %v7864_v30, 0.0 }
 0x593   :  { %v6053_v55 = vmax.f32 %v7801_v25, 0.0  ;;  %v6055_v19 = vmax.f32 %v7865_v0, 0.0 }
 0x594   :  { %v6168_v8 = vpack.c.bf16 %v6052_v32, %v6048_v51  ;;  %v6170_v1 = vpack.c.bf16 %v6054_v34, %v6050_v15 }
 0x595   :  { %v6169_v39 = vpack.c.bf16 %v6053_v55, %v6049_v59  ;;  %v6171_v17 = vpack.c.bf16 %v6055_v19, %v6051_v5  ;;  %v5517_v47 = vpop.f32.mrb[204].mxu0  ;;  %v5903_v4 = vpop.f32.mrb[204].mxu1 }
 0x596   :  { %v7802_v38 = vadd.f32 %v5517_v47, %v10154_v31  ;;  %v7866_v18 = vadd.f32 %v5903_v4, %v10157_v45  ;;  %v5519_v60 = vpop.f32.mrb[205].mxu0  ;;  %v5905_v40 = vpop.f32.mrb[205].mxu1 }
 0x597   :  { %v7803_v24 = vadd.f32 %v5519_v60, %v10160_v3  ;;  %v7867_v62 = vadd.f32 %v5905_v40, %v10163_v44  ;;  %v5521_v53 = vpop.f32.mrb[206].mxu0  ;;  %v5907_v33 = vpop.f32.mrb[206].mxu1  ;;  %6535 = vmatprep.mubr.bf16.mxu0 %v6169_v39  ;;  %6696 = vmatprep.mubr.bf16.mxu1 %v6171_v17 }
 0x598   :  { %v7804_v2 = vadd.f32 %v5521_v53, %v10154_v31  ;;  %v7868_v20 = vadd.f32 %v5907_v33, %v10157_v45  ;;  %v5523_v52 = vpop.f32.mrb[207].mxu0  ;;  %v5909_v21 = vpop.f32.mrb[207].mxu1  ;;  %6536 = vmatmul.mubr.bf16.gmra.mrb[8].mxu0 %v6168_v8  ;;  %6697 = vmatmul.mubr.bf16.gmra.mrb[8].mxu1 %v6170_v1  ;;  %v6056_v36 = vmax.f32 %v7802_v38, 0.0  ;;  %v6058_v10 = vmax.f32 %v7866_v18, 0.0 }
 0x599   :  { %v7805_v43 = vadd.f32 %v5523_v52, %v10160_v3  ;;  %v7869_v12 = vadd.f32 %v5909_v21, %v10163_v44  ;;  %v6057_v46 = vmax.f32 %v7803_v24, 0.0  ;;  %v6059_v35 = vmax.f32 %v7867_v62, 0.0 }
 0x59a   :  { %v6060_v57 = vmax.f32 %v7804_v2, 0.0  ;;  %v6062_v16 = vmax.f32 %v7868_v20, 0.0 }
 0x59b   :  { %v6061_v11 = vmax.f32 %v7805_v43, 0.0  ;;  %v6063_v22 = vmax.f32 %v7869_v12, 0.0 }
 0x59c   :  { %v6172_v13 = vpack.c.bf16 %v6060_v57, %v6056_v36  ;;  %v6174_v56 = vpack.c.bf16 %v6062_v16, %v6058_v10 }
 0x59d   :  { %v6173_v63 = vpack.c.bf16 %v6061_v11, %v6057_v46  ;;  %v6175_v7 = vpack.c.bf16 %v6063_v22, %v6059_v35  ;;  %v5527_v49 = vpop.f32.mrb[208].mxu0  ;;  %v5913_v26 = vpop.f32.mrb[208].mxu1 }
 0x59e   :  { %v7806_v61 = vadd.f32 %v5527_v49, %v10154_v31  ;;  %v7870_v42 = vadd.f32 %v5913_v26, %v10157_v45  ;;  %v5529_v29 = vpop.f32.mrb[209].mxu0  ;;  %v5915_v28 = vpop.f32.mrb[209].mxu1 }
 0x59f   :  { %v7807_v27 = vadd.f32 %v5529_v29, %v10160_v3  ;;  %v7871_v41 = vadd.f32 %v5915_v28, %v10163_v44  ;;  %v5531_v6 = vpop.f32.mrb[210].mxu0  ;;  %v5917_v37 = vpop.f32.mrb[210].mxu1  ;;  %6543 = vmatprep.mubr.bf16.mxu0 %v6173_v63  ;;  %6704 = vmatprep.mubr.bf16.mxu1 %v6175_v7 }
 0x5a0   :  { %v7808_v9 = vadd.f32 %v5531_v6, %v10154_v31  ;;  %v7872_v50 = vadd.f32 %v5917_v37, %v10157_v45  ;;  %v5533_v54 = vpop.f32.mrb[211].mxu0  ;;  %v5919_v58 = vpop.f32.mrb[211].mxu1  ;;  %6544 = vmatmul.mubr.bf16.gmra.mrb[12].mxu0 %v6172_v13  ;;  %6705 = vmatmul.mubr.bf16.gmra.mrb[12].mxu1 %v6174_v56  ;;  %v6064_v48 = vmax.f32 %v7806_v61, 0.0  ;;  %v6066_v14 = vmax.f32 %v7870_v42, 0.0 }
 0x5a1   :  { %v7809_v23 = vadd.f32 %v5533_v54, %v10160_v3  ;;  %v7873_v30 = vadd.f32 %v5919_v58, %v10163_v44  ;;  %v6065_v51 = vmax.f32 %v7807_v27, 0.0  ;;  %v6067_v15 = vmax.f32 %v7871_v41, 0.0 }
 0x5a2   :  { %v6068_v25 = vmax.f32 %v7808_v9, 0.0  ;;  %v6070_v0 = vmax.f32 %v7872_v50, 0.0 }
 0x5a3   :  { %v6069_v32 = vmax.f32 %v7809_v23, 0.0  ;;  %v6071_v34 = vmax.f32 %v7873_v30, 0.0 }
 0x5a4   :  { %v6176_v59 = vpack.c.bf16 %v6068_v25, %v6064_v48  ;;  %v6178_v5 = vpack.c.bf16 %v6070_v0, %v6066_v14 }
 0x5a5   :  { %v6177_v55 = vpack.c.bf16 %v6069_v32, %v6065_v51  ;;  %v6179_v19 = vpack.c.bf16 %v6071_v34, %v6067_v15  ;;  %v5537_v8 = vpop.f32.mrb[212].mxu0  ;;  %v5923_v1 = vpop.f32.mrb[212].mxu1 }
 0x5a6   :  { %v7810_v39 = vadd.f32 %v5537_v8, %v10154_v31  ;;  %v7874_v17 = vadd.f32 %v5923_v1, %v10157_v45  ;;  %v5539_v47 = vpop.f32.mrb[213].mxu0  ;;  %v5925_v4 = vpop.f32.mrb[213].mxu1 }
 0x5a7   :  { %v7811_v38 = vadd.f32 %v5539_v47, %v10160_v3  ;;  %v7875_v18 = vadd.f32 %v5925_v4, %v10163_v44  ;;  %v5541_v60 = vpop.f32.mrb[214].mxu0  ;;  %v5927_v40 = vpop.f32.mrb[214].mxu1  ;;  %6551 = vmatprep.mubr.bf16.mxu0 %v6177_v55  ;;  %6712 = vmatprep.mubr.bf16.mxu1 %v6179_v19 }
 0x5a8   :  { %v7812_v24 = vadd.f32 %v5541_v60, %v10154_v31  ;;  %v7876_v62 = vadd.f32 %v5927_v40, %v10157_v45  ;;  %v5543_v53 = vpop.f32.mrb[215].mxu0  ;;  %v5929_v33 = vpop.f32.mrb[215].mxu1  ;;  %6552 = vmatmul.mubr.bf16.gmra.mrb[16].mxu0 %v6176_v59  ;;  %6713 = vmatmul.mubr.bf16.gmra.mrb[16].mxu1 %v6178_v5  ;;  %v6072_v52 = vmax.f32 %v7810_v39, 0.0  ;;  %v6074_v21 = vmax.f32 %v7874_v17, 0.0 }
 0x5a9   :  { %v7813_v2 = vadd.f32 %v5543_v53, %v10160_v3  ;;  %v7877_v20 = vadd.f32 %v5929_v33, %v10163_v44  ;;  %v6073_v36 = vmax.f32 %v7811_v38, 0.0  ;;  %v6075_v10 = vmax.f32 %v7875_v18, 0.0 }
 0x5aa   :  { %v6076_v43 = vmax.f32 %v7812_v24, 0.0  ;;  %v6078_v12 = vmax.f32 %v7876_v62, 0.0 }
 0x5ab   :  { %v6077_v57 = vmax.f32 %v7813_v2, 0.0  ;;  %v6079_v16 = vmax.f32 %v7877_v20, 0.0 }
 0x5ac   :  { %v6180_v46 = vpack.c.bf16 %v6076_v43, %v6072_v52  ;;  %v6182_v35 = vpack.c.bf16 %v6078_v12, %v6074_v21 }
 0x5ad   :  { %v6181_v11 = vpack.c.bf16 %v6077_v57, %v6073_v36  ;;  %v6183_v22 = vpack.c.bf16 %v6079_v16, %v6075_v10  ;;  %v5547_v13 = vpop.f32.mrb[216].mxu0  ;;  %v5933_v56 = vpop.f32.mrb[216].mxu1 }
 0x5ae   :  { %v7814_v63 = vadd.f32 %v5547_v13, %v10154_v31  ;;  %v7878_v7 = vadd.f32 %v5933_v56, %v10157_v45  ;;  %v5549_v49 = vpop.f32.mrb[217].mxu0  ;;  %v5935_v26 = vpop.f32.mrb[217].mxu1 }
 0x5af   :  { %v7815_v61 = vadd.f32 %v5549_v49, %v10160_v3  ;;  %v7879_v42 = vadd.f32 %v5935_v26, %v10163_v44  ;;  %v5551_v29 = vpop.f32.mrb[218].mxu0  ;;  %v5937_v28 = vpop.f32.mrb[218].mxu1  ;;  %6559 = vmatprep.mubr.bf16.mxu0 %v6181_v11  ;;  %6720 = vmatprep.mubr.bf16.mxu1 %v6183_v22 }
 0x5b0   :  { %v7816_v27 = vadd.f32 %v5551_v29, %v10154_v31  ;;  %v7880_v41 = vadd.f32 %v5937_v28, %v10157_v45  ;;  %v5553_v6 = vpop.f32.mrb[219].mxu0  ;;  %v5939_v37 = vpop.f32.mrb[219].mxu1  ;;  %6560 = vmatmul.mubr.bf16.gmra.mrb[20].mxu0 %v6180_v46  ;;  %6721 = vmatmul.mubr.bf16.gmra.mrb[20].mxu1 %v6182_v35  ;;  %v6080_v54 = vmax.f32 %v7814_v63, 0.0  ;;  %v6082_v58 = vmax.f32 %v7878_v7, 0.0 }
 0x5b1   :  { %v7817_v9 = vadd.f32 %v5553_v6, %v10160_v3  ;;  %v7881_v50 = vadd.f32 %v5939_v37, %v10163_v44  ;;  %v6081_v48 = vmax.f32 %v7815_v61, 0.0  ;;  %v6083_v14 = vmax.f32 %v7879_v42, 0.0 }
 0x5b2   :  { %v6084_v23 = vmax.f32 %v7816_v27, 0.0  ;;  %v6086_v30 = vmax.f32 %v7880_v41, 0.0 }
 0x5b3   :  { %v6085_v25 = vmax.f32 %v7817_v9, 0.0  ;;  %v6087_v0 = vmax.f32 %v7881_v50, 0.0 }
 0x5b4   :  { %v6184_v51 = vpack.c.bf16 %v6084_v23, %v6080_v54  ;;  %v6186_v15 = vpack.c.bf16 %v6086_v30, %v6082_v58 }
 0x5b5   :  { %v6185_v32 = vpack.c.bf16 %v6085_v25, %v6081_v48  ;;  %v6187_v34 = vpack.c.bf16 %v6087_v0, %v6083_v14  ;;  %v5557_v59 = vpop.f32.mrb[220].mxu0  ;;  %v5943_v5 = vpop.f32.mrb[220].mxu1 }
 0x5b6   :  { %v7818_v55 = vadd.f32 %v5557_v59, %v10154_v31  ;;  %v7882_v19 = vadd.f32 %v5943_v5, %v10157_v45  ;;  %v5559_v8 = vpop.f32.mrb[221].mxu0  ;;  %v5945_v1 = vpop.f32.mrb[221].mxu1 }
 0x5b7   :  { %v7819_v39 = vadd.f32 %v5559_v8, %v10160_v3  ;;  %v7883_v17 = vadd.f32 %v5945_v1, %v10163_v44  ;;  %v5561_v47 = vpop.f32.mrb[222].mxu0  ;;  %v5947_v4 = vpop.f32.mrb[222].mxu1  ;;  %6567 = vmatprep.mubr.bf16.mxu0 %v6185_v32  ;;  %6728 = vmatprep.mubr.bf16.mxu1 %v6187_v34 }
 0x5b8   :  { %v7820_v38 = vadd.f32 %v5561_v47, %v10154_v31  ;;  %v7884_v18 = vadd.f32 %v5947_v4, %v10157_v45  ;;  %v5563_v60 = vpop.f32.mrb[223].mxu0  ;;  %v5949_v40 = vpop.f32.mrb[223].mxu1  ;;  %6568 = vmatmul.mubr.bf16.gmra.mrb[24].mxu0 %v6184_v51  ;;  %6729 = vmatmul.mubr.bf16.gmra.mrb[24].mxu1 %v6186_v15  ;;  %v6088_v53 = vmax.f32 %v7818_v55, 0.0  ;;  %v6090_v33 = vmax.f32 %v7882_v19, 0.0 }
 0x5b9   :  { %v7821_v24 = vadd.f32 %v5563_v60, %v10160_v3  ;;  %v7885_v62 = vadd.f32 %v5949_v40, %v10163_v44  ;;  %v6089_v52 = vmax.f32 %v7819_v39, 0.0  ;;  %v6091_v21 = vmax.f32 %v7883_v17, 0.0 }
 0x5ba   :  { %v6092_v2 = vmax.f32 %v7820_v38, 0.0  ;;  %v6094_v20 = vmax.f32 %v7884_v18, 0.0 }
 0x5bb   :  { %v6093_v43 = vmax.f32 %v7821_v24, 0.0  ;;  %v6095_v12 = vmax.f32 %v7885_v62, 0.0 }
 0x5bc   :  { %v6188_v36 = vpack.c.bf16 %v6092_v2, %v6088_v53  ;;  %v6190_v10 = vpack.c.bf16 %v6094_v20, %v6090_v33 }
 0x5bd   :  { %v6189_v57 = vpack.c.bf16 %v6093_v43, %v6089_v52  ;;  %v6191_v16 = vpack.c.bf16 %v6095_v12, %v6091_v21  ;;  %v5567_v46 = vpop.f32.mrb[224].mxu0  ;;  %v5953_v35 = vpop.f32.mrb[224].mxu1 }
 0x5be   :  { %v7822_v11 = vadd.f32 %v5567_v46, %v10154_v31  ;;  %v7886_v22 = vadd.f32 %v5953_v35, %v10157_v45  ;;  %v5569_v13 = vpop.f32.mrb[225].mxu0  ;;  %v5955_v56 = vpop.f32.mrb[225].mxu1 }
 0x5bf   :  { %v7823_v63 = vadd.f32 %v5569_v13, %v10160_v3  ;;  %v7887_v7 = vadd.f32 %v5955_v56, %v10163_v44  ;;  %v5571_v49 = vpop.f32.mrb[226].mxu0  ;;  %v5957_v26 = vpop.f32.mrb[226].mxu1  ;;  %6575 = vmatprep.mubr.bf16.mxu0 %v6189_v57  ;;  %6736 = vmatprep.mubr.bf16.mxu1 %v6191_v16 }
 0x5c0   :  { %v7824_v61 = vadd.f32 %v5571_v49, %v10154_v31  ;;  %v7888_v42 = vadd.f32 %v5957_v26, %v10157_v45  ;;  %v5573_v29 = vpop.f32.mrb[227].mxu0  ;;  %v5959_v28 = vpop.f32.mrb[227].mxu1  ;;  %6576 = vmatmul.mubr.bf16.gmra.mrb[28].mxu0 %v6188_v36  ;;  %6737 = vmatmul.mubr.bf16.gmra.mrb[28].mxu1 %v6190_v10  ;;  %v6096_v6 = vmax.f32 %v7822_v11, 0.0  ;;  %v6098_v37 = vmax.f32 %v7886_v22, 0.0 }
 0x5c1   :  { %v7825_v27 = vadd.f32 %v5573_v29, %v10160_v3  ;;  %v7889_v41 = vadd.f32 %v5959_v28, %v10163_v44  ;;  %v6097_v54 = vmax.f32 %v7823_v63, 0.0  ;;  %v6099_v58 = vmax.f32 %v7887_v7, 0.0 }
 0x5c2   :  { %v6100_v9 = vmax.f32 %v7824_v61, 0.0  ;;  %v6102_v50 = vmax.f32 %v7888_v42, 0.0 }
 0x5c3   :  { %v6101_v23 = vmax.f32 %v7825_v27, 0.0  ;;  %v6103_v30 = vmax.f32 %v7889_v41, 0.0 }
 0x5c4   :  { %v6192_v48 = vpack.c.bf16 %v6100_v9, %v6096_v6  ;;  %v6194_v14 = vpack.c.bf16 %v6102_v50, %v6098_v37 }
 0x5c5   :  { %v6193_v25 = vpack.c.bf16 %v6101_v23, %v6097_v54  ;;  %v6195_v0 = vpack.c.bf16 %v6103_v30, %v6099_v58  ;;  %v5577_v51 = vpop.f32.mrb[228].mxu0  ;;  %v5963_v15 = vpop.f32.mrb[228].mxu1 }
 0x5c6   :  { %v7826_v32 = vadd.f32 %v5577_v51, %v10154_v31  ;;  %v7890_v34 = vadd.f32 %v5963_v15, %v10157_v45  ;;  %v5579_v59 = vpop.f32.mrb[229].mxu0  ;;  %v5965_v5 = vpop.f32.mrb[229].mxu1 }
 0x5c7   :  { %v7827_v55 = vadd.f32 %v5579_v59, %v10160_v3  ;;  %v7891_v19 = vadd.f32 %v5965_v5, %v10163_v44  ;;  %v5581_v8 = vpop.f32.mrb[230].mxu0  ;;  %v5967_v1 = vpop.f32.mrb[230].mxu1  ;;  %6583 = vmatprep.mubr.bf16.mxu0 %v6193_v25  ;;  %6744 = vmatprep.mubr.bf16.mxu1 %v6195_v0 }
 0x5c8   :  { %v7828_v39 = vadd.f32 %v5581_v8, %v10154_v31  ;;  %v7892_v17 = vadd.f32 %v5967_v1, %v10157_v45  ;;  %v5583_v47 = vpop.f32.mrb[231].mxu0  ;;  %v5969_v4 = vpop.f32.mrb[231].mxu1  ;;  %6584 = vmatmul.mubr.bf16.gmra.mrb[32].mxu0 %v6192_v48  ;;  %6745 = vmatmul.mubr.bf16.gmra.mrb[32].mxu1 %v6194_v14  ;;  %v6104_v60 = vmax.f32 %v7826_v32, 0.0  ;;  %v6106_v40 = vmax.f32 %v7890_v34, 0.0 }
 0x5c9   :  { %v7829_v38 = vadd.f32 %v5583_v47, %v10160_v3  ;;  %v7893_v18 = vadd.f32 %v5969_v4, %v10163_v44  ;;  %v6105_v53 = vmax.f32 %v7827_v55, 0.0  ;;  %v6107_v33 = vmax.f32 %v7891_v19, 0.0 }
 0x5ca   :  { %v6108_v24 = vmax.f32 %v7828_v39, 0.0  ;;  %v6110_v62 = vmax.f32 %v7892_v17, 0.0 }
 0x5cb   :  { %v6109_v2 = vmax.f32 %v7829_v38, 0.0  ;;  %v6111_v20 = vmax.f32 %v7893_v18, 0.0 }
 0x5cc   :  { %v6196_v52 = vpack.c.bf16 %v6108_v24, %v6104_v60  ;;  %v6198_v21 = vpack.c.bf16 %v6110_v62, %v6106_v40 }
 0x5cd   :  { %v6197_v43 = vpack.c.bf16 %v6109_v2, %v6105_v53  ;;  %v6199_v12 = vpack.c.bf16 %v6111_v20, %v6107_v33  ;;  %v5587_v36 = vpop.f32.mrb[232].mxu0  ;;  %v5973_v10 = vpop.f32.mrb[232].mxu1 }
 0x5ce   :  { %v7830_v57 = vadd.f32 %v5587_v36, %v10154_v31  ;;  %v7894_v16 = vadd.f32 %v5973_v10, %v10157_v45  ;;  %v5589_v46 = vpop.f32.mrb[233].mxu0  ;;  %v5975_v35 = vpop.f32.mrb[233].mxu1 }
 0x5cf   :  { %v7831_v11 = vadd.f32 %v5589_v46, %v10160_v3  ;;  %v7895_v22 = vadd.f32 %v5975_v35, %v10163_v44  ;;  %v5591_v13 = vpop.f32.mrb[234].mxu0  ;;  %v5977_v56 = vpop.f32.mrb[234].mxu1  ;;  %6591 = vmatprep.mubr.bf16.mxu0 %v6197_v43  ;;  %6752 = vmatprep.mubr.bf16.mxu1 %v6199_v12 }
 0x5d0   :  { %v7832_v63 = vadd.f32 %v5591_v13, %v10154_v31  ;;  %v7896_v7 = vadd.f32 %v5977_v56, %v10157_v45  ;;  %v5593_v49 = vpop.f32.mrb[235].mxu0  ;;  %v5979_v26 = vpop.f32.mrb[235].mxu1  ;;  %6592 = vmatmul.mubr.bf16.gmra.mrb[36].mxu0 %v6196_v52  ;;  %6753 = vmatmul.mubr.bf16.gmra.mrb[36].mxu1 %v6198_v21  ;;  %v6112_v29 = vmax.f32 %v7830_v57, 0.0  ;;  %v6114_v28 = vmax.f32 %v7894_v16, 0.0 }
 0x5d1   :  { %v7833_v61 = vadd.f32 %v5593_v49, %v10160_v3  ;;  %v7897_v42 = vadd.f32 %v5979_v26, %v10163_v44  ;;  %v6113_v6 = vmax.f32 %v7831_v11, 0.0  ;;  %v6115_v37 = vmax.f32 %v7895_v22, 0.0 }
 0x5d2   :  { %v6116_v27 = vmax.f32 %v7832_v63, 0.0  ;;  %v6118_v41 = vmax.f32 %v7896_v7, 0.0 }
 0x5d3   :  { %v6117_v9 = vmax.f32 %v7833_v61, 0.0  ;;  %v6119_v50 = vmax.f32 %v7897_v42, 0.0 }
 0x5d4   :  { %v6200_v54 = vpack.c.bf16 %v6116_v27, %v6112_v29  ;;  %v6202_v58 = vpack.c.bf16 %v6118_v41, %v6114_v28 }
 0x5d5   :  { %v6201_v23 = vpack.c.bf16 %v6117_v9, %v6113_v6  ;;  %v6203_v30 = vpack.c.bf16 %v6119_v50, %v6115_v37  ;;  %v5597_v48 = vpop.f32.mrb[236].mxu0  ;;  %v5983_v14 = vpop.f32.mrb[236].mxu1 }
 0x5d6   :  { %v7834_v25 = vadd.f32 %v5597_v48, %v10154_v31  ;;  %v7898_v0 = vadd.f32 %v5983_v14, %v10157_v45  ;;  %v5599_v51 = vpop.f32.mrb[237].mxu0  ;;  %v5985_v15 = vpop.f32.mrb[237].mxu1 }
 0x5d7   :  { %v7835_v32 = vadd.f32 %v5599_v51, %v10160_v3  ;;  %v7899_v34 = vadd.f32 %v5985_v15, %v10163_v44  ;;  %v5601_v59 = vpop.f32.mrb[238].mxu0  ;;  %v5987_v5 = vpop.f32.mrb[238].mxu1  ;;  %6599 = vmatprep.mubr.bf16.mxu0 %v6201_v23  ;;  %6760 = vmatprep.mubr.bf16.mxu1 %v6203_v30 }
 0x5d8   :  { %v7836_v55 = vadd.f32 %v5601_v59, %v10154_v31  ;;  %v7900_v19 = vadd.f32 %v5987_v5, %v10157_v45  ;;  %v5603_v8 = vpop.f32.mrb[239].mxu0  ;;  %v5989_v1 = vpop.f32.mrb[239].mxu1  ;;  %6600 = vmatmul.mubr.bf16.gmra.mrb[40].mxu0 %v6200_v54  ;;  %6761 = vmatmul.mubr.bf16.gmra.mrb[40].mxu1 %v6202_v58  ;;  %v6120_v47 = vmax.f32 %v7834_v25, 0.0  ;;  %v6122_v4 = vmax.f32 %v7898_v0, 0.0 }
 0x5d9   :  { %v7837_v39 = vadd.f32 %v5603_v8, %v10160_v3  ;;  %v7901_v17 = vadd.f32 %v5989_v1, %v10163_v44  ;;  %v6121_v60 = vmax.f32 %v7835_v32, 0.0  ;;  %v6123_v40 = vmax.f32 %v7899_v34, 0.0 }
 0x5da   :  { %v6124_v38 = vmax.f32 %v7836_v55, 0.0  ;;  %v6126_v18 = vmax.f32 %v7900_v19, 0.0 }
 0x5db   :  { %v6125_v24 = vmax.f32 %v7837_v39, 0.0  ;;  %v6127_v62 = vmax.f32 %v7901_v17, 0.0 }
 0x5dc   :  { %v6204_v53 = vpack.c.bf16 %v6124_v38, %v6120_v47  ;;  %v6206_v33 = vpack.c.bf16 %v6126_v18, %v6122_v4 }
 0x5dd   :  { %v6205_v2 = vpack.c.bf16 %v6125_v24, %v6121_v60  ;;  %v6207_v20 = vpack.c.bf16 %v6127_v62, %v6123_v40  ;;  %v5607_v52 = vpop.f32.mrb[240].mxu0  ;;  %v5993_v21 = vpop.f32.mrb[240].mxu1 }
 0x5de   :  { %v7838_v43 = vadd.f32 %v5607_v52, %v10154_v31  ;;  %v7902_v12 = vadd.f32 %v5993_v21, %v10157_v45  ;;  %v5609_v36 = vpop.f32.mrb[241].mxu0  ;;  %v5995_v10 = vpop.f32.mrb[241].mxu1 }
 0x5df   :  { %v7839_v57 = vadd.f32 %v5609_v36, %v10160_v3  ;;  %v7903_v16 = vadd.f32 %v5995_v10, %v10163_v44  ;;  %v5611_v46 = vpop.f32.mrb[242].mxu0  ;;  %v5997_v35 = vpop.f32.mrb[242].mxu1  ;;  %6607 = vmatprep.mubr.bf16.mxu0 %v6205_v2  ;;  %6768 = vmatprep.mubr.bf16.mxu1 %v6207_v20 }
 0x5e0   :  { %v7840_v11 = vadd.f32 %v5611_v46, %v10154_v31  ;;  %v7904_v22 = vadd.f32 %v5997_v35, %v10157_v45  ;;  %v5613_v13 = vpop.f32.mrb[243].mxu0  ;;  %v5999_v56 = vpop.f32.mrb[243].mxu1  ;;  %6608 = vmatmul.mubr.bf16.gmra.mrb[44].mxu0 %v6204_v53  ;;  %6769 = vmatmul.mubr.bf16.gmra.mrb[44].mxu1 %v6206_v33  ;;  %v6128_v49 = vmax.f32 %v7838_v43, 0.0  ;;  %v6130_v26 = vmax.f32 %v7902_v12, 0.0 }
 0x5e1   :  { %v7841_v63 = vadd.f32 %v5613_v13, %v10160_v3  ;;  %v7905_v7 = vadd.f32 %v5999_v56, %v10163_v44  ;;  %v6129_v29 = vmax.f32 %v7839_v57, 0.0  ;;  %v6131_v28 = vmax.f32 %v7903_v16, 0.0 }
 0x5e2   :  { %v6132_v61 = vmax.f32 %v7840_v11, 0.0  ;;  %v6134_v42 = vmax.f32 %v7904_v22, 0.0 }
 0x5e3   :  { %v6133_v27 = vmax.f32 %v7841_v63, 0.0  ;;  %v6135_v41 = vmax.f32 %v7905_v7, 0.0 }
 0x5e4   :  { %v6208_v6 = vpack.c.bf16 %v6132_v61, %v6128_v49  ;;  %v6210_v37 = vpack.c.bf16 %v6134_v42, %v6130_v26 }
 0x5e5   :  { %v6209_v9 = vpack.c.bf16 %v6133_v27, %v6129_v29  ;;  %v6211_v50 = vpack.c.bf16 %v6135_v41, %v6131_v28  ;;  %v5617_v54 = vpop.f32.mrb[244].mxu0  ;;  %v6003_v58 = vpop.f32.mrb[244].mxu1 }
 0x5e6   :  { %v7842_v23 = vadd.f32 %v5617_v54, %v10154_v31  ;;  %v7906_v30 = vadd.f32 %v6003_v58, %v10157_v45  ;;  %v5619_v48 = vpop.f32.mrb[245].mxu0  ;;  %v6005_v14 = vpop.f32.mrb[245].mxu1 }
 0x5e7   :  { %v7843_v25 = vadd.f32 %v5619_v48, %v10160_v3  ;;  %v7907_v0 = vadd.f32 %v6005_v14, %v10163_v44  ;;  %v5621_v51 = vpop.f32.mrb[246].mxu0  ;;  %v6007_v15 = vpop.f32.mrb[246].mxu1  ;;  %6615 = vmatprep.mubr.bf16.mxu0 %v6209_v9  ;;  %6776 = vmatprep.mubr.bf16.mxu1 %v6211_v50 }
 0x5e8   :  { %v7844_v32 = vadd.f32 %v5621_v51, %v10154_v31  ;;  %v7908_v34 = vadd.f32 %v6007_v15, %v10157_v45  ;;  %v5623_v59 = vpop.f32.mrb[247].mxu0  ;;  %v6009_v5 = vpop.f32.mrb[247].mxu1  ;;  %6616 = vmatmul.mubr.bf16.gmra.mrb[48].mxu0 %v6208_v6  ;;  %6777 = vmatmul.mubr.bf16.gmra.mrb[48].mxu1 %v6210_v37  ;;  %v6136_v8 = vmax.f32 %v7842_v23, 0.0  ;;  %v6138_v1 = vmax.f32 %v7906_v30, 0.0 }
 0x5e9   :  { %v7845_v55 = vadd.f32 %v5623_v59, %v10160_v3  ;;  %v7909_v19 = vadd.f32 %v6009_v5, %v10163_v44  ;;  %v6137_v47 = vmax.f32 %v7843_v25, 0.0  ;;  %v6139_v4 = vmax.f32 %v7907_v0, 0.0 }
 0x5ea   :  { %v6140_v39 = vmax.f32 %v7844_v32, 0.0  ;;  %v6142_v17 = vmax.f32 %v7908_v34, 0.0 }
 0x5eb   :  { %v6141_v38 = vmax.f32 %v7845_v55, 0.0  ;;  %v6143_v18 = vmax.f32 %v7909_v19, 0.0 }
 0x5ec   :  { %v6212_v60 = vpack.c.bf16 %v6140_v39, %v6136_v8  ;;  %v6214_v40 = vpack.c.bf16 %v6142_v17, %v6138_v1 }
 0x5ed   :  { %v6213_v24 = vpack.c.bf16 %v6141_v38, %v6137_v47  ;;  %v6215_v62 = vpack.c.bf16 %v6143_v18, %v6139_v4  ;;  %v5627_v53 = vpop.f32.mrb[248].mxu0  ;;  %v6013_v33 = vpop.f32.mrb[248].mxu1 }
 0x5ee   :  { %v7846_v2 = vadd.f32 %v5627_v53, %v10154_v31  ;;  %v7910_v20 = vadd.f32 %v6013_v33, %v10157_v45  ;;  %v5629_v52 = vpop.f32.mrb[249].mxu0  ;;  %v6015_v21 = vpop.f32.mrb[249].mxu1 }
 0x5ef   :  { %v7847_v43 = vadd.f32 %v5629_v52, %v10160_v3  ;;  %v7911_v12 = vadd.f32 %v6015_v21, %v10163_v44  ;;  %v5631_v36 = vpop.f32.mrb[250].mxu0  ;;  %v6017_v10 = vpop.f32.mrb[250].mxu1  ;;  %6623 = vmatprep.mubr.bf16.mxu0 %v6213_v24  ;;  %6784 = vmatprep.mubr.bf16.mxu1 %v6215_v62 }
 0x5f0   :  { %v7848_v57 = vadd.f32 %v5631_v36, %v10154_v31  ;;  %v7912_v16 = vadd.f32 %v6017_v10, %v10157_v45  ;;  %v5633_v46 = vpop.f32.mrb[251].mxu0  ;;  %v6019_v35 = vpop.f32.mrb[251].mxu1  ;;  %6624 = vmatmul.mubr.bf16.gmra.mrb[52].mxu0 %v6212_v60  ;;  %6785 = vmatmul.mubr.bf16.gmra.mrb[52].mxu1 %v6214_v40  ;;  %v6144_v13 = vmax.f32 %v7846_v2, 0.0  ;;  %v6146_v56 = vmax.f32 %v7910_v20, 0.0 }
 0x5f1   :  { %v7849_v11 = vadd.f32 %v5633_v46, %v10160_v3  ;;  %v7913_v22 = vadd.f32 %v6019_v35, %v10163_v44  ;;  %v6145_v49 = vmax.f32 %v7847_v43, 0.0  ;;  %v6147_v26 = vmax.f32 %v7911_v12, 0.0 }
 0x5f2   :  { %v6148_v63 = vmax.f32 %v7848_v57, 0.0  ;;  %v6150_v7 = vmax.f32 %v7912_v16, 0.0 }
 0x5f3   :  { %v6149_v61 = vmax.f32 %v7849_v11, 0.0  ;;  %v6151_v42 = vmax.f32 %v7913_v22, 0.0 }
 0x5f4   :  { %v6216_v29 = vpack.c.bf16 %v6148_v63, %v6144_v13  ;;  %v6218_v28 = vpack.c.bf16 %v6150_v7, %v6146_v56 }
 0x5f5   :  { %v6217_v27 = vpack.c.bf16 %v6149_v61, %v6145_v49  ;;  %v6219_v41 = vpack.c.bf16 %v6151_v42, %v6147_v26  ;;  %v5637_v6 = vpop.f32.mrb[252].mxu0  ;;  %v6023_v37 = vpop.f32.mrb[252].mxu1 }
 0x5f6   :  { %v7850_v9 = vadd.f32 %v5637_v6, %v10154_v31  ;;  %v7914_v50 = vadd.f32 %v6023_v37, %v10157_v45  ;;  %v5639_v54 = vpop.f32.mrb[253].mxu0  ;;  %v6025_v58 = vpop.f32.mrb[253].mxu1 }
 0x5f7   :  { %v7851_v23 = vadd.f32 %v5639_v54, %v10160_v3  ;;  %v7915_v30 = vadd.f32 %v6025_v58, %v10163_v44  ;;  %v5641_v48 = vpop.f32.mrb[254].mxu0  ;;  %v6027_v14 = vpop.f32.mrb[254].mxu1  ;;  %6631 = vmatprep.mubr.bf16.mxu0 %v6217_v27  ;;  %6792 = vmatprep.mubr.bf16.mxu1 %v6219_v41 }
 0x5f8   :  { %v7852_v25 = vadd.f32 %v5641_v48, %v10154_v31  ;;  %v7916_v0 = vadd.f32 %v6027_v14, %v10157_v45  ;;  %v5643_v51 = vpop.f32.mrb[255].mxu0  ;;  %v6029_v15 = vpop.f32.mrb[255].mxu1  ;;  %6632 = vmatmul.mubr.bf16.gmra.mrb[56].mxu0 %v6216_v29  ;;  %6793 = vmatmul.mubr.bf16.gmra.mrb[56].mxu1 %v6218_v28  ;;  %v6152_v59 = vmax.f32 %v7850_v9, 0.0  ;;  %v6154_v5 = vmax.f32 %v7914_v50, 0.0 }
 0x5f9   :  { %v7853_v32 = vadd.f32 %v5643_v51, %v10160_v3  ;;  %v7917_v34 = vadd.f32 %v6029_v15, %v10163_v44  ;;  %v6153_v8 = vmax.f32 %v7851_v23, 0.0  ;;  %v6155_v1 = vmax.f32 %v7915_v30, 0.0  ;;  %v10296_v44 = vld [vmem:[%s10355_s10] ss:$0 sm:$0xff]  ;;  %s9149_s10 = smov [#allocation13]  }
 0x5fa   :  { %v6156_v55 = vmax.f32 %v7852_v25, 0.0  ;;  %v6158_v19 = vmax.f32 %v7916_v0, 0.0  ;;  %s6846_s24 = sshll.u32 %s9149_s10, 4  ;;  %s6847_s24 = int_to_ptr.vmem [resolvable:$true] %s6846_s24 }
 0x5fb   :  { %v6157_v39 = vmax.f32 %v7853_v32, 0.0  ;;  %v6159_v17 = vmax.f32 %v7917_v34, 0.0  ;;  %s9104_s3 = scalar_lea.vmem %s6847_s24, 4096  ;;  %p9109_p7 = scmp.lt.s32.totalorder %s6847_s24, %s6847_s24 }
 0x5fc   :  { %v6220_v47 = vpack.c.bf16 %v6156_v55, %v6152_v59  ;;  %v6222_v31 = vpack.c.bf16 %v6158_v19, %v6154_v5  ;;  %p9105_p6 = scmp.ne.s32.totalorder %s6847_s24, %s9104_s3  ;;  %p9110_p8 = scmp.lt.s32.totalorder %s9104_s3, %s9104_s3 }
 0x5fd   :  { %v6221_v4 = vpack.c.bf16 %v6157_v39, %v6153_v8  ;;  %v6223_v45 = vpack.c.bf16 %v6159_v17, %v6155_v1 }
 0x5fe   :  { %p9111_p9 = por %p9110_p8, %p9109_p7 }
 0x5ff   :  { %6639 = vmatprep.mubr.bf16.mxu0 %v6221_v4  ;;  %6800 = vmatprep.mubr.bf16.mxu1 %v6223_v45 }
 0x600   :  { %6640 = vmatmul.mubr.bf16.gmra.mrb[60].mxu0 %v6220_v47  ;;  %6801 = vmatmul.mubr.bf16.gmra.mrb[60].mxu1 %v6222_v31  ;;  %p9112_p10 = pnand %p9111_p9, %p9105_p6 }
 0x65b   :  { %v7326_v38 = vpop.f32.mrb[0].mxu0  ;;  %v7438_v3 = vpop.f32.mrb[0].mxu1 }
 0x65c   :  { %v7327_v18 = vpop.f32.mrb[1].mxu0  ;;  %v7439_v60 = vpop.f32.mrb[1].mxu1 }
 0x65d   :  { %v7328_v40 = vadd.f32 %v7327_v18, %v7326_v38  ;;  %v7440_v24 = vadd.f32 %v7439_v60, %v7438_v3  ;;  %v7329_v62 = vpop.f32.mrb[2].mxu0  ;;  %v7441_v53 = vpop.f32.mrb[2].mxu1 }
 0x65e   :  { %v7330_v33 = vpop.f32.mrb[3].mxu0  ;;  %v7442_v2 = vpop.f32.mrb[3].mxu1 }
 0x65f   :  { %v6522_v20 = vadd.f32 %v7328_v40, %v10296_v44  ;;  %v7331_v52 = vadd.f32 %v7330_v33, %v7329_v62  ;;  %v7443_v21 = vadd.f32 %v7442_v2, %v7441_v53 }
 0x661   :  { %v6683_v43 = vadd.f32 %v7440_v24, %v6522_v20  ;;  %v6525_v12 = vadd.f32 %v7331_v52, %v10296_v44 }
 0x663   :  { %6809 = vst [vmem:[#allocation13] sm:$0xff] %v6683_v43  ;;  %v6686_v36 = vadd.f32 %v7443_v21, %v6525_v12  ;;  %v7332_v10 = vpop.f32.mrb[4].mxu0  ;;  %v7444_v57 = vpop.f32.mrb[4].mxu1 }
 0x664   :  { %v7333_v16 = vpop.f32.mrb[5].mxu0  ;;  %v7445_v46 = vpop.f32.mrb[5].mxu1 }
 0x665   :  { %6810 = vst [vmem:[#allocation13 + $0x8] sm:$0xff] %v6686_v36  ;;  %v7334_v35 = vadd.f32 %v7333_v16, %v7332_v10  ;;  %v7446_v11 = vadd.f32 %v7445_v46, %v7444_v57  ;;  %v7335_v22 = vpop.f32.mrb[6].mxu0  ;;  %v7447_v13 = vpop.f32.mrb[6].mxu1 }
 0x666   :  { %v7336_v56 = vpop.f32.mrb[7].mxu0  ;;  %v7448_v63 = vpop.f32.mrb[7].mxu1 }
 0x667   :  { %v6530_v7 = vadd.f32 %v7334_v35, %v10296_v44  ;;  %v7337_v49 = vadd.f32 %v7336_v56, %v7335_v22  ;;  %v7449_v26 = vadd.f32 %v7448_v63, %v7447_v13 }
 0x669   :  { %v6691_v61 = vadd.f32 %v7446_v11, %v6530_v7  ;;  %v6533_v42 = vadd.f32 %v7337_v49, %v10296_v44 }
 0x66b   :  { %6811 = vst [vmem:[#allocation13 + $0x10] sm:$0xff] %v6691_v61  ;;  %v6694_v29 = vadd.f32 %v7449_v26, %v6533_v42  ;;  %v7338_v28 = vpop.f32.mrb[8].mxu0  ;;  %v7450_v27 = vpop.f32.mrb[8].mxu1 }
 0x66c   :  { %v7339_v41 = vpop.f32.mrb[9].mxu0  ;;  %v7451_v6 = vpop.f32.mrb[9].mxu1 }
 0x66d   :  { %6812 = vst [vmem:[#allocation13 + $0x18] sm:$0xff] %v6694_v29  ;;  %v7340_v37 = vadd.f32 %v7339_v41, %v7338_v28  ;;  %v7452_v9 = vadd.f32 %v7451_v6, %v7450_v27  ;;  %v7341_v50 = vpop.f32.mrb[10].mxu0  ;;  %v7453_v54 = vpop.f32.mrb[10].mxu1 }
 0x66e   :  { %v7342_v58 = vpop.f32.mrb[11].mxu0  ;;  %v7454_v23 = vpop.f32.mrb[11].mxu1 }
 0x66f   :  { %v6538_v30 = vadd.f32 %v7340_v37, %v10296_v44  ;;  %v7343_v48 = vadd.f32 %v7342_v58, %v7341_v50  ;;  %v7455_v14 = vadd.f32 %v7454_v23, %v7453_v54 }
 0x671   :  { %v6699_v25 = vadd.f32 %v7452_v9, %v6538_v30  ;;  %v6541_v0 = vadd.f32 %v7343_v48, %v10296_v44 }
 0x673   :  { %6813 = vst [vmem:[#allocation13 + $0x20] sm:$0xff] %v6699_v25  ;;  %v6702_v51 = vadd.f32 %v7455_v14, %v6541_v0  ;;  %v7344_v15 = vpop.f32.mrb[12].mxu0  ;;  %v7456_v32 = vpop.f32.mrb[12].mxu1 }
 0x674   :  { %v7345_v34 = vpop.f32.mrb[13].mxu0  ;;  %v7457_v59 = vpop.f32.mrb[13].mxu1 }
 0x675   :  { %6814 = vst [vmem:[#allocation13 + $0x28] sm:$0xff] %v6702_v51  ;;  %v7346_v5 = vadd.f32 %v7345_v34, %v7344_v15  ;;  %v7458_v55 = vadd.f32 %v7457_v59, %v7456_v32  ;;  %v7347_v19 = vpop.f32.mrb[14].mxu0  ;;  %v7459_v8 = vpop.f32.mrb[14].mxu1 }
 0x676   :  { %v7348_v1 = vpop.f32.mrb[15].mxu0  ;;  %v7460_v39 = vpop.f32.mrb[15].mxu1 }
 0x677   :  { %v6546_v17 = vadd.f32 %v7346_v5, %v10296_v44  ;;  %v7349_v47 = vadd.f32 %v7348_v1, %v7347_v19  ;;  %v7461_v31 = vadd.f32 %v7460_v39, %v7459_v8 }
 0x679   :  { %v6707_v4 = vadd.f32 %v7458_v55, %v6546_v17  ;;  %v6549_v45 = vadd.f32 %v7349_v47, %v10296_v44 }
 0x67b   :  { %6815 = vst [vmem:[#allocation13 + $0x30] sm:$0xff] %v6707_v4  ;;  %v6710_v38 = vadd.f32 %v7461_v31, %v6549_v45  ;;  %v7350_v3 = vpop.f32.mrb[16].mxu0  ;;  %v7462_v18 = vpop.f32.mrb[16].mxu1 }
 0x67c   :  { %v7351_v60 = vpop.f32.mrb[17].mxu0  ;;  %v7463_v40 = vpop.f32.mrb[17].mxu1 }
 0x67d   :  { %6816 = vst [vmem:[#allocation13 + $0x38] sm:$0xff] %v6710_v38  ;;  %v7352_v24 = vadd.f32 %v7351_v60, %v7350_v3  ;;  %v7464_v62 = vadd.f32 %v7463_v40, %v7462_v18  ;;  %v7353_v53 = vpop.f32.mrb[18].mxu0  ;;  %v7465_v33 = vpop.f32.mrb[18].mxu1 }
 0x67e   :  { %v7354_v2 = vpop.f32.mrb[19].mxu0  ;;  %v7466_v20 = vpop.f32.mrb[19].mxu1 }
 0x67f   :  { %v6554_v52 = vadd.f32 %v7352_v24, %v10296_v44  ;;  %v7355_v21 = vadd.f32 %v7354_v2, %v7353_v53  ;;  %v7467_v43 = vadd.f32 %v7466_v20, %v7465_v33 }
 0x681   :  { %v6715_v12 = vadd.f32 %v7464_v62, %v6554_v52  ;;  %v6557_v36 = vadd.f32 %v7355_v21, %v10296_v44 }
 0x683   :  { %6817 = vst [vmem:[#allocation13 + $0x40] sm:$0xff] %v6715_v12  ;;  %v6718_v10 = vadd.f32 %v7467_v43, %v6557_v36  ;;  %v7356_v57 = vpop.f32.mrb[20].mxu0  ;;  %v7468_v16 = vpop.f32.mrb[20].mxu1 }
 0x684   :  { %v7357_v46 = vpop.f32.mrb[21].mxu0  ;;  %v7469_v35 = vpop.f32.mrb[21].mxu1 }
 0x685   :  { %6818 = vst [vmem:[#allocation13 + $0x48] sm:$0xff] %v6718_v10  ;;  %v7358_v11 = vadd.f32 %v7357_v46, %v7356_v57  ;;  %v7470_v22 = vadd.f32 %v7469_v35, %v7468_v16  ;;  %v7359_v13 = vpop.f32.mrb[22].mxu0  ;;  %v7471_v56 = vpop.f32.mrb[22].mxu1 }
 0x686   :  { %v7360_v63 = vpop.f32.mrb[23].mxu0  ;;  %v7472_v7 = vpop.f32.mrb[23].mxu1 }
 0x687   :  { %v6562_v49 = vadd.f32 %v7358_v11, %v10296_v44  ;;  %v7361_v26 = vadd.f32 %v7360_v63, %v7359_v13  ;;  %v7473_v61 = vadd.f32 %v7472_v7, %v7471_v56 }
 0x689   :  { %v6723_v42 = vadd.f32 %v7470_v22, %v6562_v49  ;;  %v6565_v29 = vadd.f32 %v7361_v26, %v10296_v44 }
 0x68b   :  { %6819 = vst [vmem:[#allocation13 + $0x50] sm:$0xff] %v6723_v42  ;;  %v6726_v28 = vadd.f32 %v7473_v61, %v6565_v29  ;;  %v7362_v27 = vpop.f32.mrb[24].mxu0  ;;  %v7474_v41 = vpop.f32.mrb[24].mxu1 }
 0x68c   :  { %v7363_v6 = vpop.f32.mrb[25].mxu0  ;;  %v7475_v37 = vpop.f32.mrb[25].mxu1 }
 0x68d   :  { %6820 = vst [vmem:[#allocation13 + $0x58] sm:$0xff] %v6726_v28  ;;  %v7364_v9 = vadd.f32 %v7363_v6, %v7362_v27  ;;  %v7476_v50 = vadd.f32 %v7475_v37, %v7474_v41  ;;  %v7365_v54 = vpop.f32.mrb[26].mxu0  ;;  %v7477_v58 = vpop.f32.mrb[26].mxu1 }
 0x68e   :  { %v7366_v23 = vpop.f32.mrb[27].mxu0  ;;  %v7478_v30 = vpop.f32.mrb[27].mxu1 }
 0x68f   :  { %v6570_v48 = vadd.f32 %v7364_v9, %v10296_v44  ;;  %v7367_v14 = vadd.f32 %v7366_v23, %v7365_v54  ;;  %v7479_v25 = vadd.f32 %v7478_v30, %v7477_v58 }
 0x691   :  { %v6731_v0 = vadd.f32 %v7476_v50, %v6570_v48  ;;  %v6573_v51 = vadd.f32 %v7367_v14, %v10296_v44 }
 0x693   :  { %6821 = vst [vmem:[#allocation13 + $0x60] sm:$0xff] %v6731_v0  ;;  %v6734_v15 = vadd.f32 %v7479_v25, %v6573_v51  ;;  %v7368_v32 = vpop.f32.mrb[28].mxu0  ;;  %v7480_v34 = vpop.f32.mrb[28].mxu1 }
 0x694   :  { %v7369_v59 = vpop.f32.mrb[29].mxu0  ;;  %v7481_v5 = vpop.f32.mrb[29].mxu1 }
 0x695   :  { %6822 = vst [vmem:[#allocation13 + $0x68] sm:$0xff] %v6734_v15  ;;  %v7370_v55 = vadd.f32 %v7369_v59, %v7368_v32  ;;  %v7482_v19 = vadd.f32 %v7481_v5, %v7480_v34  ;;  %v7371_v8 = vpop.f32.mrb[30].mxu0  ;;  %v7483_v1 = vpop.f32.mrb[30].mxu1 }
 0x696   :  { %v7372_v39 = vpop.f32.mrb[31].mxu0  ;;  %v7484_v17 = vpop.f32.mrb[31].mxu1 }
 0x697   :  { %v6578_v47 = vadd.f32 %v7370_v55, %v10296_v44  ;;  %v7373_v31 = vadd.f32 %v7372_v39, %v7371_v8  ;;  %v7485_v4 = vadd.f32 %v7484_v17, %v7483_v1 }
 0x699   :  { %v6739_v45 = vadd.f32 %v7482_v19, %v6578_v47  ;;  %v6581_v38 = vadd.f32 %v7373_v31, %v10296_v44 }
 0x69b   :  { %6823 = vst [vmem:[#allocation13 + $0x70] sm:$0xff] %v6739_v45  ;;  %v6742_v3 = vadd.f32 %v7485_v4, %v6581_v38  ;;  %v7374_v18 = vpop.f32.mrb[32].mxu0  ;;  %v7486_v60 = vpop.f32.mrb[32].mxu1 }
 0x69c   :  { %v7375_v40 = vpop.f32.mrb[33].mxu0  ;;  %v7487_v24 = vpop.f32.mrb[33].mxu1 }
 0x69d   :  { %6824 = vst [vmem:[#allocation13 + $0x78] sm:$0xff] %v6742_v3  ;;  %v7376_v62 = vadd.f32 %v7375_v40, %v7374_v18  ;;  %v7488_v53 = vadd.f32 %v7487_v24, %v7486_v60  ;;  %v7377_v33 = vpop.f32.mrb[34].mxu0  ;;  %v7489_v2 = vpop.f32.mrb[34].mxu1 }
 0x69e   :  { %v7378_v20 = vpop.f32.mrb[35].mxu0  ;;  %v7490_v52 = vpop.f32.mrb[35].mxu1 }
 0x69f   :  { %v6586_v21 = vadd.f32 %v7376_v62, %v10296_v44  ;;  %v7379_v43 = vadd.f32 %v7378_v20, %v7377_v33  ;;  %v7491_v12 = vadd.f32 %v7490_v52, %v7489_v2 }
 0x6a1   :  { %v6747_v36 = vadd.f32 %v7488_v53, %v6586_v21  ;;  %v6589_v10 = vadd.f32 %v7379_v43, %v10296_v44 }
 0x6a3   :  { %6825 = vst [vmem:[#allocation13 + $0x80] sm:$0xff] %v6747_v36  ;;  %v6750_v57 = vadd.f32 %v7491_v12, %v6589_v10  ;;  %v7380_v16 = vpop.f32.mrb[36].mxu0  ;;  %v7492_v46 = vpop.f32.mrb[36].mxu1 }
 0x6a4   :  { %v7381_v35 = vpop.f32.mrb[37].mxu0  ;;  %v7493_v11 = vpop.f32.mrb[37].mxu1 }
 0x6a5   :  { %6826 = vst [vmem:[#allocation13 + $0x88] sm:$0xff] %v6750_v57  ;;  %v7382_v22 = vadd.f32 %v7381_v35, %v7380_v16  ;;  %v7494_v13 = vadd.f32 %v7493_v11, %v7492_v46  ;;  %v7383_v56 = vpop.f32.mrb[38].mxu0  ;;  %v7495_v63 = vpop.f32.mrb[38].mxu1 }
 0x6a6   :  { %v7384_v7 = vpop.f32.mrb[39].mxu0  ;;  %v7496_v49 = vpop.f32.mrb[39].mxu1 }
 0x6a7   :  { %v6594_v26 = vadd.f32 %v7382_v22, %v10296_v44  ;;  %v7385_v61 = vadd.f32 %v7384_v7, %v7383_v56  ;;  %v7497_v42 = vadd.f32 %v7496_v49, %v7495_v63 }
 0x6a9   :  { %v6755_v29 = vadd.f32 %v7494_v13, %v6594_v26  ;;  %v6597_v28 = vadd.f32 %v7385_v61, %v10296_v44 }
 0x6ab   :  { %6827 = vst [vmem:[#allocation13 + $0x90] sm:$0xff] %v6755_v29  ;;  %v6758_v27 = vadd.f32 %v7497_v42, %v6597_v28  ;;  %v7386_v41 = vpop.f32.mrb[40].mxu0  ;;  %v7498_v6 = vpop.f32.mrb[40].mxu1 }
 0x6ac   :  { %v7387_v37 = vpop.f32.mrb[41].mxu0  ;;  %v7499_v9 = vpop.f32.mrb[41].mxu1 }
 0x6ad   :  { %6828 = vst [vmem:[#allocation13 + $0x98] sm:$0xff] %v6758_v27  ;;  %v7388_v50 = vadd.f32 %v7387_v37, %v7386_v41  ;;  %v7500_v54 = vadd.f32 %v7499_v9, %v7498_v6  ;;  %v7389_v58 = vpop.f32.mrb[42].mxu0  ;;  %v7501_v23 = vpop.f32.mrb[42].mxu1 }
 0x6ae   :  { %v7390_v30 = vpop.f32.mrb[43].mxu0  ;;  %v7502_v48 = vpop.f32.mrb[43].mxu1 }
 0x6af   :  { %v6602_v14 = vadd.f32 %v7388_v50, %v10296_v44  ;;  %v7391_v25 = vadd.f32 %v7390_v30, %v7389_v58  ;;  %v7503_v0 = vadd.f32 %v7502_v48, %v7501_v23 }
 0x6b1   :  { %v6763_v51 = vadd.f32 %v7500_v54, %v6602_v14  ;;  %v6605_v15 = vadd.f32 %v7391_v25, %v10296_v44 }
 0x6b3   :  { %6829 = vst [vmem:[#allocation13 + $0xa0] sm:$0xff] %v6763_v51  ;;  %v6766_v32 = vadd.f32 %v7503_v0, %v6605_v15  ;;  %v7392_v34 = vpop.f32.mrb[44].mxu0  ;;  %v7504_v59 = vpop.f32.mrb[44].mxu1 }
 0x6b4   :  { %v7393_v5 = vpop.f32.mrb[45].mxu0  ;;  %v7505_v55 = vpop.f32.mrb[45].mxu1 }
 0x6b5   :  { %6830 = vst [vmem:[#allocation13 + $0xa8] sm:$0xff] %v6766_v32  ;;  %v7394_v19 = vadd.f32 %v7393_v5, %v7392_v34  ;;  %v7506_v8 = vadd.f32 %v7505_v55, %v7504_v59  ;;  %v7395_v1 = vpop.f32.mrb[46].mxu0  ;;  %v7507_v39 = vpop.f32.mrb[46].mxu1 }
 0x6b6   :  { %v7396_v17 = vpop.f32.mrb[47].mxu0  ;;  %v7508_v47 = vpop.f32.mrb[47].mxu1 }
 0x6b7   :  { %v6610_v31 = vadd.f32 %v7394_v19, %v10296_v44  ;;  %v7397_v4 = vadd.f32 %v7396_v17, %v7395_v1  ;;  %v7509_v45 = vadd.f32 %v7508_v47, %v7507_v39 }
 0x6b9   :  { %v6771_v38 = vadd.f32 %v7506_v8, %v6610_v31  ;;  %v6613_v3 = vadd.f32 %v7397_v4, %v10296_v44 }
 0x6bb   :  { %6831 = vst [vmem:[#allocation13 + $0xb0] sm:$0xff] %v6771_v38  ;;  %v6774_v18 = vadd.f32 %v7509_v45, %v6613_v3  ;;  %v7398_v60 = vpop.f32.mrb[48].mxu0  ;;  %v7510_v40 = vpop.f32.mrb[48].mxu1 }
 0x6bc   :  { %v7399_v24 = vpop.f32.mrb[49].mxu0  ;;  %v7511_v62 = vpop.f32.mrb[49].mxu1 }
 0x6bd   :  { %6832 = vst [vmem:[#allocation13 + $0xb8] sm:$0xff] %v6774_v18  ;;  %v7400_v53 = vadd.f32 %v7399_v24, %v7398_v60  ;;  %v7512_v33 = vadd.f32 %v7511_v62, %v7510_v40  ;;  %v7401_v2 = vpop.f32.mrb[50].mxu0  ;;  %v7513_v20 = vpop.f32.mrb[50].mxu1 }
 0x6be   :  { %v7402_v52 = vpop.f32.mrb[51].mxu0  ;;  %v7514_v21 = vpop.f32.mrb[51].mxu1 }
 0x6bf   :  { %v6618_v43 = vadd.f32 %v7400_v53, %v10296_v44  ;;  %v7403_v12 = vadd.f32 %v7402_v52, %v7401_v2  ;;  %v7515_v36 = vadd.f32 %v7514_v21, %v7513_v20 }
 0x6c1   :  { %v6779_v10 = vadd.f32 %v7512_v33, %v6618_v43  ;;  %v6621_v57 = vadd.f32 %v7403_v12, %v10296_v44 }
 0x6c3   :  { %6833 = vst [vmem:[#allocation13 + $0xc0] sm:$0xff] %v6779_v10  ;;  %v6782_v16 = vadd.f32 %v7515_v36, %v6621_v57  ;;  %v7404_v46 = vpop.f32.mrb[52].mxu0  ;;  %v7516_v35 = vpop.f32.mrb[52].mxu1 }
 0x6c4   :  { %v7405_v11 = vpop.f32.mrb[53].mxu0  ;;  %v7517_v22 = vpop.f32.mrb[53].mxu1 }
 0x6c5   :  { %6834 = vst [vmem:[#allocation13 + $0xc8] sm:$0xff] %v6782_v16  ;;  %v7406_v13 = vadd.f32 %v7405_v11, %v7404_v46  ;;  %v7518_v56 = vadd.f32 %v7517_v22, %v7516_v35  ;;  %v7407_v63 = vpop.f32.mrb[54].mxu0  ;;  %v7519_v7 = vpop.f32.mrb[54].mxu1 }
 0x6c6   :  { %v7408_v49 = vpop.f32.mrb[55].mxu0  ;;  %v7520_v26 = vpop.f32.mrb[55].mxu1 }
 0x6c7   :  { %v6626_v61 = vadd.f32 %v7406_v13, %v10296_v44  ;;  %v7409_v42 = vadd.f32 %v7408_v49, %v7407_v63  ;;  %v7521_v29 = vadd.f32 %v7520_v26, %v7519_v7 }
 0x6c9   :  { %v6787_v28 = vadd.f32 %v7518_v56, %v6626_v61  ;;  %v6629_v27 = vadd.f32 %v7409_v42, %v10296_v44 }
 0x6cb   :  { %6835 = vst [vmem:[#allocation13 + $0xd0] sm:$0xff] %v6787_v28  ;;  %v6790_v41 = vadd.f32 %v7521_v29, %v6629_v27  ;;  %v7410_v6 = vpop.f32.mrb[56].mxu0  ;;  %v7522_v37 = vpop.f32.mrb[56].mxu1 }
 0x6cc   :  { %v7411_v9 = vpop.f32.mrb[57].mxu0  ;;  %v7523_v50 = vpop.f32.mrb[57].mxu1 }
 0x6cd   :  { %6836 = vst [vmem:[#allocation13 + $0xd8] sm:$0xff] %v6790_v41  ;;  %v7412_v54 = vadd.f32 %v7411_v9, %v7410_v6  ;;  %v7524_v58 = vadd.f32 %v7523_v50, %v7522_v37  ;;  %v7413_v23 = vpop.f32.mrb[58].mxu0  ;;  %v7525_v30 = vpop.f32.mrb[58].mxu1 }
 0x6ce   :  { %v7414_v48 = vpop.f32.mrb[59].mxu0  ;;  %v7526_v14 = vpop.f32.mrb[59].mxu1 }
 0x6cf   :  { %v6634_v25 = vadd.f32 %v7412_v54, %v10296_v44  ;;  %v7415_v0 = vadd.f32 %v7414_v48, %v7413_v23  ;;  %v7527_v51 = vadd.f32 %v7526_v14, %v7525_v30 }
 0x6d1   :  { %v6795_v15 = vadd.f32 %v7524_v58, %v6634_v25  ;;  %v6637_v32 = vadd.f32 %v7415_v0, %v10296_v44 }
 0x6d3   :  { %6837 = vst [vmem:[#allocation13 + $0xe0] sm:$0xff] %v6795_v15  ;;  %v6798_v34 = vadd.f32 %v7527_v51, %v6637_v32  ;;  %v7416_v59 = vpop.f32.mrb[60].mxu0  ;;  %v7528_v5 = vpop.f32.mrb[60].mxu1 }
 0x6d4   :  { %v7417_v55 = vpop.f32.mrb[61].mxu0  ;;  %v7529_v19 = vpop.f32.mrb[61].mxu1 }
 0x6d5   :  { %6838 = vst [vmem:[#allocation13 + $0xe8] sm:$0xff] %v6798_v34  ;;  %v7418_v8 = vadd.f32 %v7417_v55, %v7416_v59  ;;  %v7530_v1 = vadd.f32 %v7529_v19, %v7528_v5  ;;  %v7419_v39 = vpop.f32.mrb[62].mxu0  ;;  %v7531_v17 = vpop.f32.mrb[62].mxu1 }
 0x6d6   :  { %v7420_v47 = vpop.f32.mrb[63].mxu0  ;;  %v7532_v31 = vpop.f32.mrb[63].mxu1 }
 0x6d7   :  { %v6642_v4 = vadd.f32 %v7418_v8, %v10296_v44  ;;  %v7421_v45 = vadd.f32 %v7420_v47, %v7419_v39  ;;  %v7533_v38 = vadd.f32 %v7532_v31, %v7531_v17 }
 0x6d9   :  { %v6803_v3 = vadd.f32 %v7530_v1, %v6642_v4  ;;  %v6645_v18 = vadd.f32 %v7421_v45, %v10296_v44 }
 0x6db   :  { %6839 = vst [vmem:[#allocation13 + $0xf0] sm:$0xff] %v6803_v3  ;;  %v6806_v60 = vadd.f32 %v7533_v38, %v6645_v18 }
 0x6dd   :  { %6840 = vst [vmem:[#allocation13 + $0xf8] sm:$0xff] %v6806_v60 }
 0x6de   :  { %9115 = shalt.err (!%p9112_p10)
}
 0x6df   :  { %s9116_s26 = scalar_lea.hbm %s10356_s11, 4096 }
 0x6e0   :  { %p9117_p11 = scmp.ne.s32.totalorder %s10356_s11, %s9116_s26  ;;  %p9120_p12 = scmp.lt.u32.totalorder %s9116_s26, %s10356_s11 }
 0x6e2   :  { %p9122_p13 = pnand %p9120_p12, %p9117_p11 }
 0x6e4   :  { %9125 = shalt.err (!%p9122_p13)
}
 0x6e5   :  { %6852 = dma.vmem_to_hbm [thread:$0]  %s6847_s24, 4096, %s10356_s11, [#allocation4], %s9141_s5, %s9141_s5, %s9142_s13  }
 0x6e6   :  { %9134 = dma.done.wait [#allocation4], 4096  }
 0x6e7   :  { %9135 = vsyncadd [#allocation4], 4294963200 }
 0x6e8   :  { %6856 = vsyncpa [#allocation3], 1 }
 0x6e9   :  { %6857 = vsyncpa [#allocation6], 1 }
 0x6ea   :  { %6858 = vsyncpa [#allocation9], 1 }
 0x6eb   :  { %6859 = vsyncpa [#allocation12], 1 }
 0x6ec   :  { %6860 = vsyncpa [#allocation4], 1 }

</bundles_post_ra>
